<compile_context>
chip_gen: v6e
topology: v6e:2x2x1
jax: 0.10.0
libtpu: 0.0.40
codegen_flags: <defaults>
</compile_context>

<pallas_src>
import functools
import math

import jax
import jax.numpy as jnp
from jax.experimental import pallas as pl
from jax.experimental.pallas import tpu as pltpu

BN_EPS = 1e-5
_VMEM_LIMIT = 48 * 1024 * 1024


def _cout_tile(cout):
    # Lane-dense 128-wide Cout tiles at real sizes; whole Cout for small /
    # ragged channel counts (toy test: Cout=8 -> one tile).
    return 128 if cout % 128 == 0 else cout


# ------------------- conv (+ optional fused BN/ReLU on input) + stats --------
def _conv_stats_kernel(*refs, H, W, fuse_bn_relu):
    """3x3 conv for one image / one Cout tile + per-channel sum & sumsq.

    refs (fused):      x, scale, shift, w, y, sum, sq, xp, xs, acc
    refs (not fused):  x,               w, y, sum, sq, xp, xs, acc

    x_ref    : (1, H, W, Cin)    NHWC activation tile (pre-BN if fused)
    scale/shift: (1, Cin)        previous block's folded BN scale / shift
    w_ref    : (3, 3, Cin, TC)   conv weights (HWIO), one Cout tile
    y_ref    : (1, H*W, TC)      pre-BN conv output (flattened spatial)
    sum_ref  : (1, TC)           running per-channel sum   (resident over batch)
    sq_ref   : (1, TC)           running per-channel sumsq (resident over batch)
    xp_ref   : (H+2, W+2, Cin)   VMEM scratch: zero-padded image
    xs_ref   : (H+2, W, Cin)     VMEM scratch: column-shifted window (per dx)
    acc_ref  : (H*W, TC) f32     VMEM scratch: conv accumulator
    """
    if fuse_bn_relu:
        (x_ref, scale_ref, shift_ref, w_ref,
         y_ref, sum_ref, sq_ref, xp_ref, xs_ref, acc_ref) = refs
    else:
        (x_ref, w_ref,
         y_ref, sum_ref, sq_ref, xp_ref, xs_ref, acc_ref) = refs

    Cin = x_ref.shape[-1]

    # Zero-pad into VMEM (replaces a jnp.pad HBM round trip per block).
    xp_ref[...] = jnp.zeros_like(xp_ref)
    x = x_ref[0]                                      # (H, W, Cin)
    if fuse_bn_relu:
        # Previous block's BN (batch statistics, folded) + ReLU fused into this
        # conv's input read: one FMA + max per element, no extra HBM traffic.
        scale = scale_ref[...].reshape(1, 1, Cin)
        shift = shift_ref[...].reshape(1, 1, Cin)
        x = jnp.maximum(x * scale + shift, 0.0)
    xp_ref[1:H + 1, 1:W + 1, :] = x.astype(xp_ref.dtype)

    # 3x3 conv as 9 shifted matmuls on the MXU, accumulated into a VMEM f32
    # scratch.  The unaligned column (sublane) shift is done once per dx into
    # xs_ref (3 relayouts instead of 9); per-tap slices are then outer-dim only
    # and the reshape is layout-preserving for W % 8 == 0.
    for dx in range(3):
        xs_ref[...] = xp_ref[:, dx:dx + W, :]
        for dy in range(3):
            patch = xs_ref[dy:dy + H, :, :].reshape(H * W, Cin)
            contrib = jnp.dot(patch.astype(w_ref.dtype), w_ref[dy, dx],
                              preferred_element_type=jnp.float32)
            if dx == 0 and dy == 0:
                acc_ref[...] = contrib
            else:
                acc_ref[...] += contrib

    y = acc_ref[...]                                  # (H*W, TC) f32
    y_ref[0] = y.astype(y_ref.dtype)                  # lane-dense, no reshape

    # Batch statistics accumulated across the inner ("arbitrary") batch axis.
    @pl.when(pl.program_id(1) == 0)
    def _():
        sum_ref[...] = jnp.zeros_like(sum_ref)
        sq_ref[...] = jnp.zeros_like(sq_ref)

    sum_ref[...] += jnp.sum(y, axis=0, keepdims=True)
    sq_ref[...] += jnp.sum(y * y, axis=0, keepdims=True)


def _conv_stats(x_nhwc, w, scale=None, shift=None):
    """Conv(3x3, pad 1) of (optionally BN+ReLU'd) x; returns y, sum, sumsq."""
    N, H, W, Cin = x_nhwc.shape
    Cout = w.shape[-1]
    TC = _cout_tile(Cout)
    n_ct = Cout // TC
    HW = H * W
    fuse = scale is not None

    kernel = functools.partial(_conv_stats_kernel, H=H, W=W, fuse_bn_relu=fuse)

    in_specs = [pl.BlockSpec((1, H, W, Cin), lambda j, b: (b, 0, 0, 0))]
    operands = [x_nhwc]
    if fuse:
        in_specs += [pl.BlockSpec((1, Cin), lambda j, b: (0, 0)),
                     pl.BlockSpec((1, Cin), lambda j, b: (0, 0))]
        operands += [scale, shift]
    in_specs += [pl.BlockSpec((3, 3, Cin, TC), lambda j, b: (0, 0, 0, j))]
    operands += [w]

    return pl.pallas_call(
        kernel,
        out_shape=(
            jax.ShapeDtypeStruct((N, HW, Cout), jnp.float32),  # pre-BN conv out
            jax.ShapeDtypeStruct((1, Cout), jnp.float32),      # per-channel sum
            jax.ShapeDtypeStruct((1, Cout), jnp.float32),      # per-channel sumsq
        ),
        grid_spec=pltpu.PrefetchScalarGridSpec(
            num_scalar_prefetch=0,
            grid=(n_ct, N),                       # Cout tiles outer, batch inner
            in_specs=in_specs,
            out_specs=(
                pl.BlockSpec((1, HW, TC), lambda j, b: (b, 0, j)),
                pl.BlockSpec((1, TC), lambda j, b: (0, j)),    # resident over b
                pl.BlockSpec((1, TC), lambda j, b: (0, j)),    # resident over b
            ),
            scratch_shapes=[
                pltpu.VMEM((H + 2, W + 2, Cin), w.dtype),
                pltpu.VMEM((H + 2, W, Cin), w.dtype),
                pltpu.VMEM((HW, TC), jnp.float32),
            ],
        ),
        compiler_params=pltpu.CompilerParams(
            dimension_semantics=("parallel", "arbitrary"),
            vmem_limit_bytes=_VMEM_LIMIT,
        ),
    )(*operands)


# --------------------- final fused BN scale/shift + ReLU ---------------------
def _bn_relu_kernel(y_ref, scale_ref, shift_ref, o_ref):
    y = y_ref[0]                                       # (H*W, TC)
    o_ref[0] = jnp.maximum(y * scale_ref[0] + shift_ref[0], 0.0).astype(o_ref.dtype)


def _bn_relu(y, scale, shift):
    N, HW, Cout = y.shape
    TC = _cout_tile(Cout)
    n_ct = Cout // TC
    return pl.pallas_call(
        _bn_relu_kernel,
        out_shape=jax.ShapeDtypeStruct((N, HW, Cout), jnp.float32),
        grid_spec=pltpu.PrefetchScalarGridSpec(
            num_scalar_prefetch=0,
            grid=(n_ct, N),
            in_specs=[
                pl.BlockSpec((1, HW, TC), lambda j, b: (b, 0, j)),
                pl.BlockSpec((1, TC), lambda j, b: (0, j)),
                pl.BlockSpec((1, TC), lambda j, b: (0, j)),
            ],
            out_specs=pl.BlockSpec((1, HW, TC), lambda j, b: (b, 0, j)),
        ),
        compiler_params=pltpu.CompilerParams(
            dimension_semantics=("parallel", "parallel"),
            vmem_limit_bytes=_VMEM_LIMIT,
        ),
    )(y, scale, shift)


# -------------------------------- Bridge -------------------------------------
def _bn_scale_shift(s, sq, g, be, *, count):
    """Fold training-mode batch-stat BN into a per-channel scale/shift FMA."""
    inv = 1.0 / float(count)
    mean = s * inv
    var = jnp.maximum(sq * inv - mean * mean, 0.0)
    scale = g * jax.lax.rsqrt(var + BN_EPS)
    shift = be - mean * scale
    return scale, shift


def bridge_forward(x_nchw, params, *, matmul_dtype=jnp.float32):
    """Bridge forward pass.  Input/output are NCHW to match PyTorch.

    BatchNorm uses training-mode batch statistics (as nn.BatchNorm2d does in
    .train()); running-stat buffers are not modelled.  matmul_dtype=bf16
    halves conv weight/patch traffic (keep f32 for bit-tight parity).
    """
    x = jnp.transpose(x_nchw, (0, 2, 3, 1)).astype(jnp.float32)  # NCHW -> NHWC
    N, H, W, _ = x.shape
    w1 = params["w1"].astype(matmul_dtype)
    w2 = params["w2"].astype(matmul_dtype)
    C1, C2 = w1.shape[-1], w2.shape[-1]
    count = N * H * W
    # params["b1"]/["b2"] (conv biases) are intentionally unused: they cancel
    # exactly under training-mode batch-statistics BatchNorm.

    # ConvBlock 1: conv + batch stats.
    y1, s1, sq1 = _conv_stats(x, w1)
    scale1, shift1 = _bn_scale_shift(s1, sq1, params["g1"], params["be1"],
                                     count=count)

    # ConvBlock 2: BN1+ReLU1 fused into conv2's input read (saves one full HBM
    # round trip of the intermediate activation) + conv2 + batch stats.
    y2, s2, sq2 = _conv_stats(y1.reshape(N, H, W, C1), w2, scale1, shift1)
    scale2, shift2 = _bn_scale_shift(s2, sq2, params["g2"], params["be2"],
                                     count=count)

    # Final BN2 + ReLU2.
    out = _bn_relu(y2, scale2, shift2)
    return jnp.transpose(out.reshape(N, H, W, C2), (0, 3, 1, 2))  # NHWC -> NCHW


# --------------------------- pure-JAX reference ------------------------------
def _ref_bridge(x_nchw, params):
    x = jnp.transpose(x_nchw, (0, 2, 3, 1)).astype(jnp.float32)

    def block(h, w, b, g, be):
        y = jax.lax.conv_general_dilated(
            h, w, window_strides=(1, 1), padding="SAME",
            dimension_numbers=("NHWC", "HWIO", "NHWC"),
        ) + b[0]
        mean = jnp.mean(y, axis=(0, 1, 2), keepdims=True)
        var = jnp.mean((y - mean) ** 2, axis=(0, 1, 2), keepdims=True)
        y_hat = (y - mean) * jax.lax.rsqrt(var + BN_EPS)
        return jnp.maximum(y_hat * g[0] + be[0], 0.0)

    h = block(x, params["w1"], params["b1"], params["g1"], params["be1"])
    h = block(h, params["w2"], params["b2"], params["g2"], params["be2"])
    return jnp.transpose(h, (0, 3, 1, 2))


# --------------------------- deterministic init ------------------------------
def _init_conv(key, cin, cout):
    kw, kb = jax.random.split(key)
    bound = 1.0 / math.sqrt(cin * 9)  # PyTorch Conv2d default fan-in bound
    w = jax.random.uniform(kw, (3, 3, cin, cout), jnp.float32, -bound, bound)
    b = jax.random.uniform(kb, (1, cout), jnp.float32, -bound, bound)
    return w, b


def make_params(key, in_channels, out_channels):
    k1, k2 = jax.random.split(key)
    w1, b1 = _init_conv(k1, in_channels, out_channels)
    w2, b2 = _init_conv(k2, out_channels, out_channels)
    return {
        "w1": w1, "b1": b1,
        "g1": jnp.ones((1, out_channels), jnp.float32),
        "be1": jnp.zeros((1, out_channels), jnp.float32),
        "w2": w2, "b2": b2,
        "g2": jnp.ones((1, out_channels), jnp.float32),
        "be2": jnp.zeros((1, out_channels), jnp.float32),
    }


if __name__ == "__main__":
    key = jax.random.PRNGKey(0)
    kx, kp = jax.random.split(key)

    N, Cin, Cout, H, W = 2, 4, 8, 16, 16
    x = jax.random.normal(kx, (N, Cin, H, W), jnp.float32)  # NCHW like PyTorch
    params = make_params(kp, Cin, Cout)

    out = jax.block_until_ready(bridge_forward(x, params))
    ref = jax.block_until_ready(_ref_bridge(x, params))

    assert out.shape == (N, Cout, H, W)
    assert jnp.allclose(out, ref, atol=1e-4, rtol=1e-4), "mismatch vs reference"

    print("KERNEL_OK")
</pallas_src>

<mosaic_0001>
module attributes {stable_mosaic.version = 11 : i64} {
  func.func @_conv_stats_kernel(%arg0: i32, %arg1: i32, %arg2: memref<1x16x16x4xf32, #tpu.memory_space<vmem>>, %arg3: memref<3x3x4x8xf32, #tpu.memory_space<vmem>>, %arg4: memref<1x256x8xf32, #tpu.memory_space<vmem>>, %arg5: memref<1x8xf32, #tpu.memory_space<vmem>>, %arg6: memref<1x8xf32, #tpu.memory_space<vmem>>, %arg7: memref<18x18x4xf32, #tpu.memory_space<vmem>>, %arg8: memref<18x16x4xf32, #tpu.memory_space<vmem>>, %arg9: memref<256x8xf32, #tpu.memory_space<vmem>>) attributes {dimension_semantics = [#tpu.dimension_semantics<parallel>, #tpu.dimension_semantics<arbitrary>], iteration_bounds = array<i64: 1, 2>, scalar_prefetch = 0 : i64, scratch_operands = 3 : i64, tpu.core_type = #tpu.core_type<tc>, window_params = [{transform_indices = @transform_0, window_bounds = array<i64: 1, 16, 16, 4>}, {transform_indices = @transform_1, window_bounds = array<i64: 3, 3, 4, 8>}, {transform_indices = @transform_2, window_bounds = array<i64: 1, 256, 8>}, {transform_indices = @transform_3, window_bounds = array<i64: 1, 8>}, {transform_indices = @transform_4, window_bounds = array<i64: 1, 8>}]} {
    %cst = arith.constant 0.000000e+00 : f32
    %0 = vector.broadcast %cst : f32 to vector<18x18x4xf32>
    %c0 = arith.constant 0 : index
    %c0_0 = arith.constant 0 : index
    %c0_1 = arith.constant 0 : index
    %1 = vector.load %arg7[%c0, %c0_0, %c0_1] : memref<18x18x4xf32, #tpu.memory_space<vmem>>, vector<18x18x4xf32>
    tpu.vector_store %arg7[%c0, %c0_0, %c0_1], %0 {strides = array<i32>} : memref<18x18x4xf32, #tpu.memory_space<vmem>>, vector<18x18x4xf32>,
    %c0_2 = arith.constant 0 : index
    %c0_3 = arith.constant 0 : index
    %c0_4 = arith.constant 0 : index
    %c0_5 = arith.constant 0 : index
    %2 = vector.load %arg2[%c0_2, %c0_3, %c0_4, %c0_5] : memref<1x16x16x4xf32, #tpu.memory_space<vmem>>, vector<1x16x16x4xf32>
    %3 = vector.shape_cast %2 : vector<1x16x16x4xf32> to vector<16x16x4xf32>
    %c1 = arith.constant 1 : index
    %c1_6 = arith.constant 1 : index
    %c0_7 = arith.constant 0 : index
    %4 = vector.load %arg7[%c1, %c1_6, %c0_7] : memref<18x18x4xf32, #tpu.memory_space<vmem>>, vector<16x16x4xf32>
    tpu.vector_store %arg7[%c1, %c1_6, %c0_7], %3 {strides = array<i32>} : memref<18x18x4xf32, #tpu.memory_space<vmem>>, vector<16x16x4xf32>,
    %c0_8 = arith.constant 0 : index
    %c0_9 = arith.constant 0 : index
    %c0_10 = arith.constant 0 : index
    %5 = vector.load %arg7[%c0_8, %c0_9, %c0_10] : memref<18x18x4xf32, #tpu.memory_space<vmem>>, vector<18x16x4xf32>
    %c0_11 = arith.constant 0 : index
    %c0_12 = arith.constant 0 : index
    %c0_13 = arith.constant 0 : index
    %6 = vector.load %arg8[%c0_11, %c0_12, %c0_13] : memref<18x16x4xf32, #tpu.memory_space<vmem>>, vector<18x16x4xf32>
    tpu.vector_store %arg8[%c0_11, %c0_12, %c0_13], %5 {strides = array<i32>} : memref<18x16x4xf32, #tpu.memory_space<vmem>>, vector<18x16x4xf32>,
    %c0_14 = arith.constant 0 : index
    %c0_15 = arith.constant 0 : index
    %c0_16 = arith.constant 0 : index
    %7 = vector.load %arg8[%c0_14, %c0_15, %c0_16] : memref<18x16x4xf32, #tpu.memory_space<vmem>>, vector<16x16x4xf32>
    %8 = vector.shape_cast %7 : vector<16x16x4xf32> to vector<256x4xf32>
    %c0_17 = arith.constant 0 : index
    %c0_18 = arith.constant 0 : index
    %c0_19 = arith.constant 0 : index
    %c0_20 = arith.constant 0 : index
    %9 = vector.load %arg3[%c0_17, %c0_18, %c0_19, %c0_20] : memref<3x3x4x8xf32, #tpu.memory_space<vmem>>, vector<1x1x4x8xf32>
    %10 = vector.shape_cast %9 : vector<1x1x4x8xf32> to vector<4x8xf32>
    %cst_21 = arith.constant dense<0.000000e+00> : vector<256x8xf32>
    %11 = tpu.matmul %8, %10, %cst_21 {dimension_numbers = #tpu.dot_dimension_numbers<[1], [0], [0], [1], [0, 0, 1, 1], [], []>} : vector<256x4xf32>, vector<4x8xf32>, vector<256x8xf32> -> vector<256x8xf32>
    %c0_22 = arith.constant 0 : index
    %c0_23 = arith.constant 0 : index
    %12 = vector.load %arg9[%c0_22, %c0_23] : memref<256x8xf32, #tpu.memory_space<vmem>>, vector<256x8xf32>
    tpu.vector_store %arg9[%c0_22, %c0_23], %11 {strides = array<i32>} : memref<256x8xf32, #tpu.memory_space<vmem>>, vector<256x8xf32>,
    %c1_24 = arith.constant 1 : index
    %c0_25 = arith.constant 0 : index
    %c0_26 = arith.constant 0 : index
    %13 = vector.load %arg8[%c1_24, %c0_25, %c0_26] : memref<18x16x4xf32, #tpu.memory_space<vmem>>, vector<16x16x4xf32>
    %14 = vector.shape_cast %13 : vector<16x16x4xf32> to vector<256x4xf32>
    %c1_27 = arith.constant 1 : index
    %c0_28 = arith.constant 0 : index
    %c0_29 = arith.constant 0 : index
    %c0_30 = arith.constant 0 : index
    %15 = vector.load %arg3[%c1_27, %c0_28, %c0_29, %c0_30] : memref<3x3x4x8xf32, #tpu.memory_space<vmem>>, vector<1x1x4x8xf32>
    %16 = vector.shape_cast %15 : vector<1x1x4x8xf32> to vector<4x8xf32>
    %cst_31 = arith.constant dense<0.000000e+00> : vector<256x8xf32>
    %17 = tpu.matmul %14, %16, %cst_31 {dimension_numbers = #tpu.dot_dimension_numbers<[1], [0], [0], [1], [0, 0, 1, 1], [], []>} : vector<256x4xf32>, vector<4x8xf32>, vector<256x8xf32> -> vector<256x8xf32>
    %c0_32 = arith.constant 0 : index
    %c0_33 = arith.constant 0 : index
    %18 = vector.load %arg9[%c0_32, %c0_33] : memref<256x8xf32, #tpu.memory_space<vmem>>, vector<256x8xf32>
    %19 = arith.addf %18, %17 : vector<256x8xf32>
    %c0_34 = arith.constant 0 : index
    %c0_35 = arith.constant 0 : index
    %20 = vector.load %arg9[%c0_34, %c0_35] : memref<256x8xf32, #tpu.memory_space<vmem>>, vector<256x8xf32>
    tpu.vector_store %arg9[%c0_34, %c0_35], %19 {strides = array<i32>} : memref<256x8xf32, #tpu.memory_space<vmem>>, vector<256x8xf32>,
    %c2 = arith.constant 2 : index
    %c0_36 = arith.constant 0 : index
    %c0_37 = arith.constant 0 : index
    %21 = vector.load %arg8[%c2, %c0_36, %c0_37] : memref<18x16x4xf32, #tpu.memory_space<vmem>>, vector<16x16x4xf32>
    %22 = vector.shape_cast %21 : vector<16x16x4xf32> to vector<256x4xf32>
    %c2_38 = arith.constant 2 : index
    %c0_39 = arith.constant 0 : index
    %c0_40 = arith.constant 0 : index
    %c0_41 = arith.constant 0 : index
    %23 = vector.load %arg3[%c2_38, %c0_39, %c0_40, %c0_41] : memref<3x3x4x8xf32, #tpu.memory_space<vmem>>, vector<1x1x4x8xf32>
    %24 = vector.shape_cast %23 : vector<1x1x4x8xf32> to vector<4x8xf32>
    %cst_42 = arith.constant dense<0.000000e+00> : vector<256x8xf32>
    %25 = tpu.matmul %22, %24, %cst_42 {dimension_numbers = #tpu.dot_dimension_numbers<[1], [0], [0], [1], [0, 0, 1, 1], [], []>} : vector<256x4xf32>, vector<4x8xf32>, vector<256x8xf32> -> vector<256x8xf32>
    %c0_43 = arith.constant 0 : index
    %c0_44 = arith.constant 0 : index
    %26 = vector.load %arg9[%c0_43, %c0_44] : memref<256x8xf32, #tpu.memory_space<vmem>>, vector<256x8xf32>
    %27 = arith.addf %26, %25 : vector<256x8xf32>
    %c0_45 = arith.constant 0 : index
    %c0_46 = arith.constant 0 : index
    %28 = vector.load %arg9[%c0_45, %c0_46] : memref<256x8xf32, #tpu.memory_space<vmem>>, vector<256x8xf32>
    tpu.vector_store %arg9[%c0_45, %c0_46], %27 {strides = array<i32>} : memref<256x8xf32, #tpu.memory_space<vmem>>, vector<256x8xf32>,
    %c0_47 = arith.constant 0 : index
    %c1_48 = arith.constant 1 : index
    %c0_49 = arith.constant 0 : index
    %29 = vector.load %arg7[%c0_47, %c1_48, %c0_49] : memref<18x18x4xf32, #tpu.memory_space<vmem>>, vector<18x16x4xf32>
    %c0_50 = arith.constant 0 : index
    %c0_51 = arith.constant 0 : index
    %c0_52 = arith.constant 0 : index
    %30 = vector.load %arg8[%c0_50, %c0_51, %c0_52] : memref<18x16x4xf32, #tpu.memory_space<vmem>>, vector<18x16x4xf32>
    tpu.vector_store %arg8[%c0_50, %c0_51, %c0_52], %29 {strides = array<i32>} : memref<18x16x4xf32, #tpu.memory_space<vmem>>, vector<18x16x4xf32>,
    %c0_53 = arith.constant 0 : index
    %c0_54 = arith.constant 0 : index
    %c0_55 = arith.constant 0 : index
    %31 = vector.load %arg8[%c0_53, %c0_54, %c0_55] : memref<18x16x4xf32, #tpu.memory_space<vmem>>, vector<16x16x4xf32>
    %32 = vector.shape_cast %31 : vector<16x16x4xf32> to vector<256x4xf32>
    %c0_56 = arith.constant 0 : index
    %c1_57 = arith.constant 1 : index
    %c0_58 = arith.constant 0 : index
    %c0_59 = arith.constant 0 : index
    %33 = vector.load %arg3[%c0_56, %c1_57, %c0_58, %c0_59] : memref<3x3x4x8xf32, #tpu.memory_space<vmem>>, vector<1x1x4x8xf32>
    %34 = vector.shape_cast %33 : vector<1x1x4x8xf32> to vector<4x8xf32>
    %cst_60 = arith.constant dense<0.000000e+00> : vector<256x8xf32>
    %35 = tpu.matmul %32, %34, %cst_60 {dimension_numbers = #tpu.dot_dimension_numbers<[1], [0], [0], [1], [0, 0, 1, 1], [], []>} : vector<256x4xf32>, vector<4x8xf32>, vector<256x8xf32> -> vector<256x8xf32>
    %c0_61 = arith.constant 0 : index
    %c0_62 = arith.constant 0 : index
    %36 = vector.load %arg9[%c0_61, %c0_62] : memref<256x8xf32, #tpu.memory_space<vmem>>, vector<256x8xf32>
    %37 = arith.addf %36, %35 : vector<256x8xf32>
    %c0_63 = arith.constant 0 : index
    %c0_64 = arith.constant 0 : index
    %38 = vector.load %arg9[%c0_63, %c0_64] : memref<256x8xf32, #tpu.memory_space<vmem>>, vector<256x8xf32>
    tpu.vector_store %arg9[%c0_63, %c0_64], %37 {strides = array<i32>} : memref<256x8xf32, #tpu.memory_space<vmem>>, vector<256x8xf32>,
    %c1_65 = arith.constant 1 : index
    %c0_66 = arith.constant 0 : index
    %c0_67 = arith.constant 0 : index
    %39 = vector.load %arg8[%c1_65, %c0_66, %c0_67] : memref<18x16x4xf32, #tpu.memory_space<vmem>>, vector<16x16x4xf32>
    %40 = vector.shape_cast %39 : vector<16x16x4xf32> to vector<256x4xf32>
    %c1_68 = arith.constant 1 : index
    %c1_69 = arith.constant 1 : index
    %c0_70 = arith.constant 0 : index
    %c0_71 = arith.constant 0 : index
    %41 = vector.load %arg3[%c1_68, %c1_69, %c0_70, %c0_71] : memref<3x3x4x8xf32, #tpu.memory_space<vmem>>, vector<1x1x4x8xf32>
    %42 = vector.shape_cast %41 : vector<1x1x4x8xf32> to vector<4x8xf32>
    %cst_72 = arith.constant dense<0.000000e+00> : vector<256x8xf32>
    %43 = tpu.matmul %40, %42, %cst_72 {dimension_numbers = #tpu.dot_dimension_numbers<[1], [0], [0], [1], [0, 0, 1, 1], [], []>} : vector<256x4xf32>, vector<4x8xf32>, vector<256x8xf32> -> vector<256x8xf32>
    %c0_73 = arith.constant 0 : index
    %c0_74 = arith.constant 0 : index
    %44 = vector.load %arg9[%c0_73, %c0_74] : memref<256x8xf32, #tpu.memory_space<vmem>>, vector<256x8xf32>
    %45 = arith.addf %44, %43 : vector<256x8xf32>
    %c0_75 = arith.constant 0 : index
    %c0_76 = arith.constant 0 : index
    %46 = vector.load %arg9[%c0_75, %c0_76] : memref<256x8xf32, #tpu.memory_space<vmem>>, vector<256x8xf32>
    tpu.vector_store %arg9[%c0_75, %c0_76], %45 {strides = array<i32>} : memref<256x8xf32, #tpu.memory_space<vmem>>, vector<256x8xf32>,
    %c2_77 = arith.constant 2 : index
    %c0_78 = arith.constant 0 : index
    %c0_79 = arith.constant 0 : index
    %47 = vector.load %arg8[%c2_77, %c0_78, %c0_79] : memref<18x16x4xf32, #tpu.memory_space<vmem>>, vector<16x16x4xf32>
    %48 = vector.shape_cast %47 : vector<16x16x4xf32> to vector<256x4xf32>
    %c2_80 = arith.constant 2 : index
    %c1_81 = arith.constant 1 : index
    %c0_82 = arith.constant 0 : index
    %c0_83 = arith.constant 0 : index
    %49 = vector.load %arg3[%c2_80, %c1_81, %c0_82, %c0_83] : memref<3x3x4x8xf32, #tpu.memory_space<vmem>>, vector<1x1x4x8xf32>
    %50 = vector.shape_cast %49 : vector<1x1x4x8xf32> to vector<4x8xf32>
    %cst_84 = arith.constant dense<0.000000e+00> : vector<256x8xf32>
    %51 = tpu.matmul %48, %50, %cst_84 {dimension_numbers = #tpu.dot_dimension_numbers<[1], [0], [0], [1], [0, 0, 1, 1], [], []>} : vector<256x4xf32>, vector<4x8xf32>, vector<256x8xf32> -> vector<256x8xf32>
    %c0_85 = arith.constant 0 : index
    %c0_86 = arith.constant 0 : index
    %52 = vector.load %arg9[%c0_85, %c0_86] : memref<256x8xf32, #tpu.memory_space<vmem>>, vector<256x8xf32>
    %53 = arith.addf %52, %51 : vector<256x8xf32>
    %c0_87 = arith.constant 0 : index
    %c0_88 = arith.constant 0 : index
    %54 = vector.load %arg9[%c0_87, %c0_88] : memref<256x8xf32, #tpu.memory_space<vmem>>, vector<256x8xf32>
    tpu.vector_store %arg9[%c0_87, %c0_88], %53 {strides = array<i32>} : memref<256x8xf32, #tpu.memory_space<vmem>>, vector<256x8xf32>,
    %c0_89 = arith.constant 0 : index
    %c2_90 = arith.constant 2 : index
    %c0_91 = arith.constant 0 : index
    %55 = vector.load %arg7[%c0_89, %c2_90, %c0_91] : memref<18x18x4xf32, #tpu.memory_space<vmem>>, vector<18x16x4xf32>
    %c0_92 = arith.constant 0 : index
    %c0_93 = arith.constant 0 : index
    %c0_94 = arith.constant 0 : index
    %56 = vector.load %arg8[%c0_92, %c0_93, %c0_94] : memref<18x16x4xf32, #tpu.memory_space<vmem>>, vector<18x16x4xf32>
    tpu.vector_store %arg8[%c0_92, %c0_93, %c0_94], %55 {strides = array<i32>} : memref<18x16x4xf32, #tpu.memory_space<vmem>>, vector<18x16x4xf32>,
    %c0_95 = arith.constant 0 : index
    %c0_96 = arith.constant 0 : index
    %c0_97 = arith.constant 0 : index
    %57 = vector.load %arg8[%c0_95, %c0_96, %c0_97] : memref<18x16x4xf32, #tpu.memory_space<vmem>>, vector<16x16x4xf32>
    %58 = vector.shape_cast %57 : vector<16x16x4xf32> to vector<256x4xf32>
    %c0_98 = arith.constant 0 : index
    %c2_99 = arith.constant 2 : index
    %c0_100 = arith.constant 0 : index
    %c0_101 = arith.constant 0 : index
    %59 = vector.load %arg3[%c0_98, %c2_99, %c0_100, %c0_101] : memref<3x3x4x8xf32, #tpu.memory_space<vmem>>, vector<1x1x4x8xf32>
    %60 = vector.shape_cast %59 : vector<1x1x4x8xf32> to vector<4x8xf32>
    %cst_102 = arith.constant dense<0.000000e+00> : vector<256x8xf32>
    %61 = tpu.matmul %58, %60, %cst_102 {dimension_numbers = #tpu.dot_dimension_numbers<[1], [0], [0], [1], [0, 0, 1, 1], [], []>} : vector<256x4xf32>, vector<4x8xf32>, vector<256x8xf32> -> vector<256x8xf32>
    %c0_103 = arith.constant 0 : index
    %c0_104 = arith.constant 0 : index
    %62 = vector.load %arg9[%c0_103, %c0_104] : memref<256x8xf32, #tpu.memory_space<vmem>>, vector<256x8xf32>
    %63 = arith.addf %62, %61 : vector<256x8xf32>
    %c0_105 = arith.constant 0 : index
    %c0_106 = arith.constant 0 : index
    %64 = vector.load %arg9[%c0_105, %c0_106] : memref<256x8xf32, #tpu.memory_space<vmem>>, vector<256x8xf32>
    tpu.vector_store %arg9[%c0_105, %c0_106], %63 {strides = array<i32>} : memref<256x8xf32, #tpu.memory_space<vmem>>, vector<256x8xf32>,
    %c1_107 = arith.constant 1 : index
    %c0_108 = arith.constant 0 : index
    %c0_109 = arith.constant 0 : index
    %65 = vector.load %arg8[%c1_107, %c0_108, %c0_109] : memref<18x16x4xf32, #tpu.memory_space<vmem>>, vector<16x16x4xf32>
    %66 = vector.shape_cast %65 : vector<16x16x4xf32> to vector<256x4xf32>
    %c1_110 = arith.constant 1 : index
    %c2_111 = arith.constant 2 : index
    %c0_112 = arith.constant 0 : index
    %c0_113 = arith.constant 0 : index
    %67 = vector.load %arg3[%c1_110, %c2_111, %c0_112, %c0_113] : memref<3x3x4x8xf32, #tpu.memory_space<vmem>>, vector<1x1x4x8xf32>
    %68 = vector.shape_cast %67 : vector<1x1x4x8xf32> to vector<4x8xf32>
    %cst_114 = arith.constant dense<0.000000e+00> : vector<256x8xf32>
    %69 = tpu.matmul %66, %68, %cst_114 {dimension_numbers = #tpu.dot_dimension_numbers<[1], [0], [0], [1], [0, 0, 1, 1], [], []>} : vector<256x4xf32>, vector<4x8xf32>, vector<256x8xf32> -> vector<256x8xf32>
    %c0_115 = arith.constant 0 : index
    %c0_116 = arith.constant 0 : index
    %70 = vector.load %arg9[%c0_115, %c0_116] : memref<256x8xf32, #tpu.memory_space<vmem>>, vector<256x8xf32>
    %71 = arith.addf %70, %69 : vector<256x8xf32>
    %c0_117 = arith.constant 0 : index
    %c0_118 = arith.constant 0 : index
    %72 = vector.load %arg9[%c0_117, %c0_118] : memref<256x8xf32, #tpu.memory_space<vmem>>, vector<256x8xf32>
    tpu.vector_store %arg9[%c0_117, %c0_118], %71 {strides = array<i32>} : memref<256x8xf32, #tpu.memory_space<vmem>>, vector<256x8xf32>,
    %c2_119 = arith.constant 2 : index
    %c0_120 = arith.constant 0 : index
    %c0_121 = arith.constant 0 : index
    %73 = vector.load %arg8[%c2_119, %c0_120, %c0_121] : memref<18x16x4xf32, #tpu.memory_space<vmem>>, vector<16x16x4xf32>
    %74 = vector.shape_cast %73 : vector<16x16x4xf32> to vector<256x4xf32>
    %c2_122 = arith.constant 2 : index
    %c2_123 = arith.constant 2 : index
    %c0_124 = arith.constant 0 : index
    %c0_125 = arith.constant 0 : index
    %75 = vector.load %arg3[%c2_122, %c2_123, %c0_124, %c0_125] : memref<3x3x4x8xf32, #tpu.memory_space<vmem>>, vector<1x1x4x8xf32>
    %76 = vector.shape_cast %75 : vector<1x1x4x8xf32> to vector<4x8xf32>
    %cst_126 = arith.constant dense<0.000000e+00> : vector<256x8xf32>
    %77 = tpu.matmul %74, %76, %cst_126 {dimension_numbers = #tpu.dot_dimension_numbers<[1], [0], [0], [1], [0, 0, 1, 1], [], []>} : vector<256x4xf32>, vector<4x8xf32>, vector<256x8xf32> -> vector<256x8xf32>
    %c0_127 = arith.constant 0 : index
    %c0_128 = arith.constant 0 : index
    %78 = vector.load %arg9[%c0_127, %c0_128] : memref<256x8xf32, #tpu.memory_space<vmem>>, vector<256x8xf32>
    %79 = arith.addf %78, %77 : vector<256x8xf32>
    %c0_129 = arith.constant 0 : index
    %c0_130 = arith.constant 0 : index
    %80 = vector.load %arg9[%c0_129, %c0_130] : memref<256x8xf32, #tpu.memory_space<vmem>>, vector<256x8xf32>
    tpu.vector_store %arg9[%c0_129, %c0_130], %79 {strides = array<i32>} : memref<256x8xf32, #tpu.memory_space<vmem>>, vector<256x8xf32>,
    %c0_131 = arith.constant 0 : index
    %c0_132 = arith.constant 0 : index
    %81 = vector.load %arg9[%c0_131, %c0_132] : memref<256x8xf32, #tpu.memory_space<vmem>>, vector<256x8xf32>
    %c0_133 = arith.constant 0 : index
    %c0_134 = arith.constant 0 : index
    %c0_135 = arith.constant 0 : index
    %82 = vector.load %arg4[%c0_133, %c0_134, %c0_135] : memref<1x256x8xf32, #tpu.memory_space<vmem>>, vector<1x256x8xf32>
    %83 = vector.shape_cast %82 : vector<1x256x8xf32> to vector<256x8xf32>
    %84 = vector.shape_cast %81 : vector<256x8xf32> to vector<1x256x8xf32>
    tpu.vector_store %arg4[%c0_133, %c0_134, %c0_135], %84 {strides = array<i32>} : memref<1x256x8xf32, #tpu.memory_space<vmem>>, vector<1x256x8xf32>,
    %c0_i32 = arith.constant 0 : i32
    %85 = arith.cmpi eq, %arg1, %c0_i32 : i32
    %86 = arith.extui %85 : i1 to i32
    %c0_i32_136 = arith.constant 0 : i32
    %87 = arith.cmpi ne, %86, %c0_i32_136 : i32
    scf.if %87 {
      %cst_147 = arith.constant 0.000000e+00 : f32
      %99 = vector.broadcast %cst_147 : f32 to vector<1x8xf32>
      %c0_148 = arith.constant 0 : index
      %c0_149 = arith.constant 0 : index
      %100 = vector.load %arg5[%c0_148, %c0_149] : memref<1x8xf32, #tpu.memory_space<vmem>>, vector<1x8xf32>
      tpu.vector_store %arg5[%c0_148, %c0_149], %99 {strides = array<i32>} : memref<1x8xf32, #tpu.memory_space<vmem>>, vector<1x8xf32>,
      %cst_150 = arith.constant 0.000000e+00 : f32
      %101 = vector.broadcast %cst_150 : f32 to vector<1x8xf32>
      %c0_151 = arith.constant 0 : index
      %c0_152 = arith.constant 0 : index
      %102 = vector.load %arg6[%c0_151, %c0_152] : memref<1x8xf32, #tpu.memory_space<vmem>>, vector<1x8xf32>
      tpu.vector_store %arg6[%c0_151, %c0_152], %101 {strides = array<i32>} : memref<1x8xf32, #tpu.memory_space<vmem>>, vector<1x8xf32>,
    } else {
    }
    %c0_137 = arith.constant 0 : index
    %c0_138 = arith.constant 0 : index
    %88 = vector.load %arg5[%c0_137, %c0_138] : memref<1x8xf32, #tpu.memory_space<vmem>>, vector<1x8xf32>
    %cst_139 = arith.constant dense<0.000000e+00> : vector<8xf32>
    %89 = vector.multi_reduction <add>, %81, %cst_139 [0] : vector<256x8xf32> to vector<8xf32>
    %90 = vector.shape_cast %89 : vector<8xf32> to vector<1x8xf32>
    %91 = arith.addf %88, %90 : vector<1x8xf32>
    %c0_140 = arith.constant 0 : index
    %c0_141 = arith.constant 0 : index
    %92 = vector.load %arg5[%c0_140, %c0_141] : memref<1x8xf32, #tpu.memory_space<vmem>>, vector<1x8xf32>
    tpu.vector_store %arg5[%c0_140, %c0_141], %91 {strides = array<i32>} : memref<1x8xf32, #tpu.memory_space<vmem>>, vector<1x8xf32>,
    %c0_142 = arith.constant 0 : index
    %c0_143 = arith.constant 0 : index
    %93 = vector.load %arg6[%c0_142, %c0_143] : memref<1x8xf32, #tpu.memory_space<vmem>>, vector<1x8xf32>
    %94 = arith.mulf %81, %81 : vector<256x8xf32>
    %cst_144 = arith.constant dense<0.000000e+00> : vector<8xf32>
    %95 = vector.multi_reduction <add>, %94, %cst_144 [0] : vector<256x8xf32> to vector<8xf32>
    %96 = vector.shape_cast %95 : vector<8xf32> to vector<1x8xf32>
    %97 = arith.addf %93, %96 : vector<1x8xf32>
    %c0_145 = arith.constant 0 : index
    %c0_146 = arith.constant 0 : index
    %98 = vector.load %arg6[%c0_145, %c0_146] : memref<1x8xf32, #tpu.memory_space<vmem>>, vector<1x8xf32>
    tpu.vector_store %arg6[%c0_145, %c0_146], %97 {strides = array<i32>} : memref<1x8xf32, #tpu.memory_space<vmem>>, vector<1x8xf32>,
    return
  }
  func.func @transform_0(%arg0: i32, %arg1: i32) -> (i32, i32, i32, i32) {
    %c0_i32 = arith.constant 0 : i32
    %c0_i32_0 = arith.constant 0 : i32
    %c0_i32_1 = arith.constant 0 : i32
    %c0_i32_2 = arith.constant 0 : i32
    return %arg1, %c0_i32, %c0_i32_0, %c0_i32_1 : i32, i32, i32, i32
  }
  func.func @transform_1(%arg0: i32, %arg1: i32) -> (i32, i32, i32, i32) {
    %c0_i32 = arith.constant 0 : i32
    %c0_i32_0 = arith.constant 0 : i32
    %c0_i32_1 = arith.constant 0 : i32
    %c0_i32_2 = arith.constant 0 : i32
    return %c0_i32, %c0_i32_0, %c0_i32_1, %arg0 : i32, i32, i32, i32
  }
  func.func @transform_2(%arg0: i32, %arg1: i32) -> (i32, i32, i32) {
    %c0_i32 = arith.constant 0 : i32
    %c0_i32_0 = arith.constant 0 : i32
    return %arg1, %c0_i32, %arg0 : i32, i32, i32
  }
  func.func @transform_3(%arg0: i32, %arg1: i32) -> (i32, i32) {
    %c0_i32 = arith.constant 0 : i32
    %c0_i32_0 = arith.constant 0 : i32
    return %c0_i32, %arg0 : i32, i32
  }
  func.func @transform_4(%arg0: i32, %arg1: i32) -> (i32, i32) {
    %c0_i32 = arith.constant 0 : i32
    %c0_i32_0 = arith.constant 0 : i32
    return %c0_i32, %arg0 : i32, i32
  }
}

</mosaic_0001>

<bundles_post_ra>
// kernel: tpu_custom_call.1
= control target key start
LH: loop header
LB: loop body
LE: loop exit
PB: predicated region body
PF: predicated region fallthrough
CT: control target
= control target key end

     0   :  { %10 = vsyncpa [#allocation6], 0  ;;  %s7988_s0 = inlined_call_operand.vmem [shape: f32[2,16,16,4], index: 0, kind: input, shape index: {}]   ;;  %s7989_s1 = inlined_call_operand.vmem [shape: f32[3,3,4,8], index: 1, kind: input, shape index: {}]   ;;  %s7990_s2 = inlined_call_operand.vmem [shape: f32[2,256,8], index: 2, kind: output, shape index: {0}]   ;;  %s7991_s3 = inlined_call_operand.hbm [shape: f32[1,8], index: 3, kind: output, shape index: {1}]   ;;  %s7992_s4 = inlined_call_operand.hbm [shape: f32[1,8], index: 4, kind: output, shape index: {2}]  }
   0x1   :  { %11 = vsyncpa [#allocation8], 0  ;;  %s6221_s15 = smov 0   ;;  %s6223_s16 = smov 0  }
   0x2   :  { %s6225_s17 = smov 0  }
   0x3 LB: > { %s4999_s18 = sadd.s32 4294967295, %s6190_s17   ;;  %s26_s19 = sadd.s32 1, %s6186_s16  ;;  %s6190_s17 = sphi %s6225_s17, %s17_s17   ;;  %s6186_s16 = sphi %s6223_s16, %s7995_s16   ;;  %s6182_s15 = sphi %s6221_s15, %s7994_s15  }
   0x4   : > { %p27_p0 = scmp.ge.s32.totalorder %s26_s19, 2  ;;  %p5004_p1 = scmp.ge.s32.totalorder %s6190_s17, 1 }
   0x5   : > { %p192_p2 = scmp.lt.s32.totalorder %s6190_s17, 3 }
   0x6   : > { %s7997_s19 = smov (%p27_p0, %s26_s19), 0 }
   0x7   : > { %p193_p3 = pnand %p5004_p1, %p192_p2 }
   0x8   : > { %p225_p4 = scmp.lt.s32.totalorder (!%p193_p3), %s6182_s15, 1  ;;  %p5314_p5 = scmp.ne.s32.totalorder (!%p193_p3), %s6182_s15, 0 }
   0x9   : > { %196 = sbr.rel (%p193_p3) target bundleno = 667 (0x29b), region = 28 }
   0xe   : > { %v6245_v0 = vld [vmem:[%s7989_s1] sm:$0xf]  ;;  %vm564_vm0 = vcmask 1043456   ;;  %vm242_vm1 = vcmask 31744   ;;  %v6192_v1 = vmov 0.0   ;;  %vm245_vm2 = vcmask 25600  }
   0xf   : > { %6070 = vmatprep.subr.msk.mxu1 %vm564_vm0, %v6245_v0  ;;  %268 = vst.msk [vmem:[#allocation2 + $0xc0] sm:$0xff] %vm242_vm1, %v6192_v1  ;;  %269 = vst.msk [vmem:[#allocation2 + $0xc8] sm:$0xff] %vm242_vm1, %v6192_v1  ;;  %v6289_v2 = vld [vmem:[%s7989_s1 + $0xc] sm:$0xf]  ;;  %5620 = vmatprep.subr.msk.mxu0 %vm564_vm0, %v6245_v0  ;;  %v6296_v3 = vld [vmem:[%s7989_s1 + $0x18] sm:$0xf] }
  0x10   : > { %243 = vst.msk [vmem:[#allocation2] sm:$0xff] %vm242_vm1, %v6192_v1  ;;  %244 = vst.msk [vmem:[#allocation2 + $0x8] sm:$0xff] %vm242_vm1, %v6192_v1  ;;  %6071 = vmatpush3.msk.msra.mxu1 %vm564_vm0, %v6245_v0  ;;  %s6303_s26 = scalar_select %p225_p4, %s6182_s15, 1  ;;  %5621 = vmatpush3.msk.msra.mxu0 %vm564_vm0, %v6245_v0  ;;  %v6385_v34 = vld [vmem:[%s7989_s1 + $0x10] sm:$0xf]  ;;  %vm793_vm3 = vcmask 64512  }
  0x11   : > { %247 = vst.msk [vmem:[#allocation2 + $0x18] sm:$0xff] %vm242_vm1, %v6192_v1  ;;  %248 = vst.msk [vmem:[#allocation2 + $0x20] sm:$0xff] %vm242_vm1, %v6192_v1  ;;  %5670 = vmatprep.subr.msk.mxu1 %vm564_vm0, %v6289_v2  ;;  %5720 = vmatprep.subr.msk.mxu0 %vm564_vm0, %v6296_v3  ;;  %v6427_v56 = vld [vmem:[%s7989_s1 + $0x4] sm:$0xf] }
  0x12   : > { %250 = vst.msk [vmem:[#allocation2 + $0x30] sm:$0xff] %vm242_vm1, %v6192_v1  ;;  %251 = vst.msk [vmem:[#allocation2 + $0x38] sm:$0xff] %vm242_vm1, %v6192_v1  ;;  %s5321_s27 = sshll.u32 %s6303_s26, 8 }
  0x13   : > { %253 = vst.msk [vmem:[#allocation2 + $0x48] sm:$0xff] %vm242_vm1, %v6192_v1  ;;  %254 = vst.msk [vmem:[#allocation2 + $0x50] sm:$0xff] %vm242_vm1, %v6192_v1  ;;  %s6335_s30 = scalar_lea.vmem %s7988_s0, %s5321_s27  ;;  %s7573_s24 = scalar_lea.vmem %s7990_s2, %s5321_s27 }
  0x14   : > { %256 = vst.msk [vmem:[#allocation2 + $0x60] sm:$0xff] %vm242_vm1, %v6192_v1  ;;  %257 = vst.msk [vmem:[#allocation2 + $0x68] sm:$0xff] %vm242_vm1, %v6192_v1  ;;  %v312_v4 = vld [vmem:[%s6335_s30 + $0x70] sm:$0xff]  ;;  %v313_v5 = vld [vmem:[%s6335_s30 + $0x78] sm:$0xff] }
  0x15   : > { %259 = vst.msk [vmem:[#allocation2 + $0x78] sm:$0xff] %vm242_vm1, %v6192_v1  ;;  %260 = vst.msk [vmem:[#allocation2 + $0x80] sm:$0xff] %vm242_vm1, %v6192_v1  ;;  %v314_v6 = vld [vmem:[%s6335_s30 + $0x80] sm:$0xff]  ;;  %v315_v7 = vld [vmem:[%s6335_s30 + $0x88] sm:$0xff] }
  0x16   : > { %262 = vst.msk [vmem:[#allocation2 + $0x90] sm:$0xff] %vm242_vm1, %v6192_v1  ;;  %263 = vst.msk [vmem:[#allocation2 + $0x98] sm:$0xff] %vm242_vm1, %v6192_v1  ;;  %v316_v8 = vld [vmem:[%s6335_s30 + $0x90] sm:$0xff]  ;;  %v317_v9 = vld [vmem:[%s6335_s30 + $0x98] sm:$0xff] }
  0x17   : > { %265 = vst.msk [vmem:[#allocation2 + $0xa8] sm:$0xff] %vm242_vm1, %v6192_v1  ;;  %266 = vst.msk [vmem:[#allocation2 + $0xb0] sm:$0xff] %vm242_vm1, %v6192_v1  ;;  %v363_v10 = vld [vmem:[#allocation2] sm:$0xff]  ;;  %v364_v11 = vld [vmem:[#allocation2 + $0x8] sm:$0xff] }
  0x18   : > { %271 = vst.msk [vmem:[#allocation2 + $0xd8] sm:$0xff] %vm242_vm1, %v6192_v1  ;;  %272 = vst.msk [vmem:[#allocation2 + $0xe0] sm:$0xff] %vm242_vm1, %v6192_v1  ;;  %v298_v12 = vld [vmem:[%s6335_s30] sm:$0xff]  ;;  %v299_v14 = vld [vmem:[%s6335_s30 + $0x8] sm:$0xff] }
  0x19   : > { %274 = vst.msk [vmem:[#allocation2 + $0xf0] sm:$0xff] %vm242_vm1, %v6192_v1  ;;  %275 = vst.msk [vmem:[#allocation2 + $0xf8] sm:$0xff] %vm242_vm1, %v6192_v1  ;;  %v318_v13 = vld [vmem:[%s6335_s30 + $0xa0] sm:$0xff]  ;;  %v319_v15 = vld [vmem:[%s6335_s30 + $0xa8] sm:$0xff] }
  0x1a   : > { %277 = vst.msk [vmem:[#allocation2 + $0x108] sm:$0xff] %vm242_vm1, %v6192_v1  ;;  %278 = vst.msk [vmem:[#allocation2 + $0x110] sm:$0xff] %vm242_vm1, %v6192_v1  ;;  %v300_v16 = vld [vmem:[%s6335_s30 + $0x10] sm:$0xff]  ;;  %v301_v18 = vld [vmem:[%s6335_s30 + $0x18] sm:$0xff] }
  0x1b   : > { %280 = vst.msk [vmem:[#allocation2 + $0x120] sm:$0xff] %vm242_vm1, %v6192_v1  ;;  %281 = vst.msk [vmem:[#allocation2 + $0x128] sm:$0xff] %vm242_vm1, %v6192_v1  ;;  %v320_v17 = vld [vmem:[%s6335_s30 + $0xb0] sm:$0xff]  ;;  %v321_v19 = vld [vmem:[%s6335_s30 + $0xb8] sm:$0xff] }
  0x1c   : > { %283 = vst.msk [vmem:[#allocation2 + $0x138] sm:$0xff] %vm242_vm1, %v6192_v1  ;;  %284 = vst.msk [vmem:[#allocation2 + $0x140] sm:$0xff] %vm242_vm1, %v6192_v1  ;;  %v1736_v20 = vld [vmem:[#allocation2 + $0x1] sm:$0xff]  ;;  %v304_v26 = vld [vmem:[%s6335_s30 + $0x30] sm:$0xff] }
  0x1d   : > { %286 = vst.msk [vmem:[#allocation2 + $0x150] sm:$0xff] %vm242_vm1, %v6192_v1  ;;  %287 = vst.msk [vmem:[#allocation2 + $0x158] sm:$0xff] %vm242_vm1, %v6192_v1  ;;  %v302_v22 = vld [vmem:[%s6335_s30 + $0x20] sm:$0xff]  ;;  %v303_v24 = vld [vmem:[%s6335_s30 + $0x28] sm:$0xff] }
  0x1e   : > { %289 = vst.msk [vmem:[#allocation2 + $0x168] sm:$0xff] %vm242_vm1, %v6192_v1  ;;  %290 = vst.msk [vmem:[#allocation2 + $0x170] sm:$0xff] %vm242_vm1, %v6192_v1  ;;  %v322_v23 = vld [vmem:[%s6335_s30 + $0xc0] sm:$0xff]  ;;  %v323_v25 = vld [vmem:[%s6335_s30 + $0xc8] sm:$0xff] }
  0x1f   : > { %292 = vst.msk [vmem:[#allocation2 + $0x180] sm:$0xff] %vm242_vm1, %v6192_v1  ;;  %293 = vst.msk [vmem:[#allocation2 + $0x188] sm:$0xff] %vm242_vm1, %v6192_v1  ;;  %v324_v27 = vld [vmem:[%s6335_s30 + $0xd0] sm:$0xff]  ;;  %v305_v37 = vld [vmem:[%s6335_s30 + $0x38] sm:$0xff] }
  0x20   : > { %295 = vst.msk [vmem:[#allocation2 + $0x198] sm:$0xff] %vm242_vm1, %v6192_v1  ;;  %296 = vst.msk [vmem:[#allocation2 + $0x1a0] sm:$0xff] %vm242_vm1, %v6192_v1  ;;  %v325_v40 = vld [vmem:[%s6335_s30 + $0xd8] sm:$0xff]  ;;  %v306_v58 = vld [vmem:[%s6335_s30 + $0x40] sm:$0xff] }
  0x21   : > { %270 = vst.msk [vmem:[#allocation2 + $0xd0] sm:$0x3] %vm245_vm2, %v6192_v1  ;;  %246 = vst.msk [vmem:[#allocation2 + $0x10] sm:$0x3] %vm245_vm2, %v6192_v1  ;;  %v326_v59 = vld [vmem:[%s6335_s30 + $0xe0] sm:$0xff] }
  0x22   : > { %249 = vst.msk [vmem:[#allocation2 + $0x28] sm:$0x3] %vm245_vm2, %v6192_v1  ;;  %252 = vst.msk [vmem:[#allocation2 + $0x40] sm:$0x3] %vm245_vm2, %v6192_v1 }
  0x23   : > { %255 = vst.msk [vmem:[#allocation2 + $0x58] sm:$0x3] %vm245_vm2, %v6192_v1  ;;  %258 = vst.msk [vmem:[#allocation2 + $0x70] sm:$0x3] %vm245_vm2, %v6192_v1 }
  0x24   : > { %261 = vst.msk [vmem:[#allocation2 + $0x88] sm:$0x3] %vm245_vm2, %v6192_v1  ;;  %264 = vst.msk [vmem:[#allocation2 + $0xa0] sm:$0x3] %vm245_vm2, %v6192_v1 }
  0x25   : > { %267 = vst.msk [vmem:[#allocation2 + $0xb8] sm:$0x3] %vm245_vm2, %v6192_v1  ;;  %273 = vst.msk [vmem:[#allocation2 + $0xe8] sm:$0x3] %vm245_vm2, %v6192_v1 }
  0x26   : > { %276 = vst.msk [vmem:[#allocation2 + $0x100] sm:$0x3] %vm245_vm2, %v6192_v1  ;;  %279 = vst.msk [vmem:[#allocation2 + $0x118] sm:$0x3] %vm245_vm2, %v6192_v1 }
  0x27   : > { %282 = vst.msk [vmem:[#allocation2 + $0x130] sm:$0x3] %vm245_vm2, %v6192_v1  ;;  %285 = vst.msk [vmem:[#allocation2 + $0x148] sm:$0x3] %vm245_vm2, %v6192_v1 }
  0x28   : > { %288 = vst.msk [vmem:[#allocation2 + $0x160] sm:$0x3] %vm245_vm2, %v6192_v1  ;;  %291 = vst.msk [vmem:[#allocation2 + $0x178] sm:$0x3] %vm245_vm2, %v6192_v1  ;;  %v1737_v21 = vld [vmem:[#allocation2 + $0x9] sm:$0xff] }
  0x29   : > { %294 = vst.msk [vmem:[#allocation2 + $0x190] sm:$0x3] %vm245_vm2, %v6192_v1  ;;  %297 = vst.msk [vmem:[#allocation2 + $0x1a8] sm:$0x3] %vm245_vm2, %v6192_v1 }
  0x2a   : > { %345 = vst.msk [vmem:[#allocation2 + $0xc1] sm:$0xff] %vm242_vm1, %v312_v4  ;;  %346 = vst.msk [vmem:[#allocation2 + $0xc9] sm:$0xff] %vm242_vm1, %v313_v5 }
  0x2b   : > { %347 = vst.msk [vmem:[#allocation2 + $0xd9] sm:$0xff] %vm242_vm1, %v314_v6  ;;  %348 = vst.msk [vmem:[#allocation2 + $0xe1] sm:$0xff] %vm242_vm1, %v315_v7  ;;  %v307_v7 = vld [vmem:[%s6335_s30 + $0x48] sm:$0xff] }
  0x2c   : > { %349 = vst.msk [vmem:[#allocation2 + $0xf1] sm:$0xff] %vm242_vm1, %v316_v8  ;;  %350 = vst.msk [vmem:[#allocation2 + $0xf9] sm:$0xff] %vm242_vm1, %v317_v9  ;;  %v327_v8 = vld [vmem:[%s6335_s30 + $0xe8] sm:$0xff]  ;;  %v308_v9 = vld [vmem:[%s6335_s30 + $0x50] sm:$0xff] }
  0x2d   : > { %399 = vst.msk [vmem:[#allocation3] sm:$0xff] %vm242_vm1, %v363_v10  ;;  %400 = vst.msk [vmem:[#allocation3 + $0x8] sm:$0xff] %vm242_vm1, %v364_v11 }
  0x2e   : > { %331 = vst.msk [vmem:[#allocation2 + $0x19] sm:$0xff] %vm242_vm1, %v298_v12  ;;  %351 = vst.msk [vmem:[#allocation2 + $0x109] sm:$0xff] %vm242_vm1, %v318_v13  ;;  %v309_v12 = vld [vmem:[%s6335_s30 + $0x58] sm:$0xff] }
  0x2f   : > { %332 = vst.msk [vmem:[#allocation2 + $0x21] sm:$0xff] %vm242_vm1, %v299_v14  ;;  %352 = vst.msk [vmem:[#allocation2 + $0x111] sm:$0xff] %vm242_vm1, %v319_v15 }
  0x30   : > { %333 = vst.msk [vmem:[#allocation2 + $0x31] sm:$0xff] %vm242_vm1, %v300_v16  ;;  %353 = vst.msk [vmem:[#allocation2 + $0x121] sm:$0xff] %vm242_vm1, %v320_v17 }
  0x31   : > { %334 = vst.msk [vmem:[#allocation2 + $0x39] sm:$0xff] %vm242_vm1, %v301_v18  ;;  %354 = vst.msk [vmem:[#allocation2 + $0x129] sm:$0xff] %vm242_vm1, %v321_v19  ;;  %v379_v28 = vld [vmem:[#allocation2 + $0xc0] sm:$0xff]  ;;  %v380_v29 = vld [vmem:[#allocation2 + $0xc8] sm:$0xff] }
  0x32   : > { %335 = vst.msk [vmem:[#allocation2 + $0x49] sm:$0xff] %vm242_vm1, %v302_v22  ;;  %355 = vst.msk [vmem:[#allocation2 + $0x139] sm:$0xff] %vm242_vm1, %v322_v23  ;;  %v381_v30 = vld [vmem:[#allocation2 + $0xd8] sm:$0xff]  ;;  %v382_v31 = vld [vmem:[#allocation2 + $0xe0] sm:$0xff] }
  0x33   : > { %336 = vst.msk [vmem:[#allocation2 + $0x51] sm:$0xff] %vm242_vm1, %v303_v24  ;;  %356 = vst.msk [vmem:[#allocation2 + $0x141] sm:$0xff] %vm242_vm1, %v323_v25  ;;  %v383_v32 = vld [vmem:[#allocation2 + $0xf0] sm:$0xff]  ;;  %v384_v33 = vld [vmem:[#allocation2 + $0xf8] sm:$0xff] }
  0x34   : > { %337 = vst.msk [vmem:[#allocation2 + $0x61] sm:$0xff] %vm242_vm1, %v304_v26  ;;  %357 = vst.msk [vmem:[#allocation2 + $0x151] sm:$0xff] %vm242_vm1, %v324_v27  ;;  %v435_v35 = vld [vmem:[#allocation3] sm:$0xff]  ;;  %v436_v36 = vld [vmem:[#allocation3 + $0x8] sm:$0xff] }
  0x35   : > { %415 = vst.msk [vmem:[#allocation3 + $0x80] sm:$0xff] %vm242_vm1, %v379_v28  ;;  %416 = vst.msk [vmem:[#allocation3 + $0x88] sm:$0xff] %vm242_vm1, %v380_v29  ;;  %5622 = vmatprep.mubr.msk.f32.mxu0 %vm242_vm1, %v435_v35  ;;  %v365_v38 = vld [vmem:[#allocation2 + $0x18] sm:$0xff]  ;;  %v385_v39 = vld [vmem:[#allocation2 + $0x108] sm:$0xff] }
  0x36   : > { %417 = vst.msk [vmem:[#allocation3 + $0x90] sm:$0xff] %vm242_vm1, %v381_v30  ;;  %418 = vst.msk [vmem:[#allocation3 + $0x98] sm:$0xff] %vm242_vm1, %v382_v31  ;;  %5623 = vmatmul.mubr.msk.f32.vlgmr.msra.gmra.mxu0 %vm242_vm1, %v436_v36  ;;  %v366_v41 = vld [vmem:[#allocation2 + $0x20] sm:$0xff]  ;;  %v386_v42 = vld [vmem:[#allocation2 + $0x110] sm:$0xff] }
  0x37   : > { %419 = vst.msk [vmem:[#allocation3 + $0xa0] sm:$0xff] %vm242_vm1, %v383_v32  ;;  %420 = vst.msk [vmem:[#allocation3 + $0xa8] sm:$0xff] %vm242_vm1, %v384_v33  ;;  %v367_v43 = vld [vmem:[#allocation2 + $0x30] sm:$0xff]  ;;  %5721 = vmatpush3.msk.msra.mxu0 %vm564_vm0, %v6296_v3  ;;  %v387_v44 = vld [vmem:[#allocation2 + $0x120] sm:$0xff] }
  0x38   : > { %1772 = vst.msk [vmem:[#allocation3] sm:$0xff] %vm242_vm1, %v1736_v20  ;;  %1773 = vst.msk [vmem:[#allocation3 + $0x8] sm:$0xff] %vm242_vm1, %v1737_v21  ;;  %v368_v45 = vld [vmem:[#allocation2 + $0x38] sm:$0xff]  ;;  %v388_v46 = vld [vmem:[#allocation2 + $0x128] sm:$0xff]  ;;  %5820 = vmatprep.subr.msk.mxu0 %vm564_vm0, %v6385_v34 }
  0x39   : > { %338 = vst.msk [vmem:[#allocation2 + $0x69] sm:$0xff] %vm242_vm1, %v305_v37  ;;  %401 = vst.msk [vmem:[#allocation3 + $0x10] sm:$0xff] %vm242_vm1, %v365_v38  ;;  %v369_v47 = vld [vmem:[#allocation2 + $0x48] sm:$0xff]  ;;  %v389_v48 = vld [vmem:[#allocation2 + $0x138] sm:$0xff] }
  0x3a   : > { %421 = vst.msk [vmem:[#allocation3 + $0xb0] sm:$0xff] %vm242_vm1, %v385_v39  ;;  %358 = vst.msk [vmem:[#allocation2 + $0x159] sm:$0xff] %vm242_vm1, %v325_v40  ;;  %v370_v49 = vld [vmem:[#allocation2 + $0x50] sm:$0xff]  ;;  %v390_v50 = vld [vmem:[#allocation2 + $0x140] sm:$0xff] }
  0x3b   : > { %402 = vst.msk [vmem:[#allocation3 + $0x18] sm:$0xff] %vm242_vm1, %v366_v41  ;;  %422 = vst.msk [vmem:[#allocation3 + $0xb8] sm:$0xff] %vm242_vm1, %v386_v42  ;;  %v371_v51 = vld [vmem:[#allocation2 + $0x60] sm:$0xff]  ;;  %v391_v52 = vld [vmem:[#allocation2 + $0x150] sm:$0xff] }
  0x3c   : > { %403 = vst.msk [vmem:[#allocation3 + $0x20] sm:$0xff] %vm242_vm1, %v367_v43  ;;  %423 = vst.msk [vmem:[#allocation3 + $0xc0] sm:$0xff] %vm242_vm1, %v387_v44  ;;  %v6413_v53 = vld [vmem:[#allocation3 + $0x80] sm:$0xff]  ;;  %v6415_v54 = vld [vmem:[#allocation3 + $0x88] sm:$0xff] }
  0x3d   : > { %404 = vst.msk [vmem:[#allocation3 + $0x28] sm:$0xff] %vm242_vm1, %v368_v45  ;;  %424 = vst.msk [vmem:[#allocation3 + $0xc8] sm:$0xff] %vm242_vm1, %v388_v46  ;;  %v6417_v55 = vld [vmem:[#allocation3 + $0x90] sm:$0xff]  ;;  %5646 = vmatprep.mubr.msk.f32.mxu1 %vm242_vm1, %v6413_v53  ;;  %v6437_v60 = vld [vmem:[#allocation3 + $0x98] sm:$0xff] }
  0x3e   : > { %405 = vst.msk [vmem:[#allocation3 + $0x30] sm:$0xff] %vm242_vm1, %v369_v47  ;;  %425 = vst.msk [vmem:[#allocation3 + $0xd0] sm:$0xff] %vm242_vm1, %v389_v48  ;;  %5647 = vmatmul.mubr.msk.f32.vlgmr.msra.gmra.mxu1 %vm242_vm1, %v6415_v54  ;;  %v6444_v63 = vld [vmem:[#allocation3 + $0xa0] sm:$0xff]  ;;  %v6465_v3 = vld [vmem:[#allocation3 + $0xa8] sm:$0xff] }
  0x3f   : > { %406 = vst.msk [vmem:[#allocation3 + $0x38] sm:$0xff] %vm242_vm1, %v370_v49  ;;  %426 = vst.msk [vmem:[#allocation3 + $0xd8] sm:$0xff] %vm242_vm1, %v390_v50  ;;  %5671 = vmatpush3.msk.msra.mxu1 %vm564_vm0, %v6289_v2  ;;  %5649 = vmatprep.mubr.msk.f32.mxu1 %vm242_vm1, %v6417_v55  ;;  %v1738_v11 = vld [vmem:[#allocation2 + $0x19] sm:$0xff]  ;;  %v1739_v13 = vld [vmem:[#allocation2 + $0x21] sm:$0xff] }
  0x40   : > { %407 = vst.msk [vmem:[#allocation3 + $0x40] sm:$0xff] %vm242_vm1, %v371_v51  ;;  %427 = vst.msk [vmem:[#allocation3 + $0xe0] sm:$0xff] %vm242_vm1, %v391_v52  ;;  %v372_v57 = vld [vmem:[#allocation2 + $0x68] sm:$0xff]  ;;  %v6439_v61 = vld [vmem:[#allocation3 + $0x10] sm:$0xff]  ;;  %5770 = vmatprep.subr.msk.mxu1 %vm564_vm0, %v6427_v56 }
  0x41   : > { %408 = vst.msk [vmem:[#allocation3 + $0x48] sm:$0xff] %vm242_vm1, %v372_v57  ;;  %v392_v62 = vld [vmem:[#allocation2 + $0x158] sm:$0xff]  ;;  %339 = vst.msk [vmem:[#allocation2 + $0x79] sm:$0xff] %vm242_vm1, %v306_v58  ;;  %5625 = vmatprep.mubr.msk.f32.mxu0 %vm242_vm1, %v6439_v61  ;;  %v6467_v4 = vld [vmem:[#allocation3 + $0xb0] sm:$0xff] }
  0x42   : > { %359 = vst.msk [vmem:[#allocation2 + $0x169] sm:$0xff] %vm242_vm1, %v326_v59  ;;  %v6448_v0 = vld [vmem:[#allocation3 + $0x18] sm:$0xff]  ;;  %428 = vst.msk [vmem:[#allocation3 + $0xe8] sm:$0xff] %vm242_vm1, %v392_v62  ;;  %5650 = vmatmul.mubr.msk.f32.gmra.mxu1 %vm242_vm1, %v6437_v60  ;;  %v310_v19 = vld [vmem:[%s6335_s30 + $0x60] sm:$0xff] }
  0x43   : > { %v6450_v1 = vld [vmem:[#allocation3 + $0x20] sm:$0xff]  ;;  %5626 = vmatmul.mubr.msk.f32.gmra.mxu0 %vm242_vm1, %v6448_v0  ;;  %5652 = vmatprep.mubr.msk.f32.mxu1 %vm242_vm1, %v6444_v63  ;;  %v6476_v10 = vld [vmem:[#allocation3 + $0xb8] sm:$0xff]  ;;  %340 = vst.msk [vmem:[#allocation2 + $0x81] sm:$0xff] %vm242_vm1, %v307_v7  ;;  %360 = vst.msk [vmem:[#allocation2 + $0x171] sm:$0xff] %vm242_vm1, %v327_v8 }
  0x44   : > { %5628 = vmatprep.mubr.msk.f32.mxu0 %vm242_vm1, %v6450_v1  ;;  %v6461_v2 = vld [vmem:[#allocation3 + $0x28] sm:$0xff]  ;;  %341 = vst.msk [vmem:[#allocation2 + $0x91] sm:$0xff] %vm242_vm1, %v308_v9  ;;  %v6486_v14 = vld [vmem:[#allocation3 + $0xc0] sm:$0xff]  ;;  %1774 = vst.msk [vmem:[#allocation3 + $0x10] sm:$0xff] %vm242_vm1, %v1738_v11 }
  0x45   : > { %v6469_v5 = vld [vmem:[#allocation3 + $0x30] sm:$0xff]  ;;  %342 = vst.msk [vmem:[#allocation2 + $0x99] sm:$0xff] %vm242_vm1, %v309_v12  ;;  %1775 = vst.msk [vmem:[#allocation3 + $0x18] sm:$0xff] %vm242_vm1, %v1739_v13  ;;  %v311_v20 = vld [vmem:[%s6335_s30 + $0x68] sm:$0xff] }
  0x46   : > { %v6471_v6 = vld [vmem:[#allocation3 + $0x38] sm:$0xff]  ;;  %5653 = vmatmul.mubr.msk.f32.gmra.mxu1 %vm242_vm1, %v6465_v3  ;;  %343 = vst.msk [vmem:[#allocation2 + $0xa9] sm:$0xff] %vm242_vm1, %v310_v19  ;;  %344 = vst.msk [vmem:[#allocation2 + $0xb1] sm:$0xff] %vm242_vm1, %v311_v20  ;;  %v1740_v21 = vld [vmem:[#allocation2 + $0x31] sm:$0xff] }
  0x47   : > { %5629 = vmatmul.mubr.msk.f32.gmra.mxu0 %vm242_vm1, %v6461_v2  ;;  %v6490_v15 = vld [vmem:[#allocation3 + $0x40] sm:$0xff]  ;;  %5655 = vmatprep.mubr.msk.f32.mxu1 %vm242_vm1, %v6467_v4  ;;  %v1741_v22 = vld [vmem:[#allocation2 + $0x39] sm:$0xff]  ;;  %1776 = vst.msk [vmem:[#allocation3 + $0x20] sm:$0xff] %vm242_vm1, %v1740_v21  ;;  %v1744_v26 = vld [vmem:[#allocation2 + $0x61] sm:$0xff] }
  0x48   : > { %5631 = vmatprep.mubr.msk.f32.mxu0 %vm242_vm1, %v6469_v5  ;;  %v373_v16 = vld [vmem:[#allocation2 + $0x78] sm:$0xff]  ;;  %v1742_v23 = vld [vmem:[#allocation2 + $0x49] sm:$0xff]  ;;  %1777 = vst.msk [vmem:[#allocation3 + $0x28] sm:$0xff] %vm242_vm1, %v1741_v22  ;;  %v6514_v28 = vld [vmem:[#allocation3 + $0xd0] sm:$0xff] }
  0x49   : > { %v393_v17 = vld [vmem:[#allocation2 + $0x168] sm:$0xff]  ;;  %v6497_v18 = vld [vmem:[#allocation3 + $0x48] sm:$0xff]  ;;  %409 = vst.msk [vmem:[#allocation3 + $0x50] sm:$0xff] %vm242_vm1, %v373_v16  ;;  %1778 = vst.msk [vmem:[#allocation3 + $0x30] sm:$0xff] %vm242_vm1, %v1742_v23 }
  0x4a   : > { %429 = vst.msk [vmem:[#allocation3 + $0xf0] sm:$0xff] %vm242_vm1, %v393_v17  ;;  %v6505_v24 = vld [vmem:[#allocation3 + $0xc8] sm:$0xff]  ;;  %v1745_v27 = vld [vmem:[#allocation2 + $0x69] sm:$0xff]  ;;  %5656 = vmatmul.mubr.msk.f32.gmra.mxu1 %vm242_vm1, %v6476_v10  ;;  %1780 = vst.msk [vmem:[#allocation3 + $0x40] sm:$0xff] %vm242_vm1, %v1744_v26 }
  0x4b   : > { %5632 = vmatmul.mubr.msk.f32.gmra.mxu0 %vm242_vm1, %v6471_v6  ;;  %v1743_v25 = vld [vmem:[#allocation2 + $0x51] sm:$0xff]  ;;  %1781 = vst.msk [vmem:[#allocation3 + $0x48] sm:$0xff] %vm242_vm1, %v1745_v27  ;;  %v1746_v29 = vld [vmem:[#allocation2 + $0x79] sm:$0xff]  ;;  %v1752_v30 = vld [vmem:[#allocation2 + $0xc1] sm:$0xff]  ;;  %5658 = vmatprep.mubr.msk.f32.mxu1 %vm242_vm1, %v6486_v14 }
  0x4c   : > { %5634 = vmatprep.mubr.msk.f32.mxu0 %vm242_vm1, %v6490_v15  ;;  %1779 = vst.msk [vmem:[#allocation3 + $0x38] sm:$0xff] %vm242_vm1, %v1743_v25  ;;  %v1753_v31 = vld [vmem:[#allocation2 + $0xc9] sm:$0xff]  ;;  %1788 = vst.msk [vmem:[#allocation3 + $0x80] sm:$0xff] %vm242_vm1, %v1752_v30  ;;  %v1754_v32 = vld [vmem:[#allocation2 + $0xd9] sm:$0xff] }
  0x4d   : > { %1789 = vst.msk [vmem:[#allocation3 + $0x88] sm:$0xff] %vm242_vm1, %v1753_v31  ;;  %v1755_v33 = vld [vmem:[#allocation2 + $0xe1] sm:$0xff]  ;;  %v1756_v35 = vld [vmem:[#allocation2 + $0xf1] sm:$0xff]  ;;  %1790 = vst.msk [vmem:[#allocation3 + $0x90] sm:$0xff] %vm242_vm1, %v1754_v32 }
  0x4e   : > { %v374_v36 = vld [vmem:[#allocation2 + $0x80] sm:$0xff]  ;;  %v394_v37 = vld [vmem:[#allocation2 + $0x170] sm:$0xff]  ;;  %1791 = vst.msk [vmem:[#allocation3 + $0x98] sm:$0xff] %vm242_vm1, %v1755_v33  ;;  %1792 = vst.msk [vmem:[#allocation3 + $0xa0] sm:$0xff] %vm242_vm1, %v1756_v35  ;;  %5659 = vmatmul.mubr.msk.f32.gmra.mxu1 %vm242_vm1, %v6505_v24 }
  0x4f   : > { %v375_v38 = vld [vmem:[#allocation2 + $0x90] sm:$0xff]  ;;  %5635 = vmatmul.mubr.msk.f32.gmra.mxu0 %vm242_vm1, %v6497_v18  ;;  %410 = vst.msk [vmem:[#allocation3 + $0x58] sm:$0xff] %vm242_vm1, %v374_v36  ;;  %430 = vst.msk [vmem:[#allocation3 + $0xf8] sm:$0xff] %vm242_vm1, %v394_v37  ;;  %v376_v39 = vld [vmem:[#allocation2 + $0x98] sm:$0xff]  ;;  %5661 = vmatprep.mubr.msk.f32.mxu1 %vm242_vm1, %v6514_v28 }
  0x50   : > { %411 = vst.msk [vmem:[#allocation3 + $0x60] sm:$0xff] %vm242_vm1, %v375_v38  ;;  %v6535_v40 = vld [vmem:[#allocation3 + $0xd8] sm:$0xff]  ;;  %v6537_v41 = vld [vmem:[#allocation3 + $0x50] sm:$0xff]  ;;  %412 = vst.msk [vmem:[#allocation3 + $0x68] sm:$0xff] %vm242_vm1, %v376_v39 }
  0x51   : > { %v6542_v42 = vld [vmem:[#allocation3 + $0xe0] sm:$0xff]  ;;  %5637 = vmatprep.mubr.msk.f32.mxu0 %vm242_vm1, %v6537_v41  ;;  %v377_v43 = vld [vmem:[#allocation2 + $0xa8] sm:$0xff]  ;;  %1782 = vst.msk [vmem:[#allocation3 + $0x50] sm:$0xff] %vm242_vm1, %v1746_v29  ;;  %v1757_v47 = vld [vmem:[#allocation2 + $0xf9] sm:$0xff] }
  0x52   : > { %v378_v44 = vld [vmem:[#allocation2 + $0xb0] sm:$0xff]  ;;  %413 = vst.msk [vmem:[#allocation3 + $0x70] sm:$0xff] %vm242_vm1, %v377_v43  ;;  %v1747_v45 = vld [vmem:[#allocation2 + $0x81] sm:$0xff]  ;;  %v6549_v49 = vld [vmem:[#allocation3 + $0xe8] sm:$0xff]  ;;  %5662 = vmatmul.mubr.msk.f32.gmra.mxu1 %vm242_vm1, %v6535_v40 }
  0x53   : > { %414 = vst.msk [vmem:[#allocation3 + $0x78] sm:$0xff] %vm242_vm1, %v378_v44  ;;  %v1748_v46 = vld [vmem:[#allocation2 + $0x91] sm:$0xff]  ;;  %v1758_v48 = vld [vmem:[#allocation2 + $0x109] sm:$0xff]  ;;  %v6551_v50 = vld [vmem:[#allocation3 + $0xf0] sm:$0xff]  ;;  %5664 = vmatprep.mubr.msk.f32.mxu1 %vm242_vm1, %v6542_v42 }
  0x54   : > { %v1749_v51 = vld [vmem:[#allocation2 + $0x99] sm:$0xff]  ;;  %1793 = vst.msk [vmem:[#allocation3 + $0xa8] sm:$0xff] %vm242_vm1, %v1757_v47  ;;  %1794 = vst.msk [vmem:[#allocation3 + $0xb0] sm:$0xff] %vm242_vm1, %v1758_v48  ;;  %v1759_v52 = vld [vmem:[#allocation2 + $0x111] sm:$0xff] }
  0x55   : > { %v1760_v57 = vld [vmem:[#allocation2 + $0x121] sm:$0xff]  ;;  %v1761_v58 = vld [vmem:[#allocation2 + $0x129] sm:$0xff]  ;;  %1795 = vst.msk [vmem:[#allocation3 + $0xb8] sm:$0xff] %vm242_vm1, %v1759_v52  ;;  %v1762_v59 = vld [vmem:[#allocation2 + $0x139] sm:$0xff] }
  0x56   : > { %1796 = vst.msk [vmem:[#allocation3 + $0xc0] sm:$0xff] %vm242_vm1, %v1760_v57  ;;  %1797 = vst.msk [vmem:[#allocation3 + $0xc8] sm:$0xff] %vm242_vm1, %v1761_v58  ;;  %v1763_v62 = vld [vmem:[#allocation2 + $0x141] sm:$0xff]  ;;  %v1764_v7 = vld [vmem:[#allocation2 + $0x151] sm:$0xff]  ;;  %5665 = vmatmul.mubr.msk.f32.gmra.mxu1 %vm242_vm1, %v6549_v49 }
  0x57   : > { %v1750_v8 = vld [vmem:[#allocation2 + $0xa9] sm:$0xff]  ;;  %v1751_v9 = vld [vmem:[#allocation2 + $0xb1] sm:$0xff]  ;;  %1798 = vst.msk [vmem:[#allocation3 + $0xd0] sm:$0xff] %vm242_vm1, %v1762_v59  ;;  %1799 = vst.msk [vmem:[#allocation3 + $0xd8] sm:$0xff] %vm242_vm1, %v1763_v62  ;;  %5667 = vmatprep.mubr.msk.f32.mxu1 %vm242_vm1, %v6551_v50 }
  0x58   : > { %1800 = vst.msk [vmem:[#allocation3 + $0xe0] sm:$0xff] %vm242_vm1, %v1764_v7  ;;  %v1765_v11 = vld [vmem:[#allocation2 + $0x159] sm:$0xff]  ;;  %v328_v12 = vld [vmem:[%s6335_s30 + $0xf0] sm:$0xff]  ;;  %v6566_v16 = vld [vmem:[#allocation3 + $0x58] sm:$0xff] }
  0x59   : > { %v1766_v13 = vld [vmem:[#allocation2 + $0x169] sm:$0xff]  ;;  %1801 = vst.msk [vmem:[#allocation3 + $0xe8] sm:$0xff] %vm242_vm1, %v1765_v11  ;;  %361 = vst.msk [vmem:[#allocation2 + $0x181] sm:$0xff] %vm242_vm1, %v328_v12  ;;  %5638 = vmatmul.mubr.msk.f32.gmra.mxu0 %vm242_vm1, %v6566_v16  ;;  %v6577_v20 = vld [vmem:[#allocation3 + $0x68] sm:$0xff] }
  0x5a   : > { %v6568_v17 = vld [vmem:[#allocation3 + $0xf8] sm:$0xff]  ;;  %v6570_v19 = vld [vmem:[#allocation3 + $0x60] sm:$0xff]  ;;  %1802 = vst.msk [vmem:[#allocation3 + $0xf0] sm:$0xff] %vm242_vm1, %v1766_v13  ;;  %1783 = vst.msk [vmem:[#allocation3 + $0x58] sm:$0xff] %vm242_vm1, %v1747_v45 }
  0x5b   : > { %1784 = vst.msk [vmem:[#allocation3 + $0x60] sm:$0xff] %vm242_vm1, %v1748_v46  ;;  %v329_v21 = vld [vmem:[%s6335_s30 + $0xf8] sm:$0xff]  ;;  %5640 = vmatprep.mubr.msk.f32.mxu0 %vm242_vm1, %v6570_v19  ;;  %1785 = vst.msk [vmem:[#allocation3 + $0x68] sm:$0xff] %vm242_vm1, %v1749_v51  ;;  %v6589_v23 = vld [vmem:[#allocation3] sm:$0xff]  ;;  %5668 = vmatmul.mubr.msk.f32.gmra.mxu1 %vm242_vm1, %v6568_v17 }
  0x5c   : > { %v1767_v22 = vld [vmem:[#allocation2 + $0x171] sm:$0xff]  ;;  %362 = vst.msk [vmem:[#allocation2 + $0x189] sm:$0xff] %vm242_vm1, %v329_v21  ;;  %v3170_v25 = vld [vmem:[#allocation2 + $0x2] sm:$0xff]  ;;  %v3172_v35 = vld [vmem:[#allocation2 + $0x1a] sm:$0xff]  ;;  %5672 = vmatprep.mubr.msk.f32.mxu1 %vm242_vm1, %v6439_v61 }
  0x5d   : > { %1803 = vst.msk [vmem:[#allocation3 + $0xf8] sm:$0xff] %vm242_vm1, %v1767_v22  ;;  %v6591_v26 = vld [vmem:[#allocation3 + $0x8] sm:$0xff]  ;;  %v6595_v27 = vld [vmem:[#allocation3 + $0x70] sm:$0xff]  ;;  %v6597_v29 = vld [vmem:[#allocation3 + $0x78] sm:$0xff]  ;;  %5641 = vmatmul.mubr.msk.f32.gmra.mxu0 %vm242_vm1, %v6577_v20 }
  0x5e   : > { %3206 = vst.msk [vmem:[#allocation3] sm:$0xff] %vm242_vm1, %v3170_v25  ;;  %v3171_v30 = vld [vmem:[#allocation2 + $0xa] sm:$0xff]  ;;  %1786 = vst.msk [vmem:[#allocation3 + $0x70] sm:$0xff] %vm242_vm1, %v1750_v8  ;;  %v397_v31 = vld [vmem:[#allocation2 + $0x198] sm:$0xff]  ;;  %5643 = vmatprep.mubr.msk.f32.mxu0 %vm242_vm1, %v6595_v27 }
  0x5f   : > { %1787 = vst.msk [vmem:[#allocation3 + $0x78] sm:$0xff] %vm242_vm1, %v1751_v9  ;;  %3207 = vst.msk [vmem:[#allocation3 + $0x8] sm:$0xff] %vm242_vm1, %v3171_v30  ;;  %v398_v32 = vld [vmem:[#allocation2 + $0x1a0] sm:$0xff]  ;;  %v6615_v37 = vld [vmem:[#allocation3 + $0x18] sm:$0xff]  ;;  %5673 = vmatmul.mubr.msk.f32.vlgmr.msra.gmra.mxu1 %vm242_vm1, %v6448_v0 }
  0x60   : > { %433 = vst.msk [vmem:[#allocation3 + $0x110] sm:$0xff] %vm242_vm1, %v397_v31  ;;  %v6610_v33 = vld [vmem:[#allocation3 + $0x10] sm:$0xff]  ;;  %434 = vst.msk [vmem:[#allocation3 + $0x118] sm:$0xff] %vm242_vm1, %v398_v32  ;;  %v6625_v43 = vld [vmem:[%s7989_s1 + $0x1c] sm:$0xf]  ;;  %5771 = vmatpush3.msk.msra.mxu1 %vm564_vm0, %v6427_v56  ;;  %5675 = vmatprep.mubr.msk.f32.mxu1 %vm242_vm1, %v6450_v1 }
  0x61   : > { %v395_v36 = vld [vmem:[#allocation2 + $0x180] sm:$0xff]  ;;  %3208 = vst.msk [vmem:[#allocation3 + $0x10] sm:$0xff] %vm242_vm1, %v3172_v35  ;;  %5644 = vmatmul.mubr.msk.f32.gmra.mxu0 %vm242_vm1, %v6597_v29  ;;  %5870 = vmatprep.subr.msk.mxu1 %vm564_vm0, %v6625_v43  ;;  %v6648_v56 = vld [vmem:[%s7989_s1 + $0x8] sm:$0xf]  ;;  %v3174_v51 = vld [vmem:[#allocation2 + $0x32] sm:$0xff] }
  0x62   : > { %v3173_v38 = vld [vmem:[#allocation2 + $0x22] sm:$0xff]  ;;  %431 = vst.msk [vmem:[#allocation3 + $0x100] sm:$0xff] %vm242_vm1, %v395_v36  ;;  %5722 = vmatprep.mubr.msk.f32.mxu0 %vm242_vm1, %v6450_v1  ;;  %v1770_v61 = vld [vmem:[#allocation2 + $0x199] sm:$0xff]  ;;  %v3176_v58 = vld [vmem:[#allocation2 + $0x4a] sm:$0xff] }
  0x63   : > { %3209 = vst.msk [vmem:[#allocation3 + $0x18] sm:$0xff] %vm242_vm1, %v3173_v38  ;;  %v396_v39 = vld [vmem:[#allocation2 + $0x188] sm:$0xff]  ;;  %5676 = vmatmul.mubr.msk.f32.gmra.mxu1 %vm242_vm1, %v6461_v2  ;;  %v6677_v48 = vld [vmem:[#allocation3 + $0x30] sm:$0xff]  ;;  %v3177_v59 = vld [vmem:[#allocation2 + $0x52] sm:$0xff] }
  0x64   : > { %432 = vst.msk [vmem:[#allocation3 + $0x108] sm:$0xff] %vm242_vm1, %v396_v39  ;;  %v1771_v44 = vld [vmem:[#allocation2 + $0x1a1] sm:$0xff]  ;;  %5678 = vmatprep.mubr.msk.f32.mxu1 %vm242_vm1, %v6469_v5  ;;  %v1769_v47 = vld [vmem:[#allocation2 + $0x189] sm:$0xff]  ;;  %3212 = vst.msk [vmem:[#allocation3 + $0x30] sm:$0xff] %vm242_vm1, %v3176_v58 }
  0x65   : > { %5723 = vmatmul.mubr.msk.f32.vlgmr.msra.gmra.mxu0 %vm242_vm1, %v6461_v2  ;;  %v1768_v0 = vld [vmem:[#allocation2 + $0x181] sm:$0xff]  ;;  %v6668_v2 = vld [vmem:[#allocation3 + $0x20] sm:$0xff]  ;;  %v6690_v7 = vld [vmem:[#allocation3 + $0x48] sm:$0xff] }
  0x66   : > { %5821 = vmatpush3.msk.msra.mxu0 %vm564_vm0, %v6385_v34  ;;  %5725 = vmatprep.mubr.msk.f32.mxu0 %vm242_vm1, %v6469_v5  ;;  %v6675_v5 = vld [vmem:[#allocation3 + $0x28] sm:$0xff]  ;;  %v6681_v52 = vld [vmem:[#allocation3 + $0x38] sm:$0xff]  ;;  %3210 = vst.msk [vmem:[#allocation3 + $0x20] sm:$0xff] %vm242_vm1, %v3174_v51  ;;  %v6705_v13 = vld [vmem:[#allocation3 + $0x60] sm:$0xff] }
  0x67   : > { %v6638_v45 = vld [vmem:[#allocation3 + $0x110] sm:$0xff]  ;;  %v6643_v46 = vld [vmem:[#allocation3 + $0x118] sm:$0xff]  ;;  %5920 = vmatprep.subr.msk.mxu0 %vm564_vm0, %v6648_v56  ;;  %5679 = vmatmul.mubr.msk.f32.gmra.mxu1 %vm242_vm1, %v6471_v6  ;;  %3213 = vst.msk [vmem:[#allocation3 + $0x38] sm:$0xff] %vm242_vm1, %v3177_v59  ;;  %v3182_v21 = vld [vmem:[#allocation2 + $0x92] sm:$0xff] }
  0x68   : > { %1806 = vst.msk [vmem:[#allocation3 + $0x110] sm:$0xff] %vm242_vm1, %v1770_v61  ;;  %1807 = vst.msk [vmem:[#allocation3 + $0x118] sm:$0xff] %vm242_vm1, %v1771_v44  ;;  %5681 = vmatprep.mubr.msk.f32.mxu1 %vm242_vm1, %v6490_v15  ;;  %v3175_v57 = vld [vmem:[#allocation2 + $0x3a] sm:$0xff]  ;;  %v3178_v62 = vld [vmem:[#allocation2 + $0x62] sm:$0xff] }
  0x69   : > { %v6659_v1 = vld [vmem:[#allocation3 + $0x100] sm:$0xff]  ;;  %5726 = vmatmul.mubr.msk.f32.gmra.mxu0 %vm242_vm1, %v6471_v6  ;;  %3211 = vst.msk [vmem:[#allocation3 + $0x28] sm:$0xff] %vm242_vm1, %v3175_v57  ;;  %v6700_v9 = vld [vmem:[#allocation3 + $0x58] sm:$0xff]  ;;  %v3180_v11 = vld [vmem:[#allocation2 + $0x7a] sm:$0xff] }
  0x6a   : > { %1804 = vst.msk [vmem:[#allocation3 + $0x100] sm:$0xff] %vm242_vm1, %v1768_v0  ;;  %5728 = vmatprep.mubr.msk.f32.mxu0 %vm242_vm1, %v6490_v15  ;;  %v6684_v6 = vld [vmem:[#allocation3 + $0x40] sm:$0xff]  ;;  %v6692_v15 = vld [vmem:[#allocation3 + $0x50] sm:$0xff]  ;;  %3218 = vst.msk [vmem:[#allocation3 + $0x60] sm:$0xff] %vm242_vm1, %v3182_v21 }
  0x6b   : > { %v6666_v34 = vld [vmem:[#allocation3 + $0x108] sm:$0xff]  ;;  %3214 = vst.msk [vmem:[#allocation3 + $0x40] sm:$0xff] %vm242_vm1, %v3178_v62  ;;  %v3179_v8 = vld [vmem:[#allocation2 + $0x6a] sm:$0xff]  ;;  %5682 = vmatmul.mubr.msk.f32.gmra.mxu1 %vm242_vm1, %v6497_v18  ;;  %v3181_v12 = vld [vmem:[#allocation2 + $0x82] sm:$0xff] }
  0x6c   : > { %1805 = vst.msk [vmem:[#allocation3 + $0x108] sm:$0xff] %vm242_vm1, %v1769_v47  ;;  %3215 = vst.msk [vmem:[#allocation3 + $0x48] sm:$0xff] %vm242_vm1, %v3179_v8  ;;  %5684 = vmatprep.mubr.msk.f32.mxu1 %vm242_vm1, %v6537_v41  ;;  %v6720_v22 = vld [vmem:[#allocation3 + $0x70] sm:$0xff]  ;;  %v3184_v25 = vld [vmem:[#allocation2 + $0xaa] sm:$0xff] }
  0x6d   : > { %5729 = vmatmul.mubr.msk.f32.gmra.mxu0 %vm242_vm1, %v6497_v18  ;;  %3216 = vst.msk [vmem:[#allocation3 + $0x50] sm:$0xff] %vm242_vm1, %v3180_v11  ;;  %3217 = vst.msk [vmem:[#allocation3 + $0x58] sm:$0xff] %vm242_vm1, %v3181_v12  ;;  %v6716_v18 = vld [vmem:[#allocation3 + $0x68] sm:$0xff]  ;;  %v3186_v31 = vld [vmem:[#allocation2 + $0xc2] sm:$0xff] }
  0x6e   : > { %5731 = vmatprep.mubr.msk.f32.mxu0 %vm242_vm1, %v6537_v41  ;;  %v3183_v41 = vld [vmem:[#allocation2 + $0x9a] sm:$0xff]  ;;  %3220 = vst.msk [vmem:[#allocation3 + $0x70] sm:$0xff] %vm242_vm1, %v3184_v25  ;;  %v3185_v30 = vld [vmem:[#allocation2 + $0xb2] sm:$0xff]  ;;  %v3187_v32 = vld [vmem:[#allocation2 + $0xca] sm:$0xff] }
  0x6f   : > { %5685 = vmatmul.mubr.msk.f32.gmra.mxu1 %vm242_vm1, %v6566_v16  ;;  %3219 = vst.msk [vmem:[#allocation3 + $0x68] sm:$0xff] %vm242_vm1, %v3183_v41  ;;  %v3188_v35 = vld [vmem:[#allocation2 + $0xda] sm:$0xff]  ;;  %v3189_v36 = vld [vmem:[#allocation2 + $0xe2] sm:$0xff]  ;;  %v3190_v38 = vld [vmem:[#allocation2 + $0xf2] sm:$0xff] }
  0x70   : > { %5687 = vmatprep.mubr.msk.f32.mxu1 %vm242_vm1, %v6570_v19  ;;  %v6779_v39 = vld [vmem:[#allocation3 + $0xb0] sm:$0xff]  ;;  %v3192_v61 = vld [vmem:[#allocation2 + $0x10a] sm:$0xff]  ;;  %v3198_v58 = vld [vmem:[#allocation2 + $0x152] sm:$0xff] }
  0x71   : > { %5732 = vmatmul.mubr.msk.f32.gmra.mxu0 %vm242_vm1, %v6566_v16  ;;  %v6730_v16 = vld [vmem:[#allocation3 + $0x78] sm:$0xff]  ;;  %3228 = vst.msk [vmem:[#allocation3 + $0xb0] sm:$0xff] %vm242_vm1, %v3192_v61  ;;  %v6793_v44 = vld [vmem:[#allocation3 + $0xc0] sm:$0xff]  ;;  %v6807_v47 = vld [vmem:[#allocation3 + $0xd0] sm:$0xff] }
  0x72   : > { %5734 = vmatprep.mubr.msk.f32.mxu0 %vm242_vm1, %v6570_v19  ;;  %v6734_v19 = vld [vmem:[#allocation3 + $0x80] sm:$0xff]  ;;  %3221 = vst.msk [vmem:[#allocation3 + $0x78] sm:$0xff] %vm242_vm1, %v3185_v30  ;;  %v3194_v0 = vld [vmem:[#allocation2 + $0x122] sm:$0xff]  ;;  %v3196_v51 = vld [vmem:[#allocation2 + $0x13a] sm:$0xff] }
  0x73   : > { %5688 = vmatmul.mubr.msk.f32.gmra.mxu1 %vm242_vm1, %v6577_v20  ;;  %3222 = vst.msk [vmem:[#allocation3 + $0x80] sm:$0xff] %vm242_vm1, %v3186_v31  ;;  %3230 = vst.msk [vmem:[#allocation3 + $0xc0] sm:$0xff] %vm242_vm1, %v3194_v0  ;;  %v6821_v57 = vld [vmem:[#allocation3 + $0xe0] sm:$0xff]  ;;  %v6835_v59 = vld [vmem:[#allocation3 + $0xf0] sm:$0xff] }
  0x74   : > { %5690 = vmatprep.mubr.msk.f32.mxu1 %vm242_vm1, %v6595_v27  ;;  %3232 = vst.msk [vmem:[#allocation3 + $0xd0] sm:$0xff] %vm242_vm1, %v3196_v51  ;;  %3234 = vst.msk [vmem:[#allocation3 + $0xe0] sm:$0xff] %vm242_vm1, %v3198_v58  ;;  %v3200_v62 = vld [vmem:[#allocation2 + $0x16a] sm:$0xff]  ;;  %v3202_v11 = vld [vmem:[#allocation2 + $0x182] sm:$0xff] }
  0x75   : > { %5735 = vmatmul.mubr.msk.f32.gmra.mxu0 %vm242_vm1, %v6577_v20  ;;  %v6744_v20 = vld [vmem:[#allocation3 + $0x88] sm:$0xff]  ;;  %3236 = vst.msk [vmem:[#allocation3 + $0xf0] sm:$0xff] %vm242_vm1, %v3200_v62  ;;  %v6849_v8 = vld [vmem:[#allocation3 + $0x100] sm:$0xff]  ;;  %v6863_v12 = vld [vmem:[#allocation3 + $0x110] sm:$0xff] }
  0x76   : > { %5737 = vmatprep.mubr.msk.f32.mxu0 %vm242_vm1, %v6595_v27  ;;  %v6748_v27 = vld [vmem:[#allocation3 + $0x90] sm:$0xff]  ;;  %3223 = vst.msk [vmem:[#allocation3 + $0x88] sm:$0xff] %vm242_vm1, %v3187_v32  ;;  %3238 = vst.msk [vmem:[#allocation3 + $0x100] sm:$0xff] %vm242_vm1, %v3202_v11 }
  0x77   : > { %5691 = vmatmul.mubr.msk.f32.gmra.mxu1 %vm242_vm1, %v6597_v29  ;;  %3224 = vst.msk [vmem:[#allocation3 + $0x90] sm:$0xff] %vm242_vm1, %v3188_v35  ;;  %v3204_v21 = vld [vmem:[#allocation2 + $0x19a] sm:$0xff] }
  0x78   : > { %5693 = vmatprep.mubr.msk.f32.mxu1 %vm242_vm1, %v6413_v53  ;;  %3240 = vst.msk [vmem:[#allocation3 + $0x110] sm:$0xff] %vm242_vm1, %v3204_v21 }
  0x79   : > { %5738 = vmatmul.mubr.msk.f32.gmra.mxu0 %vm242_vm1, %v6597_v29  ;;  %v6758_v29 = vld [vmem:[#allocation3 + $0x98] sm:$0xff] }
  0x7a   : > { %5740 = vmatprep.mubr.msk.f32.mxu0 %vm242_vm1, %v6413_v53  ;;  %v6762_v53 = vld [vmem:[#allocation3 + $0xa0] sm:$0xff]  ;;  %3225 = vst.msk [vmem:[#allocation3 + $0x98] sm:$0xff] %vm242_vm1, %v3189_v36 }
  0x7b   : > { %5694 = vmatmul.mubr.msk.f32.gmra.mxu1 %vm242_vm1, %v6415_v54  ;;  %3226 = vst.msk [vmem:[#allocation3 + $0xa0] sm:$0xff] %vm242_vm1, %v3190_v38  ;;  %v7177_v0 = vld [vmem:[#allocation3 + $0xc0] sm:$0xff] }
  0x7c   : > { %5696 = vmatprep.mubr.msk.f32.mxu1 %vm242_vm1, %v6417_v55  ;;  %v7223_v11 = vld [vmem:[#allocation3 + $0xf0] sm:$0xff] }
  0x7d   : > { %5741 = vmatmul.mubr.msk.f32.gmra.mxu0 %vm242_vm1, %v6415_v54  ;;  %v6774_v54 = vld [vmem:[#allocation3 + $0xa8] sm:$0xff] }
  0x7e   : > { %5743 = vmatprep.mubr.msk.f32.mxu0 %vm242_vm1, %v6417_v55  ;;  %v3191_v55 = vld [vmem:[#allocation2 + $0xfa] sm:$0xff] }
  0x7f   : > { %5697 = vmatmul.mubr.msk.f32.gmra.mxu1 %vm242_vm1, %v6437_v60  ;;  %3227 = vst.msk [vmem:[#allocation3 + $0xa8] sm:$0xff] %vm242_vm1, %v3191_v55  ;;  %v7130_v30 = vld [vmem:[#allocation3 + $0x90] sm:$0xff] }
  0x80   : > { %5699 = vmatprep.mubr.msk.f32.mxu1 %vm242_vm1, %v6444_v63  ;;  %v7161_v55 = vld [vmem:[#allocation3 + $0xb0] sm:$0xff] }
  0x81   : > { %5744 = vmatmul.mubr.msk.f32.gmra.mxu0 %vm242_vm1, %v6437_v60  ;;  %v6788_v60 = vld [vmem:[#allocation3 + $0xb8] sm:$0xff] }
  0x82   : > { %5746 = vmatprep.mubr.msk.f32.mxu0 %vm242_vm1, %v6444_v63  ;;  %v3193_v63 = vld [vmem:[#allocation2 + $0x112] sm:$0xff]  ;;  %v7140_v32 = vld [vmem:[#allocation3 + $0x98] sm:$0xff] }
  0x83   : > { %5700 = vmatmul.mubr.msk.f32.gmra.mxu1 %vm242_vm1, %v6465_v3  ;;  %3229 = vst.msk [vmem:[#allocation3 + $0xb8] sm:$0xff] %vm242_vm1, %v3193_v63  ;;  %v7145_v35 = vld [vmem:[#allocation3 + $0xa0] sm:$0xff] }
  0x84   : > { %5702 = vmatprep.mubr.msk.f32.mxu1 %vm242_vm1, %v6467_v4 }
  0x85   : > { %5747 = vmatmul.mubr.msk.f32.gmra.mxu0 %vm242_vm1, %v6465_v3  ;;  %v6802_v3 = vld [vmem:[#allocation3 + $0xc8] sm:$0xff] }
  0x86   : > { %5749 = vmatprep.mubr.msk.f32.mxu0 %vm242_vm1, %v6467_v4  ;;  %v3195_v4 = vld [vmem:[#allocation2 + $0x12a] sm:$0xff]  ;;  %v7156_v38 = vld [vmem:[#allocation3 + $0xa8] sm:$0xff] }
  0x87   : > { %5703 = vmatmul.mubr.msk.f32.gmra.mxu1 %vm242_vm1, %v6476_v10  ;;  %3231 = vst.msk [vmem:[#allocation3 + $0xc8] sm:$0xff] %vm242_vm1, %v3195_v4 }
  0x88   : > { %5705 = vmatprep.mubr.msk.f32.mxu1 %vm242_vm1, %v6486_v14 }
  0x89   : > { %5750 = vmatmul.mubr.msk.f32.gmra.mxu0 %vm242_vm1, %v6476_v10  ;;  %v6816_v10 = vld [vmem:[#allocation3 + $0xd8] sm:$0xff] }
  0x8a   : > { %5752 = vmatprep.mubr.msk.f32.mxu0 %vm242_vm1, %v6486_v14  ;;  %v3197_v14 = vld [vmem:[#allocation2 + $0x142] sm:$0xff] }
  0x8b   : > { %5706 = vmatmul.mubr.msk.f32.gmra.mxu1 %vm242_vm1, %v6505_v24  ;;  %3233 = vst.msk [vmem:[#allocation3 + $0xd8] sm:$0xff] %vm242_vm1, %v3197_v14  ;;  %v7172_v63 = vld [vmem:[#allocation3 + $0xb8] sm:$0xff]  ;;  %v7193_v14 = vld [vmem:[#allocation3 + $0xd0] sm:$0xff] }
  0x8c   : > { %5708 = vmatprep.mubr.msk.f32.mxu1 %vm242_vm1, %v6514_v28 }
  0x8d   : > { %5753 = vmatmul.mubr.msk.f32.gmra.mxu0 %vm242_vm1, %v6505_v24  ;;  %v6830_v24 = vld [vmem:[#allocation3 + $0xe8] sm:$0xff] }
  0x8e   : > { %5755 = vmatprep.mubr.msk.f32.mxu0 %vm242_vm1, %v6514_v28  ;;  %v3199_v28 = vld [vmem:[#allocation2 + $0x15a] sm:$0xff] }
  0x8f   : > { %5709 = vmatmul.mubr.msk.f32.gmra.mxu1 %vm242_vm1, %v6535_v40  ;;  %3235 = vst.msk [vmem:[#allocation3 + $0xe8] sm:$0xff] %vm242_vm1, %v3199_v28  ;;  %v7188_v51 = vld [vmem:[#allocation3 + $0xc8] sm:$0xff]  ;;  %v7208_v28 = vld [vmem:[#allocation3 + $0xe0] sm:$0xff] }
  0x90   : > { %5711 = vmatprep.mubr.msk.f32.mxu1 %vm242_vm1, %v6542_v42 }
  0x91   : > { %5756 = vmatmul.mubr.msk.f32.gmra.mxu0 %vm242_vm1, %v6535_v40  ;;  %v6844_v40 = vld [vmem:[#allocation3 + $0xf8] sm:$0xff] }
  0x92   : > { %5758 = vmatprep.mubr.msk.f32.mxu0 %vm242_vm1, %v6542_v42  ;;  %v3201_v42 = vld [vmem:[#allocation2 + $0x172] sm:$0xff] }
  0x93   : > { %5712 = vmatmul.mubr.msk.f32.gmra.mxu1 %vm242_vm1, %v6549_v49  ;;  %3237 = vst.msk [vmem:[#allocation3 + $0xf8] sm:$0xff] %vm242_vm1, %v3201_v42 }
  0x94   : > { %5714 = vmatprep.mubr.msk.f32.mxu1 %vm242_vm1, %v6551_v50 }
  0x95   : > { %5759 = vmatmul.mubr.msk.f32.gmra.mxu0 %vm242_vm1, %v6549_v49  ;;  %v6858_v49 = vld [vmem:[#allocation3 + $0x108] sm:$0xff] }
  0x96   : > { %5761 = vmatprep.mubr.msk.f32.mxu0 %vm242_vm1, %v6551_v50  ;;  %v3203_v50 = vld [vmem:[#allocation2 + $0x18a] sm:$0xff]  ;;  %v7218_v42 = vld [vmem:[#allocation3 + $0xe8] sm:$0xff] }
  0x97   : > { %5715 = vmatmul.mubr.msk.f32.gmra.mxu1 %vm242_vm1, %v6568_v17  ;;  %3239 = vst.msk [vmem:[#allocation3 + $0x108] sm:$0xff] %vm242_vm1, %v3203_v50 }
  0x98   : > { %5717 = vmatprep.mubr.msk.f32.mxu1 %vm242_vm1, %v6659_v1 }
  0x99   : > { %5762 = vmatmul.mubr.msk.f32.gmra.mxu0 %vm242_vm1, %v6568_v17  ;;  %v6872_v17 = vld [vmem:[#allocation3 + $0x118] sm:$0xff] }
  0x9a   : > { %5764 = vmatprep.mubr.msk.f32.mxu0 %vm242_vm1, %v6659_v1  ;;  %v3205_v1 = vld [vmem:[#allocation2 + $0x1a2] sm:$0xff] }
  0x9b   : > { %5718 = vmatmul.mubr.msk.f32.gmra.mxu1 %vm242_vm1, %v6666_v34  ;;  %3241 = vst.msk [vmem:[#allocation3 + $0x118] sm:$0xff] %vm242_vm1, %v3205_v1 }
  0x9c   : > { %5772 = vmatprep.mubr.msk.f32.mxu1 %vm242_vm1, %v6589_v23  ;;  %v6897_v23 = vld [vmem:[%s7989_s1 + $0x20] sm:$0xf] }
  0x9d   : > { %5765 = vmatmul.mubr.msk.f32.gmra.mxu0 %vm242_vm1, %v6666_v34  ;;  %v6880_v34 = vld [vmem:[%s7989_s1 + $0x14] sm:$0xf] }
  0x9e   : > { %5767 = vmatprep.mubr.msk.f32.mxu0 %vm242_vm1, %v6638_v45  ;;  %v7043_v45 = vld [vmem:[#allocation3 + $0x20] sm:$0xff] }
  0x9f   : > { %5773 = vmatmul.mubr.msk.f32.vlgmr.msra.gmra.mxu1 %vm242_vm1, %v6591_v26  ;;  %v3242_v26 = vld [vmem:[#allocation3] sm:$0xff] }
  0xa0   : > { %5871 = vmatpush3.msk.msra.mxu1 %vm564_vm0, %v6625_v43  ;;  %5775 = vmatprep.mubr.msk.f32.mxu1 %vm242_vm1, %v6610_v33  ;;  %v7037_v43 = vld [vmem:[#allocation3 + $0x18] sm:$0xff] }
  0xa1   : > { %5768 = vmatmul.mubr.msk.f32.gmra.mxu0 %vm242_vm1, %v6643_v46  ;;  %5970 = vmatprep.subr.msk.mxu1 %vm564_vm0, %v6880_v34  ;;  %v7051_v46 = vld [vmem:[#allocation3 + $0x28] sm:$0xff] }
  0xa2   : > { %5822 = vmatprep.mubr.msk.f32.mxu0 %vm242_vm1, %v6610_v33  ;;  %v3243_v33 = vld [vmem:[#allocation3 + $0x8] sm:$0xff] }
  0xa3   : > { %5776 = vmatmul.mubr.msk.f32.gmra.mxu1 %vm242_vm1, %v6615_v37 }
  0xa4   : > { %5778 = vmatprep.mubr.msk.f32.mxu1 %vm242_vm1, %v6668_v2 }
  0xa5   : > { %5823 = vmatmul.mubr.msk.f32.vlgmr.msra.gmra.mxu0 %vm242_vm1, %v6615_v37  ;;  %v7030_v37 = vld [vmem:[#allocation3 + $0x10] sm:$0xff] }
  0xa6   : > { %5921 = vmatpush3.msk.msra.mxu0 %vm564_vm0, %v6648_v56  ;;  %5825 = vmatprep.mubr.msk.f32.mxu0 %vm242_vm1, %v6668_v2  ;;  %v7055_v56 = vld [vmem:[#allocation3 + $0x30] sm:$0xff] }
  0xa7   : > { %6020 = vmatprep.subr.msk.mxu0 %vm564_vm0, %v6897_v23  ;;  %5779 = vmatmul.mubr.msk.f32.gmra.mxu1 %vm242_vm1, %v6675_v5 }
  0xa8   : > { %5781 = vmatprep.mubr.msk.f32.mxu1 %vm242_vm1, %v6677_v48 }
  0xa9   : > { %5826 = vmatmul.mubr.msk.f32.gmra.mxu0 %vm242_vm1, %v6675_v5 }
  0xaa   : > { %5828 = vmatprep.mubr.msk.f32.mxu0 %vm242_vm1, %v6677_v48 }
  0xab   : > { %5782 = vmatmul.mubr.msk.f32.gmra.mxu1 %vm242_vm1, %v6681_v52 }
  0xac   : > { %5784 = vmatprep.mubr.msk.f32.mxu1 %vm242_vm1, %v6684_v6 }
  0xad   : > { %5829 = vmatmul.mubr.msk.f32.gmra.mxu0 %vm242_vm1, %v6681_v52 }
  0xae   : > { %5831 = vmatprep.mubr.msk.f32.mxu0 %vm242_vm1, %v6684_v6 }
  0xaf   : > { %5785 = vmatmul.mubr.msk.f32.gmra.mxu1 %vm242_vm1, %v6690_v7 }
  0xb0   : > { %5787 = vmatprep.mubr.msk.f32.mxu1 %vm242_vm1, %v6692_v15 }
  0xb1   : > { %5832 = vmatmul.mubr.msk.f32.gmra.mxu0 %vm242_vm1, %v6690_v7 }
  0xb2   : > { %5834 = vmatprep.mubr.msk.f32.mxu0 %vm242_vm1, %v6692_v15 }
  0xb3   : > { %5788 = vmatmul.mubr.msk.f32.gmra.mxu1 %vm242_vm1, %v6700_v9 }
  0xb4   : > { %5790 = vmatprep.mubr.msk.f32.mxu1 %vm242_vm1, %v6705_v13 }
  0xb5   : > { %5835 = vmatmul.mubr.msk.f32.gmra.mxu0 %vm242_vm1, %v6700_v9 }
  0xb6   : > { %5837 = vmatprep.mubr.msk.f32.mxu0 %vm242_vm1, %v6705_v13 }
  0xb7   : > { %5791 = vmatmul.mubr.msk.f32.gmra.mxu1 %vm242_vm1, %v6716_v18 }
  0xb8   : > { %5793 = vmatprep.mubr.msk.f32.mxu1 %vm242_vm1, %v6720_v22 }
  0xb9   : > { %5838 = vmatmul.mubr.msk.f32.gmra.mxu0 %vm242_vm1, %v6716_v18 }
  0xba   : > { %5840 = vmatprep.mubr.msk.f32.mxu0 %vm242_vm1, %v6720_v22 }
  0xbb   : > { %5794 = vmatmul.mubr.msk.f32.gmra.mxu1 %vm242_vm1, %v6730_v16 }
  0xbc   : > { %5796 = vmatprep.mubr.msk.f32.mxu1 %vm242_vm1, %v6734_v19 }
  0xbd   : > { %5841 = vmatmul.mubr.msk.f32.gmra.mxu0 %vm242_vm1, %v6730_v16 }
  0xbe   : > { %5843 = vmatprep.mubr.msk.f32.mxu0 %vm242_vm1, %v6734_v19 }
  0xbf   : > { %5797 = vmatmul.mubr.msk.f32.gmra.mxu1 %vm242_vm1, %v6744_v20 }
  0xc0   : > { %5799 = vmatprep.mubr.msk.f32.mxu1 %vm242_vm1, %v6748_v27 }
  0xc1   : > { %5844 = vmatmul.mubr.msk.f32.gmra.mxu0 %vm242_vm1, %v6744_v20 }
  0xc2   : > { %5846 = vmatprep.mubr.msk.f32.mxu0 %vm242_vm1, %v6748_v27 }
  0xc3   : > { %5800 = vmatmul.mubr.msk.f32.gmra.mxu1 %vm242_vm1, %v6758_v29 }
  0xc4   : > { %5802 = vmatprep.mubr.msk.f32.mxu1 %vm242_vm1, %v6762_v53 }
  0xc5   : > { %5847 = vmatmul.mubr.msk.f32.gmra.mxu0 %vm242_vm1, %v6758_v29 }
  0xc6   : > { %5849 = vmatprep.mubr.msk.f32.mxu0 %vm242_vm1, %v6762_v53 }
  0xc7   : > { %5803 = vmatmul.mubr.msk.f32.gmra.mxu1 %vm242_vm1, %v6774_v54 }
  0xc8   : > { %5805 = vmatprep.mubr.msk.f32.mxu1 %vm242_vm1, %v6779_v39 }
  0xc9   : > { %5850 = vmatmul.mubr.msk.f32.gmra.mxu0 %vm242_vm1, %v6774_v54 }
  0xca   : > { %5852 = vmatprep.mubr.msk.f32.mxu0 %vm242_vm1, %v6779_v39 }
  0xcb   : > { %5806 = vmatmul.mubr.msk.f32.gmra.mxu1 %vm242_vm1, %v6788_v60 }
  0xcc   : > { %5808 = vmatprep.mubr.msk.f32.mxu1 %vm242_vm1, %v6793_v44 }
  0xcd   : > { %5853 = vmatmul.mubr.msk.f32.gmra.mxu0 %vm242_vm1, %v6788_v60 }
  0xce   : > { %5855 = vmatprep.mubr.msk.f32.mxu0 %vm242_vm1, %v6793_v44 }
  0xcf   : > { %5809 = vmatmul.mubr.msk.f32.gmra.mxu1 %vm242_vm1, %v6802_v3 }
  0xd0   : > { %5811 = vmatprep.mubr.msk.f32.mxu1 %vm242_vm1, %v6807_v47 }
  0xd1   : > { %5856 = vmatmul.mubr.msk.f32.gmra.mxu0 %vm242_vm1, %v6802_v3 }
  0xd2   : > { %5858 = vmatprep.mubr.msk.f32.mxu0 %vm242_vm1, %v6807_v47 }
  0xd3   : > { %5812 = vmatmul.mubr.msk.f32.gmra.mxu1 %vm242_vm1, %v6816_v10 }
  0xd4   : > { %5814 = vmatprep.mubr.msk.f32.mxu1 %vm242_vm1, %v6821_v57 }
  0xd5   : > { %5859 = vmatmul.mubr.msk.f32.gmra.mxu0 %vm242_vm1, %v6816_v10 }
  0xd6   : > { %5861 = vmatprep.mubr.msk.f32.mxu0 %vm242_vm1, %v6821_v57 }
  0xd7   : > { %5815 = vmatmul.mubr.msk.f32.gmra.mxu1 %vm242_vm1, %v6830_v24 }
  0xd8   : > { %5817 = vmatprep.mubr.msk.f32.mxu1 %vm242_vm1, %v6835_v59 }
  0xd9   : > { %5862 = vmatmul.mubr.msk.f32.gmra.mxu0 %vm242_vm1, %v6830_v24 }
  0xda   : > { %5864 = vmatprep.mubr.msk.f32.mxu0 %vm242_vm1, %v6835_v59 }
  0xdb   : > { %5818 = vmatmul.mubr.msk.f32.gmra.mxu1 %vm242_vm1, %v6844_v40 }
  0xdc   : > { %5872 = vmatprep.mubr.msk.f32.mxu1 %vm242_vm1, %v6668_v2  ;;  %v7063_v2 = vld [vmem:[#allocation3 + $0x38] sm:$0xff] }
  0xdd   : > { %5865 = vmatmul.mubr.msk.f32.gmra.mxu0 %vm242_vm1, %v6844_v40 }
  0xde   : > { %5867 = vmatprep.mubr.msk.f32.mxu0 %vm242_vm1, %v6849_v8 }
  0xdf   : > { %5873 = vmatmul.mubr.msk.f32.vlgmr.msra.gmra.mxu1 %vm242_vm1, %v6675_v5  ;;  %v7067_v5 = vld [vmem:[#allocation3 + $0x40] sm:$0xff] }
  0xe0   : > { %5971 = vmatpush3.msk.msra.mxu1 %vm564_vm0, %v6880_v34  ;;  %5875 = vmatprep.mubr.msk.f32.mxu1 %vm242_vm1, %v6677_v48  ;;  %v7075_v48 = vld [vmem:[#allocation3 + $0x48] sm:$0xff] }
  0xe1   : > { %5868 = vmatmul.mubr.msk.f32.gmra.mxu0 %vm242_vm1, %v6858_v49 }
  0xe2   : > { %5922 = vmatprep.mubr.msk.f32.mxu0 %vm242_vm1, %v3242_v26 }
  0xe3   : > { %5876 = vmatmul.mubr.msk.f32.gmra.mxu1 %vm242_vm1, %v6681_v52  ;;  %v7079_v52 = vld [vmem:[#allocation3 + $0x50] sm:$0xff] }
  0xe4   : > { %5878 = vmatprep.mubr.msk.f32.mxu1 %vm242_vm1, %v6684_v6  ;;  %v7087_v6 = vld [vmem:[#allocation3 + $0x58] sm:$0xff] }
  0xe5   : > { %5923 = vmatmul.mubr.msk.f32.vlgmr.msra.gmra.mxu0 %vm242_vm1, %v3243_v33 }
  0xe6   : > { %6021 = vmatpush3.msk.msra.mxu0 %vm564_vm0, %v6897_v23  ;;  %5925 = vmatprep.mubr.msk.f32.mxu0 %vm242_vm1, %v7030_v37 }
  0xe7   : > { %5879 = vmatmul.mubr.msk.f32.gmra.mxu1 %vm242_vm1, %v6690_v7  ;;  %v7091_v7 = vld [vmem:[#allocation3 + $0x60] sm:$0xff] }
  0xe8   : > { %5881 = vmatprep.mubr.msk.f32.mxu1 %vm242_vm1, %v6692_v15  ;;  %v7099_v15 = vld [vmem:[#allocation3 + $0x68] sm:$0xff] }
  0xe9   : > { %5926 = vmatmul.mubr.msk.f32.gmra.mxu0 %vm242_vm1, %v7037_v43 }
  0xea   : > { %5928 = vmatprep.mubr.msk.f32.mxu0 %vm242_vm1, %v7043_v45 }
  0xeb   : > { %5882 = vmatmul.mubr.msk.f32.gmra.mxu1 %vm242_vm1, %v6700_v9  ;;  %v7103_v9 = vld [vmem:[#allocation3 + $0x70] sm:$0xff] }
  0xec   : > { %5884 = vmatprep.mubr.msk.f32.mxu1 %vm242_vm1, %v6705_v13 }
  0xed   : > { %5929 = vmatmul.mubr.msk.f32.gmra.mxu0 %vm242_vm1, %v7051_v46 }
  0xee   : > { %5931 = vmatprep.mubr.msk.f32.mxu0 %vm242_vm1, %v7055_v56 }
  0xef   : > { %5885 = vmatmul.mubr.msk.f32.gmra.mxu1 %vm242_vm1, %v6716_v18  ;;  %v7112_v18 = vld [vmem:[#allocation3 + $0x78] sm:$0xff] }
  0xf0   : > { %5887 = vmatprep.mubr.msk.f32.mxu1 %vm242_vm1, %v6720_v22  ;;  %v7116_v22 = vld [vmem:[#allocation3 + $0x80] sm:$0xff] }
  0xf1   : > { %5932 = vmatmul.mubr.msk.f32.gmra.mxu0 %vm242_vm1, %v7063_v2 }
  0xf2   : > { %5934 = vmatprep.mubr.msk.f32.mxu0 %vm242_vm1, %v7067_v5 }
  0xf3   : > { %5888 = vmatmul.mubr.msk.f32.gmra.mxu1 %vm242_vm1, %v6730_v16  ;;  %v7125_v16 = vld [vmem:[#allocation3 + $0x88] sm:$0xff] }
  0xf4   : > { %5890 = vmatprep.mubr.msk.f32.mxu1 %vm242_vm1, %v6734_v19 }
  0xf5   : > { %5935 = vmatmul.mubr.msk.f32.gmra.mxu0 %vm242_vm1, %v7075_v48 }
  0xf6   : > { %5937 = vmatprep.mubr.msk.f32.mxu0 %vm242_vm1, %v7079_v52  ;;  %v5624_v13 = vpop.f32.mrf.mxu0 }
  0xf7   : > { %5891 = vmatmul.mubr.msk.f32.gmra.mxu1 %vm242_vm1, %v6744_v20  ;;  %795 = vst.msk [vmem:[#allocation4 + $0x8] sm:$0xff] %vm793_vm3, %v5624_v13 }
  0xf8   : > { %5893 = vmatprep.mubr.msk.f32.mxu1 %vm242_vm1, %v6748_v27  ;;  %v634_v41 = vpop.f32.mrf.mxu0 }
  0xf9   : > { %5938 = vmatmul.mubr.msk.f32.gmra.mxu0 %vm242_vm1, %v7087_v6  ;;  %794 = vst.msk [vmem:[#allocation4] sm:$0xff] %vm793_vm3, %v634_v41 }
  0xfa   : > { %5940 = vmatprep.mubr.msk.f32.mxu0 %vm242_vm1, %v7091_v7 }
  0xfb   : > { %5894 = vmatmul.mubr.msk.f32.gmra.mxu1 %vm242_vm1, %v6758_v29 }
  0xfc   : > { %5896 = vmatprep.mubr.msk.f32.mxu1 %vm242_vm1, %v6762_v53 }
  0xfd   : > { %5941 = vmatmul.mubr.msk.f32.gmra.mxu0 %vm242_vm1, %v7099_v15 }
  0xfe   : > { %5943 = vmatprep.mubr.msk.f32.mxu0 %vm242_vm1, %v7103_v9  ;;  %v5648_v25 = vpop.f32.mrf.mxu1  ;;  %v1186_v26 = vld [vmem:[#allocation4 + $0x8] sm:$0xff] }
  0xff   : > { %5897 = vmatmul.mubr.msk.f32.gmra.mxu1 %vm242_vm1, %v6774_v54  ;;  %811 = vst.msk [vmem:[#allocation4 + $0x88] sm:$0xff] %vm793_vm3, %v5648_v25 }
 0x100   : > { %5899 = vmatprep.mubr.msk.f32.mxu1 %vm242_vm1, %v6779_v39  ;;  %v714_v19 = vpop.f32.mrf.mxu1  ;;  %v1185_v41 = vld [vmem:[#allocation4] sm:$0xff] }
 0x101   : > { %5944 = vmatmul.mubr.msk.f32.gmra.mxu0 %vm242_vm1, %v7112_v18  ;;  %810 = vst.msk [vmem:[#allocation4 + $0x80] sm:$0xff] %vm793_vm3, %v714_v19 }
 0x102   : > { %5946 = vmatprep.mubr.msk.f32.mxu0 %vm242_vm1, %v7116_v22  ;;  %v5651_v20 = vpop.f32.mrf.mxu1 }
 0x103   : > { %v5627_v31 = vpop.f32.mrf.mxu0  ;;  %5900 = vmatmul.mubr.msk.f32.gmra.mxu1 %vm242_vm1, %v6788_v60  ;;  %813 = vst.msk [vmem:[#allocation4 + $0x98] sm:$0xff] %vm793_vm3, %v5651_v20 }
 0x104   : > { %797 = vst.msk [vmem:[#allocation4 + $0x18] sm:$0xff] %vm793_vm3, %v5627_v31  ;;  %5902 = vmatprep.mubr.msk.f32.mxu1 %vm242_vm1, %v6793_v44  ;;  %v724_v29 = vpop.f32.mrf.mxu1 }
 0x105   : > { %5947 = vmatmul.mubr.msk.f32.gmra.mxu0 %vm242_vm1, %v7125_v16  ;;  %v644_v27 = vpop.f32.mrf.mxu0  ;;  %812 = vst.msk [vmem:[#allocation4 + $0x90] sm:$0xff] %vm793_vm3, %v724_v29 }
 0x106   : > { %5949 = vmatprep.mubr.msk.f32.mxu0 %vm242_vm1, %v7130_v30  ;;  %796 = vst.msk [vmem:[#allocation4 + $0x10] sm:$0xff] %vm793_vm3, %v644_v27  ;;  %v5654_v53 = vpop.f32.mrf.mxu1 }
 0x107   : > { %v5630_v36 = vpop.f32.mrf.mxu0  ;;  %5903 = vmatmul.mubr.msk.f32.gmra.mxu1 %vm242_vm1, %v6802_v3  ;;  %815 = vst.msk [vmem:[#allocation4 + $0xa8] sm:$0xff] %vm793_vm3, %v5654_v53 }
 0x108   : > { %799 = vst.msk [vmem:[#allocation4 + $0x28] sm:$0xff] %vm793_vm3, %v5630_v36  ;;  %5905 = vmatprep.mubr.msk.f32.mxu1 %vm242_vm1, %v6807_v47  ;;  %v734_v39 = vpop.f32.mrf.mxu1 }
 0x109   : > { %5950 = vmatmul.mubr.msk.f32.gmra.mxu0 %vm242_vm1, %v7140_v32  ;;  %v654_v54 = vpop.f32.mrf.mxu0  ;;  %814 = vst.msk [vmem:[#allocation4 + $0xa0] sm:$0xff] %vm793_vm3, %v734_v39 }
 0x10a   : > { %5952 = vmatprep.mubr.msk.f32.mxu0 %vm242_vm1, %v7145_v35  ;;  %798 = vst.msk [vmem:[#allocation4 + $0x20] sm:$0xff] %vm793_vm3, %v654_v54  ;;  %v5657_v60 = vpop.f32.mrf.mxu1 }
 0x10b   : > { %v5633_v61 = vpop.f32.mrf.mxu0  ;;  %5906 = vmatmul.mubr.msk.f32.gmra.mxu1 %vm242_vm1, %v6816_v10  ;;  %817 = vst.msk [vmem:[#allocation4 + $0xb8] sm:$0xff] %vm793_vm3, %v5657_v60  ;;  %v1188_v31 = vld [vmem:[#allocation4 + $0x18] sm:$0xff] }
 0x10c   : > { %801 = vst.msk [vmem:[#allocation4 + $0x38] sm:$0xff] %vm793_vm3, %v5633_v61  ;;  %5908 = vmatprep.mubr.msk.f32.mxu1 %vm242_vm1, %v6821_v57  ;;  %v744_v3 = vpop.f32.mrf.mxu1 }
 0x10d   : > { %5953 = vmatmul.mubr.msk.f32.gmra.mxu0 %vm242_vm1, %v7156_v38  ;;  %v664_v44 = vpop.f32.mrf.mxu0  ;;  %816 = vst.msk [vmem:[#allocation4 + $0xb0] sm:$0xff] %vm793_vm3, %v744_v3  ;;  %v1187_v29 = vld [vmem:[#allocation4 + $0x10] sm:$0xff] }
 0x10e   : > { %5955 = vmatprep.mubr.msk.f32.mxu0 %vm242_vm1, %v7161_v55  ;;  %800 = vst.msk [vmem:[#allocation4 + $0x30] sm:$0xff] %vm793_vm3, %v664_v44  ;;  %v5660_v47 = vpop.f32.mrf.mxu1 }
 0x10f   : > { %v5636_v4 = vpop.f32.mrf.mxu0  ;;  %5909 = vmatmul.mubr.msk.f32.gmra.mxu1 %vm242_vm1, %v6830_v24  ;;  %819 = vst.msk [vmem:[#allocation4 + $0xc8] sm:$0xff] %vm793_vm3, %v5660_v47  ;;  %v7203_v24 = vld [vmem:[#allocation3 + $0xd8] sm:$0xff]  ;;  %v1190_v54 = vld [vmem:[#allocation4 + $0x28] sm:$0xff] }
 0x110   : > { %803 = vst.msk [vmem:[#allocation4 + $0x48] sm:$0xff] %vm793_vm3, %v5636_v4  ;;  %5911 = vmatprep.mubr.msk.f32.mxu1 %vm242_vm1, %v6835_v59  ;;  %v754_v57 = vpop.f32.mrf.mxu1 }
 0x111   : > { %5956 = vmatmul.mubr.msk.f32.gmra.mxu0 %vm242_vm1, %v7172_v63  ;;  %v674_v10 = vpop.f32.mrf.mxu0  ;;  %818 = vst.msk [vmem:[#allocation4 + $0xc0] sm:$0xff] %vm793_vm3, %v754_v57  ;;  %v1189_v44 = vld [vmem:[#allocation4 + $0x20] sm:$0xff] }
 0x112   : > { %5958 = vmatprep.mubr.msk.f32.mxu0 %vm242_vm1, %v7177_v0  ;;  %802 = vst.msk [vmem:[#allocation4 + $0x40] sm:$0xff] %vm793_vm3, %v674_v10  ;;  %v5663_v58 = vpop.f32.mrf.mxu1 }
 0x113   : > { %5912 = vmatmul.mubr.msk.f32.gmra.mxu1 %vm242_vm1, %v6844_v40  ;;  %821 = vst.msk [vmem:[#allocation4 + $0xd8] sm:$0xff] %vm793_vm3, %v5663_v58  ;;  %v1192_v57 = vld [vmem:[#allocation4 + $0x38] sm:$0xff] }
 0x114   : > { %5914 = vmatprep.mubr.msk.f32.mxu1 %vm242_vm1, %v6849_v8  ;;  %v764_v59 = vpop.f32.mrf.mxu1 }
 0x115   : > { %5959 = vmatmul.mubr.msk.f32.gmra.mxu0 %vm242_vm1, %v7188_v51  ;;  %820 = vst.msk [vmem:[#allocation4 + $0xd0] sm:$0xff] %vm793_vm3, %v764_v59 }
 0x116   : > { %5961 = vmatprep.mubr.msk.f32.mxu0 %vm242_vm1, %v7193_v14  ;;  %v5666_v40 = vpop.f32.mrf.mxu1 }
 0x117   : > { %5915 = vmatmul.mubr.msk.f32.gmra.mxu1 %vm242_vm1, %v6858_v49  ;;  %823 = vst.msk [vmem:[#allocation4 + $0xe8] sm:$0xff] %vm793_vm3, %v5666_v40 }
 0x118   : > { %5917 = vmatprep.mubr.msk.f32.mxu1 %vm242_vm1, %v6863_v12  ;;  %v774_v50 = vpop.f32.mrf.mxu1  ;;  %v7234_v12 = vld [vmem:[#allocation3 + $0xf8] sm:$0xff] }
 0x119   : > { %v5639_v62 = vpop.f32.mrf.mxu0  ;;  %5962 = vmatmul.mubr.msk.f32.gmra.mxu0 %vm242_vm1, %v7203_v24  ;;  %822 = vst.msk [vmem:[#allocation4 + $0xe0] sm:$0xff] %vm793_vm3, %v774_v50 }
 0x11a   : > { %805 = vst.msk [vmem:[#allocation4 + $0x58] sm:$0xff] %vm793_vm3, %v5639_v62  ;;  %5964 = vmatprep.mubr.msk.f32.mxu0 %vm242_vm1, %v7208_v28 }
 0x11b   : > { %v684_v8 = vpop.f32.mrf.mxu0  ;;  %v5669_v21 = vpop.f32.mrf.mxu1  ;;  %5918 = vmatmul.mubr.msk.f32.gmra.mxu1 %vm242_vm1, %v6872_v17 }
 0x11c   : > { %804 = vst.msk [vmem:[#allocation4 + $0x50] sm:$0xff] %vm793_vm3, %v684_v8  ;;  %825 = vst.msk [vmem:[#allocation4 + $0xf8] sm:$0xff] %vm793_vm3, %v5669_v21  ;;  %5972 = vmatprep.mubr.msk.f32.mxu1 %vm242_vm1, %v7030_v37  ;;  %v1191_v8 = vld [vmem:[#allocation4 + $0x30] sm:$0xff] }
 0x11d   : > { %v5642_v49 = vpop.f32.mrf.mxu0  ;;  %5965 = vmatmul.mubr.msk.f32.gmra.mxu0 %vm242_vm1, %v7218_v42  ;;  %v784_v34 = vpop.f32.mrf.mxu1 }
 0x11e   : > { %807 = vst.msk [vmem:[#allocation4 + $0x68] sm:$0xff] %vm793_vm3, %v5642_v49  ;;  %5967 = vmatprep.mubr.msk.f32.mxu0 %vm242_vm1, %v7223_v11  ;;  %824 = vst.msk [vmem:[#allocation4 + $0xf0] sm:$0xff] %vm793_vm3, %v784_v34  ;;  %v1194_v34 = vld [vmem:[#allocation4 + $0x48] sm:$0xff] }
 0x11f   : > { %v694_v1 = vpop.f32.mrf.mxu0  ;;  %v5674_v17 = vpop.f32.mrf.mxu1  ;;  %5973 = vmatmul.mubr.msk.f32.vlgmr.msra.gmra.mxu1 %vm242_vm1, %v7037_v43 }
 0x120   : > { %806 = vst.msk [vmem:[#allocation4 + $0x60] sm:$0xff] %vm793_vm3, %v694_v1  ;;  %v1218_v33 = vadd.f32 %v5674_v17, %v1186_v26  ;;  %5975 = vmatprep.mubr.msk.f32.mxu1 %vm242_vm1, %v7043_v45 }
 0x121   : > { %v5645_v23 = vpop.f32.mrf.mxu0  ;;  %5968 = vmatmul.mubr.msk.f32.gmra.mxu0 %vm242_vm1, %v7234_v12  ;;  %v1026_v13 = vpop.f32.mrf.mxu1 }
 0x122   : > { %809 = vst.msk [vmem:[#allocation4 + $0x78] sm:$0xff] %vm793_vm3, %v5645_v23  ;;  %6022 = vmatprep.mubr.msk.f32.mxu0 %vm242_vm1, %v7043_v45  ;;  %1250 = vst.msk [vmem:[#allocation4 + $0x8] sm:$0xff] %vm793_vm3, %v1218_v33  ;;  %v1217_v25 = vadd.f32 %v1185_v41, %v1026_v13 }
 0x123   : > { %v704_v37 = vpop.f32.mrf.mxu0  ;;  %v5677_v43 = vpop.f32.mrf.mxu1  ;;  %5976 = vmatmul.mubr.msk.f32.gmra.mxu1 %vm242_vm1, %v7051_v46 }
 0x124   : > { %808 = vst.msk [vmem:[#allocation4 + $0x70] sm:$0xff] %vm793_vm3, %v704_v37  ;;  %1249 = vst.msk [vmem:[#allocation4] sm:$0xff] %vm793_vm3, %v1217_v25  ;;  %v1220_v45 = vadd.f32 %v5677_v43, %v1188_v31  ;;  %5978 = vmatprep.mubr.msk.f32.mxu1 %vm242_vm1, %v7055_v56  ;;  %v1193_v37 = vld [vmem:[#allocation4 + $0x40] sm:$0xff]  ;;  %v1196_v43 = vld [vmem:[#allocation4 + $0x58] sm:$0xff] }
 0x125   : > { %v5724_v19 = vpop.f32.mrf.mxu0  ;;  %6023 = vmatmul.mubr.msk.f32.vlgmr.msra.gmra.mxu0 %vm242_vm1, %v7051_v46  ;;  %v1036_v27 = vpop.f32.mrf.mxu1 }
 0x126   : > { %6025 = vmatprep.mubr.msk.f32.mxu0 %vm242_vm1, %v7055_v56  ;;  %1252 = vst.msk [vmem:[#allocation4 + $0x18] sm:$0xff] %vm793_vm3, %v1220_v45  ;;  %v1219_v36 = vadd.f32 %v1187_v29, %v1036_v27  ;;  %v1195_v29 = vld [vmem:[#allocation4 + $0x50] sm:$0xff] }
 0x127   : > { %v1481_v20 = vpop.f32.mrf.mxu0  ;;  %v5680_v46 = vpop.f32.mrf.mxu1  ;;  %5979 = vmatmul.mubr.msk.f32.gmra.mxu1 %vm242_vm1, %v7063_v2 }
 0x128   : > { %1251 = vst.msk [vmem:[#allocation4 + $0x10] sm:$0xff] %vm793_vm3, %v1219_v36  ;;  %v1222_v56 = vadd.f32 %v5680_v46, %v1190_v54  ;;  %5981 = vmatprep.mubr.msk.f32.mxu1 %vm242_vm1, %v7067_v5 }
 0x129   : > { %v5727_v53 = vpop.f32.mrf.mxu0  ;;  %6026 = vmatmul.mubr.msk.f32.gmra.mxu0 %vm242_vm1, %v7063_v2  ;;  %v1641_v61 = vld [vmem:[#allocation4 + $0x8] sm:$0xff]  ;;  %v1046_v60 = vpop.f32.mrf.mxu1 }
 0x12a   : > { %6028 = vmatprep.mubr.msk.f32.mxu0 %vm242_vm1, %v7067_v5  ;;  %1254 = vst.msk [vmem:[#allocation4 + $0x28] sm:$0xff] %vm793_vm3, %v1222_v56  ;;  %v1673_v3 = vadd.f32 %v5724_v19, %v1641_v61  ;;  %v1221_v4 = vadd.f32 %v1189_v44, %v1046_v60  ;;  %v1198_v56 = vld [vmem:[#allocation4 + $0x68] sm:$0xff] }
 0x12b   : > { %v1491_v39 = vpop.f32.mrf.mxu0  ;;  %v1640_v2 = vld [vmem:[#allocation4] sm:$0xff]  ;;  %v5683_v10 = vpop.f32.mrf.mxu1  ;;  %5982 = vmatmul.mubr.msk.f32.gmra.mxu1 %vm242_vm1, %v7075_v48 }
 0x12c   : > { %1705 = vst.msk [vmem:[#allocation4 + $0x8] sm:$0xff] %vm793_vm3, %v1673_v3  ;;  %1253 = vst.msk [vmem:[#allocation4 + $0x20] sm:$0xff] %vm793_vm3, %v1221_v4  ;;  %v1672_v5 = vadd.f32 %v1640_v2, %v1481_v20  ;;  %v1224_v58 = vadd.f32 %v5683_v10, %v1192_v57  ;;  %5984 = vmatprep.mubr.msk.f32.mxu1 %vm242_vm1, %v7079_v52  ;;  %v1197_v3 = vld [vmem:[#allocation4 + $0x60] sm:$0xff]  ;;  %v1200_v57 = vld [vmem:[#allocation4 + $0x78] sm:$0xff] }
 0x12d   : > { %v5730_v47 = vpop.f32.mrf.mxu0  ;;  %6029 = vmatmul.mubr.msk.f32.gmra.mxu0 %vm242_vm1, %v7075_v48  ;;  %v1643_v62 = vld [vmem:[#allocation4 + $0x18] sm:$0xff]  ;;  %v1056_v40 = vpop.f32.mrf.mxu1 }
 0x12e   : > { %6031 = vmatprep.mubr.msk.f32.mxu0 %vm242_vm1, %v7079_v52  ;;  %1704 = vst.msk [vmem:[#allocation4] sm:$0xff] %vm793_vm3, %v1672_v5  ;;  %1256 = vst.msk [vmem:[#allocation4 + $0x38] sm:$0xff] %vm793_vm3, %v1224_v58  ;;  %v1675_v48 = vadd.f32 %v5727_v53, %v1643_v62  ;;  %v1223_v50 = vadd.f32 %v1191_v8, %v1056_v40  ;;  %v1199_v40 = vld [vmem:[#allocation4 + $0x70] sm:$0xff] }
 0x12f   : > { %v1501_v59 = vpop.f32.mrf.mxu0  ;;  %v1642_v21 = vld [vmem:[#allocation4 + $0x10] sm:$0xff]  ;;  %v5686_v1 = vpop.f32.mrf.mxu1  ;;  %5985 = vmatmul.mubr.msk.f32.gmra.mxu1 %vm242_vm1, %v7087_v6 }
 0x130   : > { %1707 = vst.msk [vmem:[#allocation4 + $0x18] sm:$0xff] %vm793_vm3, %v1675_v48  ;;  %1255 = vst.msk [vmem:[#allocation4 + $0x30] sm:$0xff] %vm793_vm3, %v1223_v50  ;;  %v1674_v52 = vadd.f32 %v1642_v21, %v1491_v39  ;;  %v1226_v23 = vadd.f32 %v5686_v1, %v1194_v34  ;;  %5987 = vmatprep.mubr.msk.f32.mxu1 %vm242_vm1, %v7091_v7  ;;  %v1202_v21 = vld [vmem:[#allocation4 + $0x88] sm:$0xff] }
 0x131   : > { %v5733_v49 = vpop.f32.mrf.mxu0  ;;  %6032 = vmatmul.mubr.msk.f32.gmra.mxu0 %vm242_vm1, %v7087_v6  ;;  %v1645_v26 = vld [vmem:[#allocation4 + $0x28] sm:$0xff]  ;;  %v1066_v33 = vpop.f32.mrf.mxu1 }
 0x132   : > { %6034 = vmatprep.mubr.msk.f32.mxu0 %vm242_vm1, %v7091_v7  ;;  %1706 = vst.msk [vmem:[#allocation4 + $0x10] sm:$0xff] %vm793_vm3, %v1674_v52  ;;  %1258 = vst.msk [vmem:[#allocation4 + $0x48] sm:$0xff] %vm793_vm3, %v1226_v23  ;;  %v1677_v6 = vadd.f32 %v5730_v47, %v1645_v26  ;;  %v1225_v13 = vadd.f32 %v1193_v37, %v1066_v33 }
 0x133   : > { %v1511_v17 = vpop.f32.mrf.mxu0  ;;  %v1644_v25 = vld [vmem:[#allocation4 + $0x20] sm:$0xff]  ;;  %v5689_v19 = vpop.f32.mrf.mxu1  ;;  %5988 = vmatmul.mubr.msk.f32.gmra.mxu1 %vm242_vm1, %v7099_v15 }
 0x134   : > { %1709 = vst.msk [vmem:[#allocation4 + $0x28] sm:$0xff] %vm793_vm3, %v1677_v6  ;;  %1257 = vst.msk [vmem:[#allocation4 + $0x40] sm:$0xff] %vm793_vm3, %v1225_v13  ;;  %v1676_v7 = vadd.f32 %v1644_v25, %v1501_v59  ;;  %v1228_v31 = vadd.f32 %v5689_v19, %v1196_v43  ;;  %5990 = vmatprep.mubr.msk.f32.mxu1 %vm242_vm1, %v7103_v9  ;;  %v1204_v13 = vld [vmem:[#allocation4 + $0x98] sm:$0xff] }
 0x135   : > { %v5736_v41 = vpop.f32.mrf.mxu0  ;;  %6035 = vmatmul.mubr.msk.f32.gmra.mxu0 %vm242_vm1, %v7099_v15  ;;  %v1647_v20 = vld [vmem:[#allocation4 + $0x38] sm:$0xff]  ;;  %v1076_v27 = vpop.f32.mrf.mxu1 }
 0x136   : > { %6037 = vmatprep.mubr.msk.f32.mxu0 %vm242_vm1, %v7103_v9  ;;  %1708 = vst.msk [vmem:[#allocation4 + $0x20] sm:$0xff] %vm793_vm3, %v1676_v7  ;;  %1260 = vst.msk [vmem:[#allocation4 + $0x58] sm:$0xff] %vm793_vm3, %v1228_v31  ;;  %v1679_v15 = vadd.f32 %v5733_v49, %v1647_v20  ;;  %v1227_v36 = vadd.f32 %v1195_v29, %v1076_v27  ;;  %v1203_v7 = vld [vmem:[#allocation4 + $0x90] sm:$0xff]  ;;  %v1206_v29 = vld [vmem:[#allocation4 + $0xa8] sm:$0xff] }
 0x137   : > { %v1521_v45 = vpop.f32.mrf.mxu0  ;;  %v1646_v46 = vld [vmem:[#allocation4 + $0x30] sm:$0xff]  ;;  %v5692_v54 = vpop.f32.mrf.mxu1  ;;  %5991 = vmatmul.mubr.msk.f32.gmra.mxu1 %vm242_vm1, %v7112_v18 }
 0x138   : > { %1711 = vst.msk [vmem:[#allocation4 + $0x38] sm:$0xff] %vm793_vm3, %v1679_v15  ;;  %1259 = vst.msk [vmem:[#allocation4 + $0x50] sm:$0xff] %vm793_vm3, %v1227_v36  ;;  %v1678_v9 = vadd.f32 %v1646_v46, %v1511_v17  ;;  %v1230_v39 = vadd.f32 %v5692_v54, %v1198_v56  ;;  %5993 = vmatprep.mubr.msk.f32.mxu1 %vm242_vm1, %v7116_v22  ;;  %v1201_v17 = vld [vmem:[#allocation4 + $0x80] sm:$0xff] }
 0x139   : > { %v5739_v53 = vpop.f32.mrf.mxu0  ;;  %6038 = vmatmul.mubr.msk.f32.gmra.mxu0 %vm242_vm1, %v7112_v18  ;;  %v1649_v60 = vld [vmem:[#allocation4 + $0x48] sm:$0xff]  ;;  %v1086_v44 = vpop.f32.mrf.mxu1  ;;  %v1205_v54 = vld [vmem:[#allocation4 + $0xa0] sm:$0xff] }
 0x13a   : > { %6040 = vmatprep.mubr.msk.f32.mxu0 %vm242_vm1, %v7116_v22  ;;  %1710 = vst.msk [vmem:[#allocation4 + $0x30] sm:$0xff] %vm793_vm3, %v1678_v9  ;;  %1262 = vst.msk [vmem:[#allocation4 + $0x68] sm:$0xff] %vm793_vm3, %v1230_v39  ;;  %v1681_v18 = vadd.f32 %v5736_v41, %v1649_v60  ;;  %v1229_v4 = vadd.f32 %v1197_v3, %v1086_v44  ;;  %v1208_v60 = vld [vmem:[#allocation4 + $0xb8] sm:$0xff] }
 0x13b   : > { %v1531_v61 = vpop.f32.mrf.mxu0  ;;  %v1648_v2 = vld [vmem:[#allocation4 + $0x40] sm:$0xff]  ;;  %v5695_v10 = vpop.f32.mrf.mxu1  ;;  %5994 = vmatmul.mubr.msk.f32.gmra.mxu1 %vm242_vm1, %v7125_v16 }
 0x13c   : > { %1713 = vst.msk [vmem:[#allocation4 + $0x48] sm:$0xff] %vm793_vm3, %v1681_v18  ;;  %1261 = vst.msk [vmem:[#allocation4 + $0x60] sm:$0xff] %vm793_vm3, %v1229_v4  ;;  %v1680_v22 = vadd.f32 %v1648_v2, %v1521_v45  ;;  %v1232_v5 = vadd.f32 %v5695_v10, %v1200_v57  ;;  %5996 = vmatprep.mubr.msk.f32.mxu1 %vm242_vm1, %v7130_v30 }
 0x13d   : > { %v5742_v47 = vpop.f32.mrf.mxu0  ;;  %6041 = vmatmul.mubr.msk.f32.gmra.mxu0 %vm242_vm1, %v7125_v16  ;;  %v1651_v59 = vld [vmem:[#allocation4 + $0x58] sm:$0xff]  ;;  %v1096_v62 = vpop.f32.mrf.mxu1 }
 0x13e   : > { %6043 = vmatprep.mubr.msk.f32.mxu0 %vm242_vm1, %v7130_v30  ;;  %1712 = vst.msk [vmem:[#allocation4 + $0x40] sm:$0xff] %vm793_vm3, %v1680_v22  ;;  %1264 = vst.msk [vmem:[#allocation4 + $0x78] sm:$0xff] %vm793_vm3, %v1232_v5  ;;  %v1683_v16 = vadd.f32 %v5739_v53, %v1651_v59  ;;  %v1231_v8 = vadd.f32 %v1199_v40, %v1096_v62  ;;  %v1210_v5 = vld [vmem:[#allocation4 + $0xc8] sm:$0xff] }
 0x13f   : > { %v1541_v58 = vpop.f32.mrf.mxu0  ;;  %v1650_v50 = vld [vmem:[#allocation4 + $0x50] sm:$0xff]  ;;  %v5698_v49 = vpop.f32.mrf.mxu1  ;;  %5997 = vmatmul.mubr.msk.f32.gmra.mxu1 %vm242_vm1, %v7140_v32 }
 0x140   : > { %1715 = vst.msk [vmem:[#allocation4 + $0x58] sm:$0xff] %vm793_vm3, %v1683_v16  ;;  %1263 = vst.msk [vmem:[#allocation4 + $0x70] sm:$0xff] %vm793_vm3, %v1231_v8  ;;  %v1682_v30 = vadd.f32 %v1650_v50, %v1531_v61  ;;  %v1234_v1 = vadd.f32 %v5698_v49, %v1202_v21  ;;  %5999 = vmatprep.mubr.msk.f32.mxu1 %vm242_vm1, %v7145_v35  ;;  %v1209_v16 = vld [vmem:[#allocation4 + $0xc0] sm:$0xff]  ;;  %v1212_v21 = vld [vmem:[#allocation4 + $0xd8] sm:$0xff] }
 0x141   : > { %v5745_v48 = vpop.f32.mrf.mxu0  ;;  %6044 = vmatmul.mubr.msk.f32.gmra.mxu0 %vm242_vm1, %v7140_v32  ;;  %v1653_v52 = vld [vmem:[#allocation4 + $0x68] sm:$0xff]  ;;  %v1106_v23 = vpop.f32.mrf.mxu1 }
 0x142   : > { %6046 = vmatprep.mubr.msk.f32.mxu0 %vm242_vm1, %v7145_v35  ;;  %1714 = vst.msk [vmem:[#allocation4 + $0x50] sm:$0xff] %vm793_vm3, %v1682_v30  ;;  %1266 = vst.msk [vmem:[#allocation4 + $0x88] sm:$0xff] %vm793_vm3, %v1234_v1  ;;  %v1685_v32 = vadd.f32 %v5742_v47, %v1653_v52  ;;  %v1233_v26 = vadd.f32 %v1201_v17, %v1106_v23  ;;  %v1207_v47 = vld [vmem:[#allocation4 + $0xb0] sm:$0xff]  ;;  %v3726_v17 = vld [vmem:[#allocation3 + $0x100] sm:$0xff] }
 0x143   : > { %v1551_v34 = vpop.f32.mrf.mxu0  ;;  %v1652_v37 = vld [vmem:[#allocation4 + $0x60] sm:$0xff]  ;;  %v5701_v6 = vpop.f32.mrf.mxu1  ;;  %6000 = vmatmul.mubr.msk.f32.gmra.mxu1 %vm242_vm1, %v7156_v38  ;;  %v1211_v23 = vld [vmem:[#allocation4 + $0xd0] sm:$0xff] }
 0x144   : > { %1717 = vst.msk [vmem:[#allocation4 + $0x68] sm:$0xff] %vm793_vm3, %v1685_v32  ;;  %1265 = vst.msk [vmem:[#allocation4 + $0x80] sm:$0xff] %vm793_vm3, %v1233_v26  ;;  %v1684_v35 = vadd.f32 %v1652_v37, %v1541_v58  ;;  %v1236_v41 = vadd.f32 %v5701_v6, %v1204_v13  ;;  %6002 = vmatprep.mubr.msk.f32.mxu1 %vm242_vm1, %v7161_v55  ;;  %v1214_v6 = vld [vmem:[#allocation4 + $0xe8] sm:$0xff] }
 0x145   : > { %v5748_v33 = vpop.f32.mrf.mxu0  ;;  %6047 = vmatmul.mubr.msk.f32.gmra.mxu0 %vm242_vm1, %v7156_v38  ;;  %v1655_v19 = vld [vmem:[#allocation4 + $0x78] sm:$0xff]  ;;  %v1116_v43 = vpop.f32.mrf.mxu1 }
 0x146   : > { %6049 = vmatprep.mubr.msk.f32.mxu0 %vm242_vm1, %v7161_v55  ;;  %1716 = vst.msk [vmem:[#allocation4 + $0x60] sm:$0xff] %vm793_vm3, %v1684_v35  ;;  %1268 = vst.msk [vmem:[#allocation4 + $0x98] sm:$0xff] %vm793_vm3, %v1236_v41  ;;  %v1687_v38 = vadd.f32 %v5745_v48, %v1655_v19  ;;  %v1235_v31 = vadd.f32 %v1203_v7, %v1116_v43  ;;  %v3727_v35 = vld [vmem:[#allocation3 + $0x108] sm:$0xff]  ;;  %v1213_v7 = vld [vmem:[#allocation4 + $0xe0] sm:$0xff] }
 0x147   : > { %v1561_v25 = vpop.f32.mrf.mxu0  ;;  %v1654_v20 = vld [vmem:[#allocation4 + $0x70] sm:$0xff]  ;;  %v5704_v27 = vpop.f32.mrf.mxu1  ;;  %6003 = vmatmul.mubr.msk.f32.gmra.mxu1 %vm242_vm1, %v7172_v63 }
 0x148   : > { %1719 = vst.msk [vmem:[#allocation4 + $0x78] sm:$0xff] %vm793_vm3, %v1687_v38  ;;  %1267 = vst.msk [vmem:[#allocation4 + $0x90] sm:$0xff] %vm793_vm3, %v1235_v31  ;;  %v1686_v55 = vadd.f32 %v1654_v20, %v1551_v34  ;;  %v1238_v15 = vadd.f32 %v5704_v27, %v1206_v29  ;;  %6005 = vmatprep.mubr.msk.f32.mxu1 %vm242_vm1, %v7177_v0  ;;  %v1216_v27 = vld [vmem:[#allocation4 + $0xf8] sm:$0xff] }
 0x149   : > { %v5751_v45 = vpop.f32.mrf.mxu0  ;;  %6050 = vmatmul.mubr.msk.f32.gmra.mxu0 %vm242_vm1, %v7172_v63  ;;  %v1657_v53 = vld [vmem:[#allocation4 + $0x88] sm:$0xff]  ;;  %v1126_v46 = vpop.f32.mrf.mxu1  ;;  %v4181_v29 = vld [vmem:[#allocation3 + $0x118] sm:$0xff] }
 0x14a   : > { %6052 = vmatprep.mubr.msk.f32.mxu0 %vm242_vm1, %v7177_v0  ;;  %1718 = vst.msk [vmem:[#allocation4 + $0x70] sm:$0xff] %vm793_vm3, %v1686_v55  ;;  %1270 = vst.msk [vmem:[#allocation4 + $0xa8] sm:$0xff] %vm793_vm3, %v1238_v15  ;;  %v1689_v63 = vadd.f32 %v5748_v33, %v1657_v53  ;;  %v1237_v56 = vadd.f32 %v1205_v54, %v1126_v46  ;;  %v1215_v54 = vld [vmem:[#allocation4 + $0xf0] sm:$0xff] }
 0x14b   : > { %v1571_v36 = vpop.f32.mrf.mxu0  ;;  %v1656_v39 = vld [vmem:[#allocation4 + $0x80] sm:$0xff]  ;;  %v5707_v61 = vpop.f32.mrf.mxu1  ;;  %6006 = vmatmul.mubr.msk.f32.gmra.mxu1 %vm242_vm1, %v7188_v51 }
 0x14c   : > { %1721 = vst.msk [vmem:[#allocation4 + $0x88] sm:$0xff] %vm793_vm3, %v1689_v63  ;;  %1269 = vst.msk [vmem:[#allocation4 + $0xa0] sm:$0xff] %vm793_vm3, %v1237_v56  ;;  %v1688_v0 = vadd.f32 %v1656_v39, %v1561_v25  ;;  %v1240_v44 = vadd.f32 %v5707_v61, %v1208_v60  ;;  %6008 = vmatprep.mubr.msk.f32.mxu1 %vm242_vm1, %v7193_v14  ;;  %v4180_v25 = vld [vmem:[#allocation3 + $0x110] sm:$0xff]  ;;  %v2167_v60 = vld [vmem:[#allocation4 + $0x8] sm:$0xff] }
 0x14d   : > { %v5754_v9 = vpop.f32.mrf.mxu0  ;;  %6053 = vmatmul.mubr.msk.f32.gmra.mxu0 %vm242_vm1, %v7188_v51  ;;  %v1659_v18 = vld [vmem:[#allocation4 + $0x98] sm:$0xff]  ;;  %v1136_v4 = vpop.f32.mrf.mxu1 }
 0x14e   : > { %6055 = vmatprep.mubr.msk.f32.mxu0 %vm242_vm1, %v7193_v14  ;;  %1720 = vst.msk [vmem:[#allocation4 + $0x80] sm:$0xff] %vm793_vm3, %v1688_v0  ;;  %1272 = vst.msk [vmem:[#allocation4 + $0xb8] sm:$0xff] %vm793_vm3, %v1240_v44  ;;  %v1691_v51 = vadd.f32 %v5751_v45, %v1659_v18  ;;  %v1239_v2 = vadd.f32 %v1207_v47, %v1136_v4  ;;  %v2166_v47 = vld [vmem:[#allocation4] sm:$0xff] }
 0x14f   : > { %v1581_v3 = vpop.f32.mrf.mxu0  ;;  %v1658_v57 = vld [vmem:[#allocation4 + $0x90] sm:$0xff]  ;;  %v5710_v22 = vpop.f32.mrf.mxu1  ;;  %6009 = vmatmul.mubr.msk.f32.gmra.mxu1 %vm242_vm1, %v7203_v24 }
 0x150   : > { %1723 = vst.msk [vmem:[#allocation4 + $0x98] sm:$0xff] %vm793_vm3, %v1691_v51  ;;  %1271 = vst.msk [vmem:[#allocation4 + $0xb0] sm:$0xff] %vm793_vm3, %v1239_v2  ;;  %v1690_v14 = vadd.f32 %v1658_v57, %v1571_v36  ;;  %v1242_v58 = vadd.f32 %v5710_v22, %v1210_v5  ;;  %6011 = vmatprep.mubr.msk.f32.mxu1 %vm242_vm1, %v7208_v28  ;;  %v2169_v5 = vld [vmem:[#allocation4 + $0x18] sm:$0xff] }
 0x151   : > { %v5757_v10 = vpop.f32.mrf.mxu0  ;;  %6056 = vmatmul.mubr.msk.f32.gmra.mxu0 %vm242_vm1, %v7203_v24  ;;  %v1661_v62 = vld [vmem:[#allocation4 + $0xa8] sm:$0xff]  ;;  %v1146_v40 = vpop.f32.mrf.mxu1 }
 0x152   : > { %6058 = vmatprep.mubr.msk.f32.mxu0 %vm242_vm1, %v7208_v28  ;;  %1722 = vst.msk [vmem:[#allocation4 + $0x90] sm:$0xff] %vm793_vm3, %v1690_v14  ;;  %1274 = vst.msk [vmem:[#allocation4 + $0xc8] sm:$0xff] %vm793_vm3, %v1242_v58  ;;  %v1693_v24 = vadd.f32 %v5754_v9, %v1661_v62  ;;  %v1241_v8 = vadd.f32 %v1209_v16, %v1146_v40  ;;  %v2168_v16 = vld [vmem:[#allocation4 + $0x10] sm:$0xff] }
 0x153   : > { %v1591_v59 = vpop.f32.mrf.mxu0  ;;  %v1660_v50 = vld [vmem:[#allocation4 + $0xa0] sm:$0xff]  ;;  %v5713_v49 = vpop.f32.mrf.mxu1  ;;  %6012 = vmatmul.mubr.msk.f32.gmra.mxu1 %vm242_vm1, %v7218_v42 }
 0x154   : > { %1725 = vst.msk [vmem:[#allocation4 + $0xa8] sm:$0xff] %vm793_vm3, %v1693_v24  ;;  %1273 = vst.msk [vmem:[#allocation4 + $0xc0] sm:$0xff] %vm793_vm3, %v1241_v8  ;;  %v1692_v28 = vadd.f32 %v1660_v50, %v1581_v3  ;;  %v1244_v30 = vadd.f32 %v5713_v49, %v1212_v21  ;;  %6014 = vmatprep.mubr.msk.f32.mxu1 %vm242_vm1, %v7223_v11  ;;  %v2171_v21 = vld [vmem:[#allocation4 + $0x28] sm:$0xff] }
 0x155   : > { %v5760_v48 = vpop.f32.mrf.mxu0  ;;  %6059 = vmatmul.mubr.msk.f32.gmra.mxu0 %vm242_vm1, %v7218_v42  ;;  %v1663_v34 = vld [vmem:[#allocation4 + $0xb8] sm:$0xff]  ;;  %v1156_v52 = vpop.f32.mrf.mxu1 }
 0x156   : > { %6061 = vmatprep.mubr.msk.f32.mxu0 %vm242_vm1, %v7223_v11  ;;  %1724 = vst.msk [vmem:[#allocation4 + $0xa0] sm:$0xff] %vm793_vm3, %v1692_v28  ;;  %1276 = vst.msk [vmem:[#allocation4 + $0xd8] sm:$0xff] %vm793_vm3, %v1244_v30  ;;  %v1695_v42 = vadd.f32 %v5757_v10, %v1663_v34  ;;  %v1243_v32 = vadd.f32 %v1211_v23, %v1156_v52  ;;  %v2170_v23 = vld [vmem:[#allocation4 + $0x20] sm:$0xff] }
 0x157   : > { %v1601_v1 = vpop.f32.mrf.mxu0  ;;  %v1662_v33 = vld [vmem:[#allocation4 + $0xb0] sm:$0xff]  ;;  %v5716_v37 = vpop.f32.mrf.mxu1  ;;  %6015 = vmatmul.mubr.msk.f32.gmra.mxu1 %vm242_vm1, %v7234_v12 }
 0x158   : > { %1727 = vst.msk [vmem:[#allocation4 + $0xb8] sm:$0xff] %vm793_vm3, %v1695_v42  ;;  %1275 = vst.msk [vmem:[#allocation4 + $0xd0] sm:$0xff] %vm793_vm3, %v1243_v32  ;;  %v1694_v11 = vadd.f32 %v1662_v33, %v1591_v59  ;;  %v1246_v13 = vadd.f32 %v5716_v37, %v1214_v6  ;;  %6017 = vmatprep.mubr.msk.f32.mxu1 %vm242_vm1, %v3726_v17  ;;  %v2173_v37 = vld [vmem:[#allocation4 + $0x38] sm:$0xff] }
 0x159   : > { %v5763_v26 = vpop.f32.mrf.mxu0  ;;  %6062 = vmatmul.mubr.msk.f32.gmra.mxu0 %vm242_vm1, %v7234_v12  ;;  %v1665_v19 = vld [vmem:[#allocation4 + $0xc8] sm:$0xff]  ;;  %v1166_v43 = vpop.f32.mrf.mxu1 }
 0x15a   : > { %6064 = vmatprep.mubr.msk.f32.mxu0 %vm242_vm1, %v3726_v17  ;;  %1726 = vst.msk [vmem:[#allocation4 + $0xb0] sm:$0xff] %vm793_vm3, %v1694_v11  ;;  %1278 = vst.msk [vmem:[#allocation4 + $0xe8] sm:$0xff] %vm793_vm3, %v1246_v13  ;;  %v1697_v12 = vadd.f32 %v5760_v48, %v1665_v19  ;;  %v1245_v38 = vadd.f32 %v1213_v7, %v1166_v43 }
 0x15b   : > { %v1611_v41 = vpop.f32.mrf.mxu0  ;;  %v1664_v45 = vld [vmem:[#allocation4 + $0xc0] sm:$0xff]  ;;  %v5719_v20 = vpop.f32.mrf.mxu1  ;;  %6018 = vmatmul.mubr.msk.f32.gmra.mxu1 %vm242_vm1, %v3727_v35 }
 0x15c   : > { %1729 = vst.msk [vmem:[#allocation4 + $0xc8] sm:$0xff] %vm793_vm3, %v1697_v12  ;;  %1277 = vst.msk [vmem:[#allocation4 + $0xe0] sm:$0xff] %vm793_vm3, %v1245_v38  ;;  %v1696_v55 = vadd.f32 %v1664_v45, %v1601_v1  ;;  %v1248_v15 = vadd.f32 %v5719_v20, %v1216_v27 }
 0x15d   : > { %v5766_v31 = vpop.f32.mrf.mxu0  ;;  %6065 = vmatmul.mubr.msk.f32.gmra.mxu0 %vm242_vm1, %v3727_v35  ;;  %v1667_v53 = vld [vmem:[#allocation4 + $0xd8] sm:$0xff]  ;;  %v1176_v46 = vpop.f32.mrf.mxu1 }
 0x15e   : > { %6067 = vmatprep.mubr.msk.f32.mxu0 %vm242_vm1, %v4180_v25  ;;  %1728 = vst.msk [vmem:[#allocation4 + $0xc0] sm:$0xff] %vm793_vm3, %v1696_v55  ;;  %1280 = vst.msk [vmem:[#allocation4 + $0xf8] sm:$0xff] %vm793_vm3, %v1248_v15  ;;  %v1699_v63 = vadd.f32 %v5763_v26, %v1667_v53  ;;  %v1247_v56 = vadd.f32 %v1215_v54, %v1176_v46  ;;  %v2172_v25 = vld [vmem:[#allocation4 + $0x30] sm:$0xff]  ;;  %v2174_v15 = vld [vmem:[#allocation4 + $0x40] sm:$0xff] }
 0x15f   : > { %v1621_v36 = vpop.f32.mrf.mxu0  ;;  %v1666_v39 = vld [vmem:[#allocation4 + $0xd0] sm:$0xff]  ;;  %v5774_v61 = vpop.f32.mrf.mxu1 }
 0x160   : > { %1731 = vst.msk [vmem:[#allocation4 + $0xd8] sm:$0xff] %vm793_vm3, %v1699_v63  ;;  %1279 = vst.msk [vmem:[#allocation4 + $0xf0] sm:$0xff] %vm793_vm3, %v1247_v56  ;;  %v1698_v0 = vadd.f32 %v1666_v39, %v1611_v41  ;;  %v2199_v44 = vadd.f32 %v5774_v61, %v2167_v60  ;;  %v2177_v56 = vld [vmem:[#allocation4 + $0x58] sm:$0xff] }
 0x161   : > { %v5769_v9 = vpop.f32.mrf.mxu0  ;;  %6068 = vmatmul.mubr.msk.f32.gmra.mxu0 %vm242_vm1, %v4181_v29  ;;  %v1669_v18 = vld [vmem:[#allocation4 + $0xe8] sm:$0xff]  ;;  %v2007_v4 = vpop.f32.mrf.mxu1 }
 0x162   : > { %1730 = vst.msk [vmem:[#allocation4 + $0xd0] sm:$0xff] %vm793_vm3, %v1698_v0  ;;  %v1701_v51 = vadd.f32 %v5766_v31, %v1669_v18  ;;  %2231 = vst.msk [vmem:[#allocation4 + $0x8] sm:$0xff] %vm793_vm3, %v2199_v44  ;;  %v2198_v2 = vadd.f32 %v2166_v47, %v2007_v4  ;;  %v2175_v31 = vld [vmem:[#allocation4 + $0x48] sm:$0xff]  ;;  %v2176_v44 = vld [vmem:[#allocation4 + $0x50] sm:$0xff] }
 0x163   : > { %v1631_v3 = vpop.f32.mrf.mxu0  ;;  %v1668_v57 = vld [vmem:[#allocation4 + $0xe0] sm:$0xff]  ;;  %v5777_v22 = vpop.f32.mrf.mxu1 }
 0x164   : > { %1733 = vst.msk [vmem:[#allocation4 + $0xe8] sm:$0xff] %vm793_vm3, %v1701_v51  ;;  %v1700_v14 = vadd.f32 %v1668_v57, %v1621_v36  ;;  %2230 = vst.msk [vmem:[#allocation4] sm:$0xff] %vm793_vm3, %v2198_v2  ;;  %v2201_v58 = vadd.f32 %v5777_v22, %v2169_v5  ;;  %v2179_v2 = vld [vmem:[#allocation4 + $0x68] sm:$0xff] }
 0x165   : > { %v5824_v10 = vpop.f32.mrf.mxu0  ;;  %v1671_v62 = vld [vmem:[#allocation4 + $0xf8] sm:$0xff]  ;;  %v2017_v40 = vpop.f32.mrf.mxu1 }
 0x166   : > { %1732 = vst.msk [vmem:[#allocation4 + $0xe0] sm:$0xff] %vm793_vm3, %v1700_v14  ;;  %v1703_v24 = vadd.f32 %v5769_v9, %v1671_v62  ;;  %2233 = vst.msk [vmem:[#allocation4 + $0x18] sm:$0xff] %vm793_vm3, %v2201_v58  ;;  %v2200_v8 = vadd.f32 %v2168_v16, %v2017_v40  ;;  %v2178_v58 = vld [vmem:[#allocation4 + $0x60] sm:$0xff] }
 0x167   : > { %v2461_v59 = vpop.f32.mrf.mxu0  ;;  %v1670_v50 = vld [vmem:[#allocation4 + $0xf0] sm:$0xff]  ;;  %v5780_v49 = vpop.f32.mrf.mxu1 }
 0x168   : > { %1735 = vst.msk [vmem:[#allocation4 + $0xf8] sm:$0xff] %vm793_vm3, %v1703_v24  ;;  %v1702_v28 = vadd.f32 %v1670_v50, %v1631_v3  ;;  %2232 = vst.msk [vmem:[#allocation4 + $0x10] sm:$0xff] %vm793_vm3, %v2200_v8  ;;  %v2203_v30 = vadd.f32 %v5780_v49, %v2171_v21  ;;  %v2181_v8 = vld [vmem:[#allocation4 + $0x78] sm:$0xff] }
 0x169   : > { %v5827_v48 = vpop.f32.mrf.mxu0  ;;  %v2621_v34 = vld [vmem:[#allocation4 + $0x8] sm:$0xff]  ;;  %v2027_v52 = vpop.f32.mrf.mxu1 }
 0x16a   : > { %1734 = vst.msk [vmem:[#allocation4 + $0xf0] sm:$0xff] %vm793_vm3, %v1702_v28  ;;  %2235 = vst.msk [vmem:[#allocation4 + $0x28] sm:$0xff] %vm793_vm3, %v2203_v30  ;;  %v2653_v17 = vadd.f32 %v5824_v10, %v2621_v34  ;;  %v2202_v42 = vadd.f32 %v2170_v23, %v2027_v52  ;;  %v2180_v30 = vld [vmem:[#allocation4 + $0x70] sm:$0xff] }
 0x16b   : > { %v2471_v1 = vpop.f32.mrf.mxu0  ;;  %v2620_v26 = vld [vmem:[#allocation4] sm:$0xff]  ;;  %v5783_v33 = vpop.f32.mrf.mxu1 }
 0x16c   : > { %2685 = vst.msk [vmem:[#allocation4 + $0x8] sm:$0xff] %vm793_vm3, %v2653_v17  ;;  %2234 = vst.msk [vmem:[#allocation4 + $0x20] sm:$0xff] %vm793_vm3, %v2202_v42  ;;  %v2652_v6 = vadd.f32 %v2620_v26, %v2461_v59  ;;  %v2205_v11 = vadd.f32 %v5783_v33, %v2173_v37  ;;  %v2183_v42 = vld [vmem:[#allocation4 + $0x88] sm:$0xff] }
 0x16d   : > { %v5830_v32 = vpop.f32.mrf.mxu0  ;;  %v2623_v35 = vld [vmem:[#allocation4 + $0x18] sm:$0xff]  ;;  %v2037_v41 = vpop.f32.mrf.mxu1 }
 0x16e   : > { %2684 = vst.msk [vmem:[#allocation4] sm:$0xff] %vm793_vm3, %v2652_v6  ;;  %2237 = vst.msk [vmem:[#allocation4 + $0x38] sm:$0xff] %vm793_vm3, %v2205_v11  ;;  %v2655_v19 = vadd.f32 %v5827_v48, %v2623_v35  ;;  %v2204_v43 = vadd.f32 %v2172_v25, %v2037_v41  ;;  %v2182_v11 = vld [vmem:[#allocation4 + $0x80] sm:$0xff] }
 0x16f   : > { %v2481_v13 = vpop.f32.mrf.mxu0  ;;  %v2622_v12 = vld [vmem:[#allocation4 + $0x10] sm:$0xff]  ;;  %v5786_v38 = vpop.f32.mrf.mxu1 }
 0x170   : > { %2687 = vst.msk [vmem:[#allocation4 + $0x18] sm:$0xff] %vm793_vm3, %v2655_v19  ;;  %2236 = vst.msk [vmem:[#allocation4 + $0x30] sm:$0xff] %vm793_vm3, %v2204_v43  ;;  %v2654_v45 = vadd.f32 %v2622_v12, %v2471_v1  ;;  %v2207_v20 = vadd.f32 %v5786_v38, %v2175_v31  ;;  %v2185_v43 = vld [vmem:[#allocation4 + $0x98] sm:$0xff] }
 0x171   : > { %v5833_v7 = vpop.f32.mrf.mxu0  ;;  %v2625_v29 = vld [vmem:[#allocation4 + $0x28] sm:$0xff]  ;;  %v2047_v55 = vpop.f32.mrf.mxu1 }
 0x172   : > { %2686 = vst.msk [vmem:[#allocation4 + $0x10] sm:$0xff] %vm793_vm3, %v2654_v45  ;;  %2239 = vst.msk [vmem:[#allocation4 + $0x48] sm:$0xff] %vm793_vm3, %v2207_v20  ;;  %v2657_v36 = vadd.f32 %v5830_v32, %v2625_v29  ;;  %v2206_v53 = vadd.f32 %v2174_v15, %v2047_v55  ;;  %v2184_v20 = vld [vmem:[#allocation4 + $0x90] sm:$0xff] }
 0x173   : > { %v2491_v27 = vpop.f32.mrf.mxu0  ;;  %v2624_v54 = vld [vmem:[#allocation4 + $0x20] sm:$0xff]  ;;  %v5789_v63 = vpop.f32.mrf.mxu1 }
 0x174   : > { %2689 = vst.msk [vmem:[#allocation4 + $0x28] sm:$0xff] %vm793_vm3, %v2657_v36  ;;  %2238 = vst.msk [vmem:[#allocation4 + $0x40] sm:$0xff] %vm793_vm3, %v2206_v53  ;;  %v2656_v9 = vadd.f32 %v2624_v54, %v2481_v13  ;;  %v2209_v39 = vadd.f32 %v5789_v63, %v2177_v56  ;;  %v2187_v53 = vld [vmem:[#allocation4 + $0xa8] sm:$0xff] }
 0x175   : > { %v5836_v46 = vpop.f32.mrf.mxu0  ;;  %v2627_v60 = vld [vmem:[#allocation4 + $0x38] sm:$0xff]  ;;  %v2057_v0 = vpop.f32.mrf.mxu1 }
 0x176   : > { %2688 = vst.msk [vmem:[#allocation4 + $0x20] sm:$0xff] %vm793_vm3, %v2656_v9  ;;  %2241 = vst.msk [vmem:[#allocation4 + $0x58] sm:$0xff] %vm793_vm3, %v2209_v39  ;;  %v2659_v3 = vadd.f32 %v5833_v7, %v2627_v60  ;;  %v2208_v18 = vadd.f32 %v2176_v44, %v2057_v0  ;;  %v2186_v39 = vld [vmem:[#allocation4 + $0xa0] sm:$0xff] }
 0x177   : > { %v2501_v61 = vpop.f32.mrf.mxu0  ;;  %v2626_v47 = vld [vmem:[#allocation4 + $0x30] sm:$0xff]  ;;  %v5792_v51 = vpop.f32.mrf.mxu1 }
 0x178   : > { %2691 = vst.msk [vmem:[#allocation4 + $0x38] sm:$0xff] %vm793_vm3, %v2659_v3  ;;  %2240 = vst.msk [vmem:[#allocation4 + $0x50] sm:$0xff] %vm793_vm3, %v2208_v18  ;;  %v2658_v10 = vadd.f32 %v2626_v47, %v2491_v27  ;;  %v2211_v57 = vadd.f32 %v5792_v51, %v2179_v2  ;;  %v2189_v18 = vld [vmem:[#allocation4 + $0xb8] sm:$0xff] }
 0x179   : > { %v5839_v4 = vpop.f32.mrf.mxu0  ;;  %v2629_v5 = vld [vmem:[#allocation4 + $0x48] sm:$0xff]  ;;  %v2067_v14 = vpop.f32.mrf.mxu1 }
 0x17a   : > { %2690 = vst.msk [vmem:[#allocation4 + $0x30] sm:$0xff] %vm793_vm3, %v2658_v10  ;;  %2243 = vst.msk [vmem:[#allocation4 + $0x68] sm:$0xff] %vm793_vm3, %v2211_v57  ;;  %v2661_v59 = vadd.f32 %v5836_v46, %v2629_v5  ;;  %v2210_v62 = vadd.f32 %v2178_v58, %v2067_v14  ;;  %v2188_v57 = vld [vmem:[#allocation4 + $0xb0] sm:$0xff] }
 0x17b   : > { %v2511_v22 = vpop.f32.mrf.mxu0  ;;  %v2628_v16 = vld [vmem:[#allocation4 + $0x40] sm:$0xff]  ;;  %v5795_v24 = vpop.f32.mrf.mxu1 }
 0x17c   : > { %2693 = vst.msk [vmem:[#allocation4 + $0x48] sm:$0xff] %vm793_vm3, %v2661_v59  ;;  %2242 = vst.msk [vmem:[#allocation4 + $0x60] sm:$0xff] %vm793_vm3, %v2210_v62  ;;  %v2660_v48 = vadd.f32 %v2628_v16, %v2501_v61  ;;  %v2213_v50 = vadd.f32 %v5795_v24, %v2181_v8  ;;  %v2191_v62 = vld [vmem:[#allocation4 + $0xc8] sm:$0xff] }
 0x17d   : > { %v5842_v40 = vpop.f32.mrf.mxu0  ;;  %v2631_v21 = vld [vmem:[#allocation4 + $0x58] sm:$0xff]  ;;  %v2077_v28 = vpop.f32.mrf.mxu1 }
 0x17e   : > { %2692 = vst.msk [vmem:[#allocation4 + $0x40] sm:$0xff] %vm793_vm3, %v2660_v48  ;;  %2245 = vst.msk [vmem:[#allocation4 + $0x78] sm:$0xff] %vm793_vm3, %v2213_v50  ;;  %v2663_v1 = vadd.f32 %v5839_v4, %v2631_v21  ;;  %v2212_v34 = vadd.f32 %v2180_v30, %v2077_v28  ;;  %v2190_v50 = vld [vmem:[#allocation4 + $0xc0] sm:$0xff] }
 0x17f   : > { %v2521_v49 = vpop.f32.mrf.mxu0  ;;  %v2630_v23 = vld [vmem:[#allocation4 + $0x50] sm:$0xff]  ;;  %v5798_v17 = vpop.f32.mrf.mxu1 }
 0x180   : > { %2695 = vst.msk [vmem:[#allocation4 + $0x58] sm:$0xff] %vm793_vm3, %v2663_v1  ;;  %2244 = vst.msk [vmem:[#allocation4 + $0x70] sm:$0xff] %vm793_vm3, %v2212_v34  ;;  %v2662_v32 = vadd.f32 %v2630_v23, %v2511_v22  ;;  %v2215_v26 = vadd.f32 %v5798_v17, %v2183_v42  ;;  %v2193_v34 = vld [vmem:[#allocation4 + $0xd8] sm:$0xff] }
 0x181   : > { %v5845_v52 = vpop.f32.mrf.mxu0  ;;  %v2633_v37 = vld [vmem:[#allocation4 + $0x68] sm:$0xff]  ;;  %v2087_v6 = vpop.f32.mrf.mxu1 }
 0x182   : > { %2694 = vst.msk [vmem:[#allocation4 + $0x50] sm:$0xff] %vm793_vm3, %v2662_v32  ;;  %2247 = vst.msk [vmem:[#allocation4 + $0x88] sm:$0xff] %vm793_vm3, %v2215_v26  ;;  %v2665_v13 = vadd.f32 %v5842_v40, %v2633_v37  ;;  %v2214_v35 = vadd.f32 %v2182_v11, %v2087_v6  ;;  %v2192_v26 = vld [vmem:[#allocation4 + $0xd0] sm:$0xff] }
 0x183   : > { %v2531_v33 = vpop.f32.mrf.mxu0  ;;  %v2632_v25 = vld [vmem:[#allocation4 + $0x60] sm:$0xff]  ;;  %v5801_v19 = vpop.f32.mrf.mxu1 }
 0x184   : > { %2697 = vst.msk [vmem:[#allocation4 + $0x68] sm:$0xff] %vm793_vm3, %v2665_v13  ;;  %2246 = vst.msk [vmem:[#allocation4 + $0x80] sm:$0xff] %vm793_vm3, %v2214_v35  ;;  %v2664_v7 = vadd.f32 %v2632_v25, %v2521_v49  ;;  %v2217_v12 = vadd.f32 %v5801_v19, %v2185_v43  ;;  %v2195_v35 = vld [vmem:[#allocation4 + $0xe8] sm:$0xff] }
 0x185   : > { %v5848_v41 = vpop.f32.mrf.mxu0  ;;  %v2635_v31 = vld [vmem:[#allocation4 + $0x78] sm:$0xff]  ;;  %v2097_v45 = vpop.f32.mrf.mxu1 }
 0x186   : > { %2696 = vst.msk [vmem:[#allocation4 + $0x60] sm:$0xff] %vm793_vm3, %v2664_v7  ;;  %2249 = vst.msk [vmem:[#allocation4 + $0x98] sm:$0xff] %vm793_vm3, %v2217_v12  ;;  %v2667_v27 = vadd.f32 %v5845_v52, %v2635_v31  ;;  %v2216_v29 = vadd.f32 %v2184_v20, %v2097_v45  ;;  %v2194_v12 = vld [vmem:[#allocation4 + $0xe0] sm:$0xff] }
 0x187   : > { %v2541_v38 = vpop.f32.mrf.mxu0  ;;  %v2634_v15 = vld [vmem:[#allocation4 + $0x70] sm:$0xff]  ;;  %v5804_v36 = vpop.f32.mrf.mxu1 }
 0x188   : > { %2699 = vst.msk [vmem:[#allocation4 + $0x78] sm:$0xff] %vm793_vm3, %v2667_v27  ;;  %2248 = vst.msk [vmem:[#allocation4 + $0x90] sm:$0xff] %vm793_vm3, %v2216_v29  ;;  %v2666_v46 = vadd.f32 %v2634_v15, %v2531_v33  ;;  %v2219_v54 = vadd.f32 %v5804_v36, %v2187_v53  ;;  %v2197_v29 = vld [vmem:[#allocation4 + $0xf8] sm:$0xff] }
 0x189   : > { %v5851_v55 = vpop.f32.mrf.mxu0  ;;  %v2637_v56 = vld [vmem:[#allocation4 + $0x88] sm:$0xff]  ;;  %v2107_v9 = vpop.f32.mrf.mxu1 }
 0x18a   : > { %2698 = vst.msk [vmem:[#allocation4 + $0x70] sm:$0xff] %vm793_vm3, %v2666_v46  ;;  %2251 = vst.msk [vmem:[#allocation4 + $0xa8] sm:$0xff] %vm793_vm3, %v2219_v54  ;;  %v2669_v61 = vadd.f32 %v5848_v41, %v2637_v56  ;;  %v2218_v60 = vadd.f32 %v2186_v39, %v2107_v9  ;;  %v2196_v54 = vld [vmem:[#allocation4 + $0xf0] sm:$0xff] }
 0x18b   : > { %v2551_v63 = vpop.f32.mrf.mxu0  ;;  %v2636_v44 = vld [vmem:[#allocation4 + $0x80] sm:$0xff]  ;;  %v5807_v3 = vpop.f32.mrf.mxu1 }
 0x18c   : > { %2701 = vst.msk [vmem:[#allocation4 + $0x88] sm:$0xff] %vm793_vm3, %v2669_v61  ;;  %2250 = vst.msk [vmem:[#allocation4 + $0xa0] sm:$0xff] %vm793_vm3, %v2218_v60  ;;  %v2668_v4 = vadd.f32 %v2636_v44, %v2541_v38  ;;  %v2221_v47 = vadd.f32 %v5807_v3, %v2189_v18  ;;  %v3075_v60 = vld [vmem:[#allocation4 + $0x8] sm:$0xff] }
 0x18d   : > { %v5854_v0 = vpop.f32.mrf.mxu0  ;;  %v2639_v2 = vld [vmem:[#allocation4 + $0x98] sm:$0xff]  ;;  %v2117_v10 = vpop.f32.mrf.mxu1 }
 0x18e   : > { %2700 = vst.msk [vmem:[#allocation4 + $0x80] sm:$0xff] %vm793_vm3, %v2668_v4  ;;  %2253 = vst.msk [vmem:[#allocation4 + $0xb8] sm:$0xff] %vm793_vm3, %v2221_v47  ;;  %v2671_v22 = vadd.f32 %v5851_v55, %v2639_v2  ;;  %v2220_v5 = vadd.f32 %v2188_v57, %v2117_v10  ;;  %v3074_v47 = vld [vmem:[#allocation4] sm:$0xff] }
 0x18f   : > { %v2561_v51 = vpop.f32.mrf.mxu0  ;;  %v2638_v58 = vld [vmem:[#allocation4 + $0x90] sm:$0xff]  ;;  %v5810_v59 = vpop.f32.mrf.mxu1 }
 0x190   : > { %2703 = vst.msk [vmem:[#allocation4 + $0x98] sm:$0xff] %vm793_vm3, %v2671_v22  ;;  %2252 = vst.msk [vmem:[#allocation4 + $0xb0] sm:$0xff] %vm793_vm3, %v2220_v5  ;;  %v2670_v40 = vadd.f32 %v2638_v58, %v2551_v63  ;;  %v2223_v16 = vadd.f32 %v5810_v59, %v2191_v62  ;;  %v3077_v5 = vld [vmem:[#allocation4 + $0x18] sm:$0xff] }
 0x191   : > { %v5857_v14 = vpop.f32.mrf.mxu0  ;;  %v2641_v8 = vld [vmem:[#allocation4 + $0xa8] sm:$0xff]  ;;  %v2127_v48 = vpop.f32.mrf.mxu1 }
 0x192   : > { %2702 = vst.msk [vmem:[#allocation4 + $0x90] sm:$0xff] %vm793_vm3, %v2670_v40  ;;  %2255 = vst.msk [vmem:[#allocation4 + $0xc8] sm:$0xff] %vm793_vm3, %v2223_v16  ;;  %v2673_v49 = vadd.f32 %v5854_v0, %v2641_v8  ;;  %v2222_v21 = vadd.f32 %v2190_v50, %v2127_v48  ;;  %v3076_v16 = vld [vmem:[#allocation4 + $0x10] sm:$0xff] }
 0x193   : > { %v2571_v24 = vpop.f32.mrf.mxu0  ;;  %v2640_v30 = vld [vmem:[#allocation4 + $0xa0] sm:$0xff]  ;;  %v5813_v1 = vpop.f32.mrf.mxu1 }
 0x194   : > { %2705 = vst.msk [vmem:[#allocation4 + $0xa8] sm:$0xff] %vm793_vm3, %v2673_v49  ;;  %2254 = vst.msk [vmem:[#allocation4 + $0xc0] sm:$0xff] %vm793_vm3, %v2222_v21  ;;  %v2672_v52 = vadd.f32 %v2640_v30, %v2561_v51  ;;  %v2225_v23 = vadd.f32 %v5813_v1, %v2193_v34  ;;  %v3079_v21 = vld [vmem:[#allocation4 + $0x28] sm:$0xff] }
 0x195   : > { %v5860_v28 = vpop.f32.mrf.mxu0  ;;  %v2643_v42 = vld [vmem:[#allocation4 + $0xb8] sm:$0xff]  ;;  %v2137_v32 = vpop.f32.mrf.mxu1 }
 0x196   : > { %2704 = vst.msk [vmem:[#allocation4 + $0xa0] sm:$0xff] %vm793_vm3, %v2672_v52  ;;  %2257 = vst.msk [vmem:[#allocation4 + $0xd8] sm:$0xff] %vm793_vm3, %v2225_v23  ;;  %v2675_v33 = vadd.f32 %v5857_v14, %v2643_v42  ;;  %v2224_v37 = vadd.f32 %v2192_v26, %v2137_v32  ;;  %v3078_v23 = vld [vmem:[#allocation4 + $0x20] sm:$0xff] }
 0x197   : > { %v2581_v17 = vpop.f32.mrf.mxu0  ;;  %v2642_v11 = vld [vmem:[#allocation4 + $0xb0] sm:$0xff]  ;;  %v5816_v13 = vpop.f32.mrf.mxu1 }
 0x198   : > { %2707 = vst.msk [vmem:[#allocation4 + $0xb8] sm:$0xff] %vm793_vm3, %v2675_v33  ;;  %2256 = vst.msk [vmem:[#allocation4 + $0xd0] sm:$0xff] %vm793_vm3, %v2224_v37  ;;  %v2674_v41 = vadd.f32 %v2642_v11, %v2571_v24  ;;  %v2227_v25 = vadd.f32 %v5816_v13, %v2195_v35  ;;  %v3081_v37 = vld [vmem:[#allocation4 + $0x38] sm:$0xff] }
 0x199   : > { %v5863_v6 = vpop.f32.mrf.mxu0  ;;  %v2645_v43 = vld [vmem:[#allocation4 + $0xc8] sm:$0xff]  ;;  %v2147_v7 = vpop.f32.mrf.mxu1 }
 0x19a   : > { %2706 = vst.msk [vmem:[#allocation4 + $0xb0] sm:$0xff] %vm793_vm3, %v2674_v41  ;;  %2259 = vst.msk [vmem:[#allocation4 + $0xe8] sm:$0xff] %vm793_vm3, %v2227_v25  ;;  %v2677_v38 = vadd.f32 %v5860_v28, %v2645_v43  ;;  %v2226_v31 = vadd.f32 %v2194_v12, %v2147_v7  ;;  %v3080_v25 = vld [vmem:[#allocation4 + $0x30] sm:$0xff] }
 0x19b   : > { %v2591_v19 = vpop.f32.mrf.mxu0  ;;  %v2644_v20 = vld [vmem:[#allocation4 + $0xc0] sm:$0xff]  ;;  %v5819_v27 = vpop.f32.mrf.mxu1 }
 0x19c   : > { %2709 = vst.msk [vmem:[#allocation4 + $0xc8] sm:$0xff] %vm793_vm3, %v2677_v38  ;;  %2258 = vst.msk [vmem:[#allocation4 + $0xe0] sm:$0xff] %vm793_vm3, %v2226_v31  ;;  %v2676_v55 = vadd.f32 %v2644_v20, %v2581_v17  ;;  %v2229_v15 = vadd.f32 %v5819_v27, %v2197_v29  ;;  %v3083_v31 = vld [vmem:[#allocation4 + $0x48] sm:$0xff] }
 0x19d   : > { %v5866_v45 = vpop.f32.mrf.mxu0  ;;  %v2647_v53 = vld [vmem:[#allocation4 + $0xd8] sm:$0xff]  ;;  %v2157_v46 = vpop.f32.mrf.mxu1 }
 0x19e   : > { %2708 = vst.msk [vmem:[#allocation4 + $0xc0] sm:$0xff] %vm793_vm3, %v2676_v55  ;;  %2261 = vst.msk [vmem:[#allocation4 + $0xf8] sm:$0xff] %vm793_vm3, %v2229_v15  ;;  %v2679_v63 = vadd.f32 %v5863_v6, %v2647_v53  ;;  %v2228_v56 = vadd.f32 %v2196_v54, %v2157_v46  ;;  %v3082_v15 = vld [vmem:[#allocation4 + $0x40] sm:$0xff] }
 0x19f   : > { %v2601_v36 = vpop.f32.mrf.mxu0  ;;  %v2646_v39 = vld [vmem:[#allocation4 + $0xd0] sm:$0xff]  ;;  %v5874_v61 = vpop.f32.mrf.mxu1 }
 0x1a0   : > { %2711 = vst.msk [vmem:[#allocation4 + $0xd8] sm:$0xff] %vm793_vm3, %v2679_v63  ;;  %2260 = vst.msk [vmem:[#allocation4 + $0xf0] sm:$0xff] %vm793_vm3, %v2228_v56  ;;  %v2678_v0 = vadd.f32 %v2646_v39, %v2591_v19  ;;  %v3107_v44 = vadd.f32 %v5874_v61, %v3075_v60  ;;  %v3085_v56 = vld [vmem:[#allocation4 + $0x58] sm:$0xff] }
 0x1a1   : > { %v5869_v9 = vpop.f32.mrf.mxu0  ;;  %v2649_v18 = vld [vmem:[#allocation4 + $0xe8] sm:$0xff]  ;;  %v2915_v4 = vpop.f32.mrf.mxu1 }
 0x1a2   : > { %2710 = vst.msk [vmem:[#allocation4 + $0xd0] sm:$0xff] %vm793_vm3, %v2678_v0  ;;  %v2681_v51 = vadd.f32 %v5866_v45, %v2649_v18  ;;  %3139 = vst.msk [vmem:[#allocation4 + $0x8] sm:$0xff] %vm793_vm3, %v3107_v44  ;;  %v3106_v2 = vadd.f32 %v3074_v47, %v2915_v4  ;;  %v3084_v44 = vld [vmem:[#allocation4 + $0x50] sm:$0xff] }
 0x1a3   : > { %v2611_v3 = vpop.f32.mrf.mxu0  ;;  %v2648_v57 = vld [vmem:[#allocation4 + $0xe0] sm:$0xff]  ;;  %v5877_v22 = vpop.f32.mrf.mxu1 }
 0x1a4   : > { %2713 = vst.msk [vmem:[#allocation4 + $0xe8] sm:$0xff] %vm793_vm3, %v2681_v51  ;;  %v2680_v14 = vadd.f32 %v2648_v57, %v2601_v36  ;;  %3138 = vst.msk [vmem:[#allocation4] sm:$0xff] %vm793_vm3, %v3106_v2  ;;  %v3109_v58 = vadd.f32 %v5877_v22, %v3077_v5  ;;  %v3087_v2 = vld [vmem:[#allocation4 + $0x68] sm:$0xff] }
 0x1a5   : > { %v5924_v10 = vpop.f32.mrf.mxu0  ;;  %v2651_v62 = vld [vmem:[#allocation4 + $0xf8] sm:$0xff]  ;;  %v2925_v40 = vpop.f32.mrf.mxu1 }
 0x1a6   : > { %2712 = vst.msk [vmem:[#allocation4 + $0xe0] sm:$0xff] %vm793_vm3, %v2680_v14  ;;  %v2683_v24 = vadd.f32 %v5869_v9, %v2651_v62  ;;  %3141 = vst.msk [vmem:[#allocation4 + $0x18] sm:$0xff] %vm793_vm3, %v3109_v58  ;;  %v3108_v8 = vadd.f32 %v3076_v16, %v2925_v40  ;;  %v3086_v58 = vld [vmem:[#allocation4 + $0x60] sm:$0xff] }
 0x1a7   : > { %v3441_v59 = vpop.f32.mrf.mxu0  ;;  %v2650_v50 = vld [vmem:[#allocation4 + $0xf0] sm:$0xff]  ;;  %v5880_v49 = vpop.f32.mrf.mxu1 }
 0x1a8   : > { %2715 = vst.msk [vmem:[#allocation4 + $0xf8] sm:$0xff] %vm793_vm3, %v2683_v24  ;;  %v2682_v28 = vadd.f32 %v2650_v50, %v2611_v3  ;;  %3140 = vst.msk [vmem:[#allocation4 + $0x10] sm:$0xff] %vm793_vm3, %v3108_v8  ;;  %v3111_v30 = vadd.f32 %v5880_v49, %v3079_v21  ;;  %v3089_v8 = vld [vmem:[#allocation4 + $0x78] sm:$0xff] }
 0x1a9   : > { %v5927_v48 = vpop.f32.mrf.mxu0  ;;  %v3601_v34 = vld [vmem:[#allocation4 + $0x8] sm:$0xff]  ;;  %v2935_v52 = vpop.f32.mrf.mxu1 }
 0x1aa   : > { %2714 = vst.msk [vmem:[#allocation4 + $0xf0] sm:$0xff] %vm793_vm3, %v2682_v28  ;;  %3143 = vst.msk [vmem:[#allocation4 + $0x28] sm:$0xff] %vm793_vm3, %v3111_v30  ;;  %v3633_v17 = vadd.f32 %v5924_v10, %v3601_v34  ;;  %v3110_v42 = vadd.f32 %v3078_v23, %v2935_v52  ;;  %v3088_v30 = vld [vmem:[#allocation4 + $0x70] sm:$0xff] }
 0x1ab   : > { %v3451_v1 = vpop.f32.mrf.mxu0  ;;  %v3600_v26 = vld [vmem:[#allocation4] sm:$0xff]  ;;  %v5883_v33 = vpop.f32.mrf.mxu1 }
 0x1ac   : > { %3665 = vst.msk [vmem:[#allocation4 + $0x8] sm:$0xff] %vm793_vm3, %v3633_v17  ;;  %3142 = vst.msk [vmem:[#allocation4 + $0x20] sm:$0xff] %vm793_vm3, %v3110_v42  ;;  %v3632_v6 = vadd.f32 %v3600_v26, %v3441_v59  ;;  %v3113_v11 = vadd.f32 %v5883_v33, %v3081_v37  ;;  %v3091_v42 = vld [vmem:[#allocation4 + $0x88] sm:$0xff] }
 0x1ad   : > { %v5930_v32 = vpop.f32.mrf.mxu0  ;;  %v3603_v35 = vld [vmem:[#allocation4 + $0x18] sm:$0xff]  ;;  %v2945_v41 = vpop.f32.mrf.mxu1 }
 0x1ae   : > { %3664 = vst.msk [vmem:[#allocation4] sm:$0xff] %vm793_vm3, %v3632_v6  ;;  %3145 = vst.msk [vmem:[#allocation4 + $0x38] sm:$0xff] %vm793_vm3, %v3113_v11  ;;  %v3635_v19 = vadd.f32 %v5927_v48, %v3603_v35  ;;  %v3112_v43 = vadd.f32 %v3080_v25, %v2945_v41  ;;  %v3090_v11 = vld [vmem:[#allocation4 + $0x80] sm:$0xff] }
 0x1af   : > { %v3461_v13 = vpop.f32.mrf.mxu0  ;;  %v3602_v12 = vld [vmem:[#allocation4 + $0x10] sm:$0xff]  ;;  %v5886_v38 = vpop.f32.mrf.mxu1 }
 0x1b0   : > { %3667 = vst.msk [vmem:[#allocation4 + $0x18] sm:$0xff] %vm793_vm3, %v3635_v19  ;;  %3144 = vst.msk [vmem:[#allocation4 + $0x30] sm:$0xff] %vm793_vm3, %v3112_v43  ;;  %v3634_v45 = vadd.f32 %v3602_v12, %v3451_v1  ;;  %v3115_v20 = vadd.f32 %v5886_v38, %v3083_v31  ;;  %v3093_v43 = vld [vmem:[#allocation4 + $0x98] sm:$0xff] }
 0x1b1   : > { %v5933_v7 = vpop.f32.mrf.mxu0  ;;  %v3605_v29 = vld [vmem:[#allocation4 + $0x28] sm:$0xff]  ;;  %v2955_v55 = vpop.f32.mrf.mxu1 }
 0x1b2   : > { %3666 = vst.msk [vmem:[#allocation4 + $0x10] sm:$0xff] %vm793_vm3, %v3634_v45  ;;  %3147 = vst.msk [vmem:[#allocation4 + $0x48] sm:$0xff] %vm793_vm3, %v3115_v20  ;;  %v3637_v36 = vadd.f32 %v5930_v32, %v3605_v29  ;;  %v3114_v53 = vadd.f32 %v3082_v15, %v2955_v55  ;;  %v3092_v20 = vld [vmem:[#allocation4 + $0x90] sm:$0xff] }
 0x1b3   : > { %v3471_v27 = vpop.f32.mrf.mxu0  ;;  %v3604_v54 = vld [vmem:[#allocation4 + $0x20] sm:$0xff]  ;;  %v5889_v63 = vpop.f32.mrf.mxu1 }
 0x1b4   : > { %3669 = vst.msk [vmem:[#allocation4 + $0x28] sm:$0xff] %vm793_vm3, %v3637_v36  ;;  %3146 = vst.msk [vmem:[#allocation4 + $0x40] sm:$0xff] %vm793_vm3, %v3114_v53  ;;  %v3636_v9 = vadd.f32 %v3604_v54, %v3461_v13  ;;  %v3117_v39 = vadd.f32 %v5889_v63, %v3085_v56  ;;  %v3095_v53 = vld [vmem:[#allocation4 + $0xa8] sm:$0xff] }
 0x1b5   : > { %v5936_v46 = vpop.f32.mrf.mxu0  ;;  %v3607_v60 = vld [vmem:[#allocation4 + $0x38] sm:$0xff]  ;;  %v2965_v0 = vpop.f32.mrf.mxu1 }
 0x1b6   : > { %3668 = vst.msk [vmem:[#allocation4 + $0x20] sm:$0xff] %vm793_vm3, %v3636_v9  ;;  %3149 = vst.msk [vmem:[#allocation4 + $0x58] sm:$0xff] %vm793_vm3, %v3117_v39  ;;  %v3639_v3 = vadd.f32 %v5933_v7, %v3607_v60  ;;  %v3116_v18 = vadd.f32 %v3084_v44, %v2965_v0  ;;  %v3094_v39 = vld [vmem:[#allocation4 + $0xa0] sm:$0xff] }
 0x1b7   : > { %v3481_v61 = vpop.f32.mrf.mxu0  ;;  %v3606_v47 = vld [vmem:[#allocation4 + $0x30] sm:$0xff]  ;;  %v5892_v51 = vpop.f32.mrf.mxu1 }
 0x1b8   : > { %3671 = vst.msk [vmem:[#allocation4 + $0x38] sm:$0xff] %vm793_vm3, %v3639_v3  ;;  %3148 = vst.msk [vmem:[#allocation4 + $0x50] sm:$0xff] %vm793_vm3, %v3116_v18  ;;  %v3638_v10 = vadd.f32 %v3606_v47, %v3471_v27  ;;  %v3119_v57 = vadd.f32 %v5892_v51, %v3087_v2  ;;  %v3097_v18 = vld [vmem:[#allocation4 + $0xb8] sm:$0xff] }
 0x1b9   : > { %v5939_v4 = vpop.f32.mrf.mxu0  ;;  %v3609_v5 = vld [vmem:[#allocation4 + $0x48] sm:$0xff]  ;;  %v2975_v14 = vpop.f32.mrf.mxu1 }
 0x1ba   : > { %3670 = vst.msk [vmem:[#allocation4 + $0x30] sm:$0xff] %vm793_vm3, %v3638_v10  ;;  %3151 = vst.msk [vmem:[#allocation4 + $0x68] sm:$0xff] %vm793_vm3, %v3119_v57  ;;  %v3641_v59 = vadd.f32 %v5936_v46, %v3609_v5  ;;  %v3118_v62 = vadd.f32 %v3086_v58, %v2975_v14  ;;  %v3096_v57 = vld [vmem:[#allocation4 + $0xb0] sm:$0xff] }
 0x1bb   : > { %v3491_v22 = vpop.f32.mrf.mxu0  ;;  %v3608_v16 = vld [vmem:[#allocation4 + $0x40] sm:$0xff]  ;;  %v5895_v24 = vpop.f32.mrf.mxu1 }
 0x1bc   : > { %3673 = vst.msk [vmem:[#allocation4 + $0x48] sm:$0xff] %vm793_vm3, %v3641_v59  ;;  %3150 = vst.msk [vmem:[#allocation4 + $0x60] sm:$0xff] %vm793_vm3, %v3118_v62  ;;  %v3640_v48 = vadd.f32 %v3608_v16, %v3481_v61  ;;  %v3121_v50 = vadd.f32 %v5895_v24, %v3089_v8  ;;  %v3099_v62 = vld [vmem:[#allocation4 + $0xc8] sm:$0xff] }
 0x1bd   : > { %v5942_v40 = vpop.f32.mrf.mxu0  ;;  %v3611_v21 = vld [vmem:[#allocation4 + $0x58] sm:$0xff]  ;;  %v2985_v28 = vpop.f32.mrf.mxu1 }
 0x1be   : > { %3672 = vst.msk [vmem:[#allocation4 + $0x40] sm:$0xff] %vm793_vm3, %v3640_v48  ;;  %3153 = vst.msk [vmem:[#allocation4 + $0x78] sm:$0xff] %vm793_vm3, %v3121_v50  ;;  %v3643_v1 = vadd.f32 %v5939_v4, %v3611_v21  ;;  %v3120_v34 = vadd.f32 %v3088_v30, %v2985_v28  ;;  %v3098_v50 = vld [vmem:[#allocation4 + $0xc0] sm:$0xff] }
 0x1bf   : > { %v3501_v49 = vpop.f32.mrf.mxu0  ;;  %v3610_v23 = vld [vmem:[#allocation4 + $0x50] sm:$0xff]  ;;  %v5898_v17 = vpop.f32.mrf.mxu1 }
 0x1c0   : > { %3675 = vst.msk [vmem:[#allocation4 + $0x58] sm:$0xff] %vm793_vm3, %v3643_v1  ;;  %3152 = vst.msk [vmem:[#allocation4 + $0x70] sm:$0xff] %vm793_vm3, %v3120_v34  ;;  %v3642_v32 = vadd.f32 %v3610_v23, %v3491_v22  ;;  %v3123_v26 = vadd.f32 %v5898_v17, %v3091_v42  ;;  %v3101_v34 = vld [vmem:[#allocation4 + $0xd8] sm:$0xff] }
 0x1c1   : > { %v5945_v52 = vpop.f32.mrf.mxu0  ;;  %v3613_v37 = vld [vmem:[#allocation4 + $0x68] sm:$0xff]  ;;  %v2995_v6 = vpop.f32.mrf.mxu1 }
 0x1c2   : > { %3674 = vst.msk [vmem:[#allocation4 + $0x50] sm:$0xff] %vm793_vm3, %v3642_v32  ;;  %3155 = vst.msk [vmem:[#allocation4 + $0x88] sm:$0xff] %vm793_vm3, %v3123_v26  ;;  %v3645_v13 = vadd.f32 %v5942_v40, %v3613_v37  ;;  %v3122_v35 = vadd.f32 %v3090_v11, %v2995_v6  ;;  %v3100_v26 = vld [vmem:[#allocation4 + $0xd0] sm:$0xff] }
 0x1c3   : > { %v3511_v33 = vpop.f32.mrf.mxu0  ;;  %v3612_v25 = vld [vmem:[#allocation4 + $0x60] sm:$0xff]  ;;  %v5901_v19 = vpop.f32.mrf.mxu1 }
 0x1c4   : > { %3677 = vst.msk [vmem:[#allocation4 + $0x68] sm:$0xff] %vm793_vm3, %v3645_v13  ;;  %3154 = vst.msk [vmem:[#allocation4 + $0x80] sm:$0xff] %vm793_vm3, %v3122_v35  ;;  %v3644_v7 = vadd.f32 %v3612_v25, %v3501_v49  ;;  %v3125_v12 = vadd.f32 %v5901_v19, %v3093_v43  ;;  %v3103_v35 = vld [vmem:[#allocation4 + $0xe8] sm:$0xff] }
 0x1c5   : > { %v5948_v41 = vpop.f32.mrf.mxu0  ;;  %v3615_v31 = vld [vmem:[#allocation4 + $0x78] sm:$0xff]  ;;  %v3005_v45 = vpop.f32.mrf.mxu1 }
 0x1c6   : > { %3676 = vst.msk [vmem:[#allocation4 + $0x60] sm:$0xff] %vm793_vm3, %v3644_v7  ;;  %3157 = vst.msk [vmem:[#allocation4 + $0x98] sm:$0xff] %vm793_vm3, %v3125_v12  ;;  %v3647_v27 = vadd.f32 %v5945_v52, %v3615_v31  ;;  %v3124_v29 = vadd.f32 %v3092_v20, %v3005_v45  ;;  %v3102_v12 = vld [vmem:[#allocation4 + $0xe0] sm:$0xff] }
 0x1c7   : > { %v3521_v38 = vpop.f32.mrf.mxu0  ;;  %v3614_v15 = vld [vmem:[#allocation4 + $0x70] sm:$0xff]  ;;  %v5904_v36 = vpop.f32.mrf.mxu1 }
 0x1c8   : > { %3679 = vst.msk [vmem:[#allocation4 + $0x78] sm:$0xff] %vm793_vm3, %v3647_v27  ;;  %3156 = vst.msk [vmem:[#allocation4 + $0x90] sm:$0xff] %vm793_vm3, %v3124_v29  ;;  %v3646_v46 = vadd.f32 %v3614_v15, %v3511_v33  ;;  %v3127_v54 = vadd.f32 %v5904_v36, %v3095_v53  ;;  %v3105_v29 = vld [vmem:[#allocation4 + $0xf8] sm:$0xff] }
 0x1c9   : > { %v5951_v55 = vpop.f32.mrf.mxu0  ;;  %v3617_v56 = vld [vmem:[#allocation4 + $0x88] sm:$0xff]  ;;  %v3015_v9 = vpop.f32.mrf.mxu1 }
 0x1ca   : > { %3678 = vst.msk [vmem:[#allocation4 + $0x70] sm:$0xff] %vm793_vm3, %v3646_v46  ;;  %3159 = vst.msk [vmem:[#allocation4 + $0xa8] sm:$0xff] %vm793_vm3, %v3127_v54  ;;  %v3649_v61 = vadd.f32 %v5948_v41, %v3617_v56  ;;  %v3126_v60 = vadd.f32 %v3094_v39, %v3015_v9  ;;  %v3104_v54 = vld [vmem:[#allocation4 + $0xf0] sm:$0xff] }
 0x1cb   : > { %v3531_v63 = vpop.f32.mrf.mxu0  ;;  %v3616_v44 = vld [vmem:[#allocation4 + $0x80] sm:$0xff]  ;;  %v5907_v3 = vpop.f32.mrf.mxu1 }
 0x1cc   : > { %3681 = vst.msk [vmem:[#allocation4 + $0x88] sm:$0xff] %vm793_vm3, %v3649_v61  ;;  %3158 = vst.msk [vmem:[#allocation4 + $0xa0] sm:$0xff] %vm793_vm3, %v3126_v60  ;;  %v3648_v4 = vadd.f32 %v3616_v44, %v3521_v38  ;;  %v3129_v47 = vadd.f32 %v5907_v3, %v3097_v18  ;;  %v4055_v60 = vld [vmem:[#allocation4 + $0x8] sm:$0xff] }
 0x1cd   : > { %v5954_v0 = vpop.f32.mrf.mxu0  ;;  %v3619_v2 = vld [vmem:[#allocation4 + $0x98] sm:$0xff]  ;;  %v3025_v10 = vpop.f32.mrf.mxu1 }
 0x1ce   : > { %3680 = vst.msk [vmem:[#allocation4 + $0x80] sm:$0xff] %vm793_vm3, %v3648_v4  ;;  %3161 = vst.msk [vmem:[#allocation4 + $0xb8] sm:$0xff] %vm793_vm3, %v3129_v47  ;;  %v3651_v22 = vadd.f32 %v5951_v55, %v3619_v2  ;;  %v3128_v5 = vadd.f32 %v3096_v57, %v3025_v10  ;;  %v4054_v47 = vld [vmem:[#allocation4] sm:$0xff] }
 0x1cf   : > { %v3541_v51 = vpop.f32.mrf.mxu0  ;;  %v3618_v58 = vld [vmem:[#allocation4 + $0x90] sm:$0xff]  ;;  %v5910_v59 = vpop.f32.mrf.mxu1 }
 0x1d0   : > { %3683 = vst.msk [vmem:[#allocation4 + $0x98] sm:$0xff] %vm793_vm3, %v3651_v22  ;;  %3160 = vst.msk [vmem:[#allocation4 + $0xb0] sm:$0xff] %vm793_vm3, %v3128_v5  ;;  %v3650_v40 = vadd.f32 %v3618_v58, %v3531_v63  ;;  %v3131_v16 = vadd.f32 %v5910_v59, %v3099_v62  ;;  %v4057_v5 = vld [vmem:[#allocation4 + $0x18] sm:$0xff] }
 0x1d1   : > { %v5957_v14 = vpop.f32.mrf.mxu0  ;;  %v3621_v8 = vld [vmem:[#allocation4 + $0xa8] sm:$0xff]  ;;  %v3035_v48 = vpop.f32.mrf.mxu1 }
 0x1d2   : > { %3682 = vst.msk [vmem:[#allocation4 + $0x90] sm:$0xff] %vm793_vm3, %v3650_v40  ;;  %3163 = vst.msk [vmem:[#allocation4 + $0xc8] sm:$0xff] %vm793_vm3, %v3131_v16  ;;  %v3653_v49 = vadd.f32 %v5954_v0, %v3621_v8  ;;  %v3130_v21 = vadd.f32 %v3098_v50, %v3035_v48  ;;  %v4056_v16 = vld [vmem:[#allocation4 + $0x10] sm:$0xff] }
 0x1d3   : > { %v3551_v24 = vpop.f32.mrf.mxu0  ;;  %v3620_v30 = vld [vmem:[#allocation4 + $0xa0] sm:$0xff]  ;;  %v5913_v1 = vpop.f32.mrf.mxu1 }
 0x1d4   : > { %3685 = vst.msk [vmem:[#allocation4 + $0xa8] sm:$0xff] %vm793_vm3, %v3653_v49  ;;  %3162 = vst.msk [vmem:[#allocation4 + $0xc0] sm:$0xff] %vm793_vm3, %v3130_v21  ;;  %v3652_v52 = vadd.f32 %v3620_v30, %v3541_v51  ;;  %v3133_v23 = vadd.f32 %v5913_v1, %v3101_v34  ;;  %v4059_v21 = vld [vmem:[#allocation4 + $0x28] sm:$0xff] }
 0x1d5   : > { %v5960_v28 = vpop.f32.mrf.mxu0  ;;  %v3623_v42 = vld [vmem:[#allocation4 + $0xb8] sm:$0xff]  ;;  %v3045_v32 = vpop.f32.mrf.mxu1 }
 0x1d6   : > { %3684 = vst.msk [vmem:[#allocation4 + $0xa0] sm:$0xff] %vm793_vm3, %v3652_v52  ;;  %3165 = vst.msk [vmem:[#allocation4 + $0xd8] sm:$0xff] %vm793_vm3, %v3133_v23  ;;  %v3655_v33 = vadd.f32 %v5957_v14, %v3623_v42  ;;  %v3132_v37 = vadd.f32 %v3100_v26, %v3045_v32  ;;  %v4058_v23 = vld [vmem:[#allocation4 + $0x20] sm:$0xff] }
 0x1d7   : > { %v3561_v17 = vpop.f32.mrf.mxu0  ;;  %v3622_v11 = vld [vmem:[#allocation4 + $0xb0] sm:$0xff]  ;;  %v5916_v13 = vpop.f32.mrf.mxu1 }
 0x1d8   : > { %3687 = vst.msk [vmem:[#allocation4 + $0xb8] sm:$0xff] %vm793_vm3, %v3655_v33  ;;  %3164 = vst.msk [vmem:[#allocation4 + $0xd0] sm:$0xff] %vm793_vm3, %v3132_v37  ;;  %v3654_v41 = vadd.f32 %v3622_v11, %v3551_v24  ;;  %v3135_v25 = vadd.f32 %v5916_v13, %v3103_v35  ;;  %v4061_v37 = vld [vmem:[#allocation4 + $0x38] sm:$0xff] }
 0x1d9   : > { %v5963_v6 = vpop.f32.mrf.mxu0  ;;  %v3625_v43 = vld [vmem:[#allocation4 + $0xc8] sm:$0xff]  ;;  %v3055_v7 = vpop.f32.mrf.mxu1 }
 0x1da   : > { %3686 = vst.msk [vmem:[#allocation4 + $0xb0] sm:$0xff] %vm793_vm3, %v3654_v41  ;;  %3167 = vst.msk [vmem:[#allocation4 + $0xe8] sm:$0xff] %vm793_vm3, %v3135_v25  ;;  %v3657_v38 = vadd.f32 %v5960_v28, %v3625_v43  ;;  %v3134_v31 = vadd.f32 %v3102_v12, %v3055_v7  ;;  %v4060_v25 = vld [vmem:[#allocation4 + $0x30] sm:$0xff] }
 0x1db   : > { %v3571_v19 = vpop.f32.mrf.mxu0  ;;  %v3624_v20 = vld [vmem:[#allocation4 + $0xc0] sm:$0xff]  ;;  %v5919_v27 = vpop.f32.mrf.mxu1 }
 0x1dc   : > { %3689 = vst.msk [vmem:[#allocation4 + $0xc8] sm:$0xff] %vm793_vm3, %v3657_v38  ;;  %3166 = vst.msk [vmem:[#allocation4 + $0xe0] sm:$0xff] %vm793_vm3, %v3134_v31  ;;  %v3656_v55 = vadd.f32 %v3624_v20, %v3561_v17  ;;  %v3137_v15 = vadd.f32 %v5919_v27, %v3105_v29  ;;  %v4063_v31 = vld [vmem:[#allocation4 + $0x48] sm:$0xff] }
 0x1dd   : > { %v5966_v45 = vpop.f32.mrf.mxu0  ;;  %v3627_v53 = vld [vmem:[#allocation4 + $0xd8] sm:$0xff]  ;;  %v3065_v46 = vpop.f32.mrf.mxu1 }
 0x1de   : > { %3688 = vst.msk [vmem:[#allocation4 + $0xc0] sm:$0xff] %vm793_vm3, %v3656_v55  ;;  %3169 = vst.msk [vmem:[#allocation4 + $0xf8] sm:$0xff] %vm793_vm3, %v3137_v15  ;;  %v3659_v63 = vadd.f32 %v5963_v6, %v3627_v53  ;;  %v3136_v56 = vadd.f32 %v3104_v54, %v3065_v46  ;;  %v4062_v15 = vld [vmem:[#allocation4 + $0x40] sm:$0xff] }
 0x1df   : > { %v3581_v36 = vpop.f32.mrf.mxu0  ;;  %v3626_v39 = vld [vmem:[#allocation4 + $0xd0] sm:$0xff]  ;;  %v5974_v61 = vpop.f32.mrf.mxu1 }
 0x1e0   : > { %3691 = vst.msk [vmem:[#allocation4 + $0xd8] sm:$0xff] %vm793_vm3, %v3659_v63  ;;  %3168 = vst.msk [vmem:[#allocation4 + $0xf0] sm:$0xff] %vm793_vm3, %v3136_v56  ;;  %v3658_v0 = vadd.f32 %v3626_v39, %v3571_v19  ;;  %v4087_v44 = vadd.f32 %v5974_v61, %v4055_v60 }
 0x1e1   : > { %v5969_v9 = vpop.f32.mrf.mxu0  ;;  %v3629_v18 = vld [vmem:[#allocation4 + $0xe8] sm:$0xff]  ;;  %v3895_v4 = vpop.f32.mrf.mxu1 }
 0x1e2   : > { %3690 = vst.msk [vmem:[#allocation4 + $0xd0] sm:$0xff] %vm793_vm3, %v3658_v0  ;;  %v3661_v51 = vadd.f32 %v5966_v45, %v3629_v18  ;;  %4119 = vst.msk [vmem:[#allocation4 + $0x8] sm:$0xff] %vm793_vm3, %v4087_v44  ;;  %v4086_v2 = vadd.f32 %v4054_v47, %v3895_v4  ;;  %v4064_v18 = vld [vmem:[#allocation4 + $0x50] sm:$0xff] }
 0x1e3   : > { %v3591_v3 = vpop.f32.mrf.mxu0  ;;  %v3628_v57 = vld [vmem:[#allocation4 + $0xe0] sm:$0xff]  ;;  %v5977_v22 = vpop.f32.mrf.mxu1 }
 0x1e4   : > { %3693 = vst.msk [vmem:[#allocation4 + $0xe8] sm:$0xff] %vm793_vm3, %v3661_v51  ;;  %v3660_v14 = vadd.f32 %v3628_v57, %v3581_v36  ;;  %4118 = vst.msk [vmem:[#allocation4] sm:$0xff] %vm793_vm3, %v4086_v2  ;;  %v4089_v58 = vadd.f32 %v5977_v22, %v4057_v5  ;;  %v4067_v22 = vld [vmem:[#allocation4 + $0x68] sm:$0xff] }
 0x1e5   : > { %v6024_v10 = vpop.f32.mrf.mxu0  ;;  %v3631_v62 = vld [vmem:[#allocation4 + $0xf8] sm:$0xff]  ;;  %v3905_v40 = vpop.f32.mrf.mxu1 }
 0x1e6   : > { %3692 = vst.msk [vmem:[#allocation4 + $0xe0] sm:$0xff] %vm793_vm3, %v3660_v14  ;;  %v3663_v24 = vadd.f32 %v5969_v9, %v3631_v62  ;;  %4121 = vst.msk [vmem:[#allocation4 + $0x18] sm:$0xff] %vm793_vm3, %v4089_v58  ;;  %v4088_v8 = vadd.f32 %v4056_v16, %v3905_v40  ;;  %v4065_v9 = vld [vmem:[#allocation4 + $0x58] sm:$0xff]  ;;  %v4066_v16 = vld [vmem:[#allocation4 + $0x60] sm:$0xff] }
 0x1e7   : > { %v4349_v59 = vpop.f32.mrf.mxu0  ;;  %v3630_v50 = vld [vmem:[#allocation4 + $0xf0] sm:$0xff]  ;;  %v5980_v49 = vpop.f32.mrf.mxu1 }
 0x1e8   : > { %3695 = vst.msk [vmem:[#allocation4 + $0xf8] sm:$0xff] %vm793_vm3, %v3663_v24  ;;  %v3662_v28 = vadd.f32 %v3630_v50, %v3591_v3  ;;  %4120 = vst.msk [vmem:[#allocation4 + $0x10] sm:$0xff] %vm793_vm3, %v4088_v8  ;;  %v4091_v30 = vadd.f32 %v5980_v49, %v4059_v21 }
 0x1e9   : > { %v6027_v48 = vpop.f32.mrf.mxu0  ;;  %v4509_v34 = vld [vmem:[#allocation4 + $0x8] sm:$0xff]  ;;  %v3915_v52 = vpop.f32.mrf.mxu1 }
 0x1ea   : > { %3694 = vst.msk [vmem:[#allocation4 + $0xf0] sm:$0xff] %vm793_vm3, %v3662_v28  ;;  %4123 = vst.msk [vmem:[#allocation4 + $0x28] sm:$0xff] %vm793_vm3, %v4091_v30  ;;  %v4541_v17 = vadd.f32 %v6024_v10, %v4509_v34  ;;  %v4090_v42 = vadd.f32 %v4058_v23, %v3915_v52  ;;  %v4069_v28 = vld [vmem:[#allocation4 + $0x78] sm:$0xff] }
 0x1eb   : > { %v4359_v1 = vpop.f32.mrf.mxu0  ;;  %v4508_v26 = vld [vmem:[#allocation4] sm:$0xff]  ;;  %v5983_v33 = vpop.f32.mrf.mxu1 }
 0x1ec   : > { %4573 = vst.msk [vmem:[#allocation4 + $0x8] sm:$0xff] %vm793_vm3, %v4541_v17  ;;  %4122 = vst.msk [vmem:[#allocation4 + $0x20] sm:$0xff] %vm793_vm3, %v4090_v42  ;;  %v4540_v6 = vadd.f32 %v4508_v26, %v4349_v59  ;;  %v4093_v11 = vadd.f32 %v5983_v33, %v4061_v37  ;;  %v4068_v42 = vld [vmem:[#allocation4 + $0x70] sm:$0xff] }
 0x1ed   : > { %v6030_v32 = vpop.f32.mrf.mxu0  ;;  %v4511_v35 = vld [vmem:[#allocation4 + $0x18] sm:$0xff]  ;;  %v3925_v41 = vpop.f32.mrf.mxu1 }
 0x1ee   : > { %4572 = vst.msk [vmem:[#allocation4] sm:$0xff] %vm793_vm3, %v4540_v6  ;;  %4125 = vst.msk [vmem:[#allocation4 + $0x38] sm:$0xff] %vm793_vm3, %v4093_v11  ;;  %v4543_v19 = vadd.f32 %v6027_v48, %v4511_v35  ;;  %v4092_v43 = vadd.f32 %v4060_v25, %v3925_v41 }
 0x1ef   : > { %v4369_v13 = vpop.f32.mrf.mxu0  ;;  %v4510_v12 = vld [vmem:[#allocation4 + $0x10] sm:$0xff]  ;;  %v5986_v38 = vpop.f32.mrf.mxu1 }
 0x1f0   : > { %4575 = vst.msk [vmem:[#allocation4 + $0x18] sm:$0xff] %vm793_vm3, %v4543_v19  ;;  %4124 = vst.msk [vmem:[#allocation4 + $0x30] sm:$0xff] %vm793_vm3, %v4092_v43  ;;  %v4542_v45 = vadd.f32 %v4510_v12, %v4359_v1  ;;  %v4095_v20 = vadd.f32 %v5986_v38, %v4063_v31  ;;  %v4070_v12 = vld [vmem:[#allocation4 + $0x80] sm:$0xff] }
 0x1f1   : > { %v6033_v7 = vpop.f32.mrf.mxu0  ;;  %v4513_v29 = vld [vmem:[#allocation4 + $0x28] sm:$0xff]  ;;  %v3935_v55 = vpop.f32.mrf.mxu1 }
 0x1f2   : > { %4574 = vst.msk [vmem:[#allocation4 + $0x10] sm:$0xff] %vm793_vm3, %v4542_v45  ;;  %4127 = vst.msk [vmem:[#allocation4 + $0x48] sm:$0xff] %vm793_vm3, %v4095_v20  ;;  %v4545_v36 = vadd.f32 %v6030_v32, %v4513_v29  ;;  %v4094_v53 = vadd.f32 %v4062_v15, %v3935_v55  ;;  %v4073_v55 = vld [vmem:[#allocation4 + $0x98] sm:$0xff] }
 0x1f3   : > { %v4379_v27 = vpop.f32.mrf.mxu0  ;;  %v7577_v54 = vld [vmem:[#allocation4 + $0x8] sm:$0xff]  ;;  %v4512_v63 = vld [vmem:[#allocation4 + $0x20] sm:$0xff]  ;;  %v5989_v56 = vpop.f32.mrf.mxu1 }
 0x1f4   : > { %4637 = vst.msk [vmem:[%s7573_s24 + $0x8] sm:$0xff] %vm793_vm3, %v7577_v54  ;;  %4577 = vst.msk [vmem:[#allocation4 + $0x28] sm:$0xff] %vm793_vm3, %v4545_v36  ;;  %v4544_v39 = vadd.f32 %v4512_v63, %v4369_v13  ;;  %v4097_v61 = vadd.f32 %v5989_v56, %v4065_v9  ;;  %v4071_v13 = vld [vmem:[#allocation4 + $0x88] sm:$0xff]  ;;  %v4072_v9 = vld [vmem:[#allocation4 + $0x90] sm:$0xff] }
 0x1f5   : > { %v6036_v46 = vpop.f32.mrf.mxu0  ;;  %4126 = vst.msk [vmem:[#allocation4 + $0x40] sm:$0xff] %vm793_vm3, %v4094_v53  ;;  %v7584_v0 = vld [vmem:[#allocation4] sm:$0xff]  ;;  %v4515_v44 = vld [vmem:[#allocation4 + $0x38] sm:$0xff]  ;;  %v3945_v3 = vpop.f32.mrf.mxu1 }
 0x1f6   : > { %4636 = vst.msk [vmem:[%s7573_s24] sm:$0xff] %vm793_vm3, %v7584_v0  ;;  %4576 = vst.msk [vmem:[#allocation4 + $0x20] sm:$0xff] %vm793_vm3, %v4544_v39  ;;  %v4547_v4 = vadd.f32 %v6033_v7, %v4515_v44  ;;  %v4096_v47 = vadd.f32 %v4064_v18, %v3945_v3 }
 0x1f7   : > { %v4389_v60 = vpop.f32.mrf.mxu0  ;;  %4129 = vst.msk [vmem:[#allocation4 + $0x58] sm:$0xff] %vm793_vm3, %v4097_v61  ;;  %v7591_v2 = vld [vmem:[#allocation4 + $0x18] sm:$0xff]  ;;  %v4514_v10 = vld [vmem:[#allocation4 + $0x30] sm:$0xff]  ;;  %v5992_v57 = vpop.f32.mrf.mxu1 }
 0x1f8   : > { %4639 = vst.msk [vmem:[%s7573_s24 + $0x18] sm:$0xff] %vm793_vm3, %v7591_v2  ;;  %4579 = vst.msk [vmem:[#allocation4 + $0x38] sm:$0xff] %vm793_vm3, %v4547_v4  ;;  %v4546_v5 = vadd.f32 %v4514_v10, %v4379_v27  ;;  %v4099_v14 = vadd.f32 %v5992_v57, %v4067_v22  ;;  %v4075_v4 = vld [vmem:[#allocation4 + $0xa8] sm:$0xff] }
 0x1f9   : > { %v6039_v51 = vpop.f32.mrf.mxu0  ;;  %4128 = vst.msk [vmem:[#allocation4 + $0x50] sm:$0xff] %vm793_vm3, %v4096_v47  ;;  %v7598_v59 = vld [vmem:[#allocation4 + $0x10] sm:$0xff]  ;;  %v4517_v62 = vld [vmem:[#allocation4 + $0x48] sm:$0xff]  ;;  %v3955_v40 = vpop.f32.mrf.mxu1 }
 0x1fa   : > { %4638 = vst.msk [vmem:[%s7573_s24 + $0x10] sm:$0xff] %vm793_vm3, %v7598_v59  ;;  %4578 = vst.msk [vmem:[#allocation4 + $0x30] sm:$0xff] %vm793_vm3, %v4546_v5  ;;  %v4549_v24 = vadd.f32 %v6036_v46, %v4517_v62  ;;  %v4098_v8 = vadd.f32 %v4066_v16, %v3955_v40 }
 0x1fb   : > { %v4399_v58 = vpop.f32.mrf.mxu0  ;;  %4131 = vst.msk [vmem:[#allocation4 + $0x68] sm:$0xff] %vm793_vm3, %v4099_v14  ;;  %v7605_v50 = vld [vmem:[#allocation4 + $0x28] sm:$0xff]  ;;  %v5995_v21 = vpop.f32.mrf.mxu1  ;;  %v4074_v14 = vld [vmem:[#allocation4 + $0xa0] sm:$0xff] }
 0x1fc   : > { %v4516_v49 = vld [vmem:[#allocation4 + $0x40] sm:$0xff]  ;;  %4641 = vst.msk [vmem:[%s7573_s24 + $0x28] sm:$0xff] %vm793_vm3, %v7605_v50  ;;  %4581 = vst.msk [vmem:[#allocation4 + $0x48] sm:$0xff] %vm793_vm3, %v4549_v24  ;;  %v4101_v1 = vadd.f32 %v5995_v21, %v4069_v28 }
 0x1fd   : > { %v6042_v48 = vpop.f32.mrf.mxu0  ;;  %4130 = vst.msk [vmem:[#allocation4 + $0x60] sm:$0xff] %vm793_vm3, %v4098_v8  ;;  %v4548_v30 = vadd.f32 %v4516_v49, %v4389_v60  ;;  %v7612_v52 = vld [vmem:[#allocation4 + $0x20] sm:$0xff]  ;;  %v3965_v17 = vpop.f32.mrf.mxu1 }
 0x1fe   : > { %v4519_v23 = vld [vmem:[#allocation4 + $0x58] sm:$0xff]  ;;  %4640 = vst.msk [vmem:[%s7573_s24 + $0x20] sm:$0xff] %vm793_vm3, %v7612_v52  ;;  %4133 = vst.msk [vmem:[#allocation4 + $0x78] sm:$0xff] %vm793_vm3, %v4101_v1  ;;  %v4100_v26 = vadd.f32 %v4068_v42, %v3965_v17 }
 0x1ff   : > { %v4409_v34 = vpop.f32.mrf.mxu0  ;;  %4580 = vst.msk [vmem:[#allocation4 + $0x40] sm:$0xff] %vm793_vm3, %v4548_v30  ;;  %v4551_v32 = vadd.f32 %v6039_v51, %v4519_v23  ;;  %v7619_v37 = vld [vmem:[#allocation4 + $0x38] sm:$0xff]  ;;  %v5998_v11 = vpop.f32.mrf.mxu1  ;;  %v4076_v23 = vld [vmem:[#allocation4 + $0xb0] sm:$0xff] }
 0x200   : > { %v4518_v6 = vld [vmem:[#allocation4 + $0x50] sm:$0xff]  ;;  %4643 = vst.msk [vmem:[%s7573_s24 + $0x38] sm:$0xff] %vm793_vm3, %v7619_v37  ;;  %4132 = vst.msk [vmem:[#allocation4 + $0x70] sm:$0xff] %vm793_vm3, %v4100_v26  ;;  %v4103_v41 = vadd.f32 %v5998_v11, %v4071_v13  ;;  %v4079_v11 = vld [vmem:[#allocation4 + $0xc8] sm:$0xff] }
 0x201   : > { %v6045_v33 = vpop.f32.mrf.mxu0  ;;  %4583 = vst.msk [vmem:[#allocation4 + $0x58] sm:$0xff] %vm793_vm3, %v4551_v32  ;;  %v4550_v35 = vadd.f32 %v4518_v6, %v4399_v58  ;;  %v7626_v19 = vld [vmem:[#allocation4 + $0x30] sm:$0xff]  ;;  %v3975_v7 = vpop.f32.mrf.mxu1 }
 0x202   : > { %v4521_v43 = vld [vmem:[#allocation4 + $0x68] sm:$0xff]  ;;  %4642 = vst.msk [vmem:[%s7573_s24 + $0x30] sm:$0xff] %vm793_vm3, %v7626_v19  ;;  %4135 = vst.msk [vmem:[#allocation4 + $0x88] sm:$0xff] %vm793_vm3, %v4103_v41  ;;  %v4102_v31 = vadd.f32 %v4070_v12, %v3975_v7  ;;  %v4078_v12 = vld [vmem:[#allocation4 + $0xc0] sm:$0xff] }
 0x203   : > { %v4419_v25 = vpop.f32.mrf.mxu0  ;;  %4582 = vst.msk [vmem:[#allocation4 + $0x50] sm:$0xff] %vm793_vm3, %v4550_v35  ;;  %v4553_v38 = vadd.f32 %v6042_v48, %v4521_v43  ;;  %v7633_v20 = vld [vmem:[#allocation4 + $0x48] sm:$0xff]  ;;  %v6001_v29 = vpop.f32.mrf.mxu1  ;;  %v4077_v48 = vld [vmem:[#allocation4 + $0xb8] sm:$0xff] }
 0x204   : > { %v4520_v27 = vld [vmem:[#allocation4 + $0x60] sm:$0xff]  ;;  %4645 = vst.msk [vmem:[%s7573_s24 + $0x48] sm:$0xff] %vm793_vm3, %v7633_v20  ;;  %4134 = vst.msk [vmem:[#allocation4 + $0x80] sm:$0xff] %vm793_vm3, %v4102_v31  ;;  %v4105_v36 = vadd.f32 %v6001_v29, %v4073_v55 }
 0x205   : > { %v6048_v45 = vpop.f32.mrf.mxu0  ;;  %4585 = vst.msk [vmem:[#allocation4 + $0x68] sm:$0xff] %vm793_vm3, %v4553_v38  ;;  %v4552_v15 = vadd.f32 %v4520_v27, %v4409_v34  ;;  %v4523_v63 = vld [vmem:[#allocation4 + $0x78] sm:$0xff]  ;;  %v3985_v56 = vpop.f32.mrf.mxu1 }
 0x206   : > { %v7640_v46 = vld [vmem:[#allocation4 + $0x40] sm:$0xff]  ;;  %4137 = vst.msk [vmem:[#allocation4 + $0x98] sm:$0xff] %vm793_vm3, %v4105_v36  ;;  %v4555_v39 = vadd.f32 %v6045_v33, %v4523_v63  ;;  %v4104_v61 = vadd.f32 %v4072_v9, %v3985_v56 }
 0x207   : > { %v4429_v53 = vpop.f32.mrf.mxu0  ;;  %4644 = vst.msk [vmem:[%s7573_s24 + $0x40] sm:$0xff] %vm793_vm3, %v7640_v46  ;;  %4584 = vst.msk [vmem:[#allocation4 + $0x60] sm:$0xff] %vm793_vm3, %v4552_v15  ;;  %v4522_v3 = vld [vmem:[#allocation4 + $0x70] sm:$0xff]  ;;  %v6004_v18 = vpop.f32.mrf.mxu1  ;;  %v4081_v15 = vld [vmem:[#allocation4 + $0xd8] sm:$0xff] }
 0x208   : > { %v7647_v44 = vld [vmem:[#allocation4 + $0x58] sm:$0xff]  ;;  %4587 = vst.msk [vmem:[#allocation4 + $0x78] sm:$0xff] %vm793_vm3, %v4555_v39  ;;  %4136 = vst.msk [vmem:[#allocation4 + $0x90] sm:$0xff] %vm793_vm3, %v4104_v61  ;;  %v4554_v47 = vadd.f32 %v4522_v3, %v4419_v25  ;;  %v4107_v51 = vadd.f32 %v6004_v18, %v4075_v4  ;;  %v4080_v61 = vld [vmem:[#allocation4 + $0xd0] sm:$0xff] }
 0x209   : > { %v6051_v60 = vpop.f32.mrf.mxu0  ;;  %4647 = vst.msk [vmem:[%s7573_s24 + $0x58] sm:$0xff] %vm793_vm3, %v7647_v44  ;;  %v4525_v22 = vld [vmem:[#allocation4 + $0x88] sm:$0xff]  ;;  %v3995_v5 = vpop.f32.mrf.mxu1 }
 0x20a   : > { %v7654_v57 = vld [vmem:[#allocation4 + $0x50] sm:$0xff]  ;;  %4586 = vst.msk [vmem:[#allocation4 + $0x70] sm:$0xff] %vm793_vm3, %v4554_v47  ;;  %4139 = vst.msk [vmem:[#allocation4 + $0xa8] sm:$0xff] %vm793_vm3, %v4107_v51  ;;  %v4557_v58 = vadd.f32 %v6048_v45, %v4525_v22  ;;  %v4106_v62 = vadd.f32 %v4074_v14, %v3995_v5 }
 0x20b   : > { %v4439_v10 = vpop.f32.mrf.mxu0  ;;  %4646 = vst.msk [vmem:[%s7573_s24 + $0x50] sm:$0xff] %vm793_vm3, %v7654_v57  ;;  %v4524_v24 = vld [vmem:[#allocation4 + $0x80] sm:$0xff]  ;;  %v6007_v8 = vpop.f32.mrf.mxu1 }
 0x20c   : > { %v7661_v16 = vld [vmem:[#allocation4 + $0x68] sm:$0xff]  ;;  %4589 = vst.msk [vmem:[#allocation4 + $0x88] sm:$0xff] %vm793_vm3, %v4557_v58  ;;  %4138 = vst.msk [vmem:[#allocation4 + $0xa0] sm:$0xff] %vm793_vm3, %v4106_v62  ;;  %v4556_v49 = vadd.f32 %v4524_v24, %v4429_v53  ;;  %v4109_v21 = vadd.f32 %v6007_v8, %v4077_v48  ;;  %v4082_v24 = vld [vmem:[#allocation4 + $0xe0] sm:$0xff] }
 0x20d   : > { %v6054_v40 = vpop.f32.mrf.mxu0  ;;  %4649 = vst.msk [vmem:[%s7573_s24 + $0x68] sm:$0xff] %vm793_vm3, %v7661_v16  ;;  %v4527_v1 = vld [vmem:[#allocation4 + $0x98] sm:$0xff]  ;;  %v4005_v34 = vpop.f32.mrf.mxu1 }
 0x20e   : > { %v7668_v30 = vld [vmem:[#allocation4 + $0x60] sm:$0xff]  ;;  %4588 = vst.msk [vmem:[#allocation4 + $0x80] sm:$0xff] %vm793_vm3, %v4556_v49  ;;  %4141 = vst.msk [vmem:[#allocation4 + $0xb8] sm:$0xff] %vm793_vm3, %v4109_v21  ;;  %v4559_v17 = vadd.f32 %v6051_v60, %v4527_v1  ;;  %v4108_v42 = vadd.f32 %v4076_v23, %v4005_v34  ;;  %v4085_v1 = vld [vmem:[#allocation4 + $0xf8] sm:$0xff] }
 0x20f   : > { %v4449_v28 = vpop.f32.mrf.mxu0  ;;  %4648 = vst.msk [vmem:[%s7573_s24 + $0x60] sm:$0xff] %vm793_vm3, %v7668_v30  ;;  %v7675_v26 = vld [vmem:[#allocation4 + $0x78] sm:$0xff]  ;;  %v4526_v33 = vld [vmem:[#allocation4 + $0x90] sm:$0xff]  ;;  %v6010_v6 = vpop.f32.mrf.mxu1 }
 0x210   : > { %4651 = vst.msk [vmem:[%s7573_s24 + $0x78] sm:$0xff] %vm793_vm3, %v7675_v26  ;;  %4591 = vst.msk [vmem:[#allocation4 + $0x98] sm:$0xff] %vm793_vm3, %v4559_v17  ;;  %v4558_v13 = vadd.f32 %v4526_v33, %v4439_v10  ;;  %v4111_v35 = vadd.f32 %v6010_v6, %v4079_v11  ;;  %v4083_v10 = vld [vmem:[#allocation4 + $0xe8] sm:$0xff]  ;;  %v4084_v6 = vld [vmem:[#allocation4 + $0xf0] sm:$0xff] }
 0x211   : > { %v6057_v32 = vpop.f32.mrf.mxu0  ;;  %4140 = vst.msk [vmem:[#allocation4 + $0xb0] sm:$0xff] %vm793_vm3, %v4108_v42  ;;  %v7682_v25 = vld [vmem:[#allocation4 + $0x70] sm:$0xff]  ;;  %v4529_v43 = vld [vmem:[#allocation4 + $0xa8] sm:$0xff]  ;;  %v4015_v7 = vpop.f32.mrf.mxu1 }
 0x212   : > { %4650 = vst.msk [vmem:[%s7573_s24 + $0x70] sm:$0xff] %vm793_vm3, %v7682_v25  ;;  %4590 = vst.msk [vmem:[#allocation4 + $0x90] sm:$0xff] %vm793_vm3, %v4558_v13  ;;  %v4561_v38 = vadd.f32 %v6054_v40, %v4529_v43  ;;  %v4110_v31 = vadd.f32 %v4078_v12, %v4015_v7 }
 0x213   : > { %v4459_v41 = vpop.f32.mrf.mxu0  ;;  %4143 = vst.msk [vmem:[#allocation4 + $0xc8] sm:$0xff] %vm793_vm3, %v4111_v35  ;;  %v7689_v27 = vld [vmem:[#allocation4 + $0x88] sm:$0xff]  ;;  %v4528_v29 = vld [vmem:[#allocation4 + $0xa0] sm:$0xff]  ;;  %v6013_v55 = vpop.f32.mrf.mxu1 }
 0x214   : > { %4653 = vst.msk [vmem:[%s7573_s24 + $0x88] sm:$0xff] %vm793_vm3, %v7689_v27  ;;  %4593 = vst.msk [vmem:[#allocation4 + $0xa8] sm:$0xff] %vm793_vm3, %v4561_v38  ;;  %v4560_v36 = vadd.f32 %v4528_v29, %v4449_v28  ;;  %v4113_v53 = vadd.f32 %v6013_v55, %v4081_v15 }
 0x215   : > { %v6060_v45 = vpop.f32.mrf.mxu0  ;;  %4142 = vst.msk [vmem:[#allocation4 + $0xc0] sm:$0xff] %vm793_vm3, %v4110_v31  ;;  %v7696_v56 = vld [vmem:[#allocation4 + $0x80] sm:$0xff]  ;;  %v4531_v9 = vld [vmem:[#allocation4 + $0xb8] sm:$0xff]  ;;  %v4025_v39 = vpop.f32.mrf.mxu1 }
 0x216   : > { %4652 = vst.msk [vmem:[%s7573_s24 + $0x80] sm:$0xff] %vm793_vm3, %v7696_v56  ;;  %4592 = vst.msk [vmem:[#allocation4 + $0xa0] sm:$0xff] %vm793_vm3, %v4560_v36  ;;  %v4563_v60 = vadd.f32 %v6057_v32, %v4531_v9  ;;  %v4112_v3 = vadd.f32 %v4080_v61, %v4025_v39 }
 0x217   : > { %v4469_v63 = vpop.f32.mrf.mxu0  ;;  %4145 = vst.msk [vmem:[#allocation4 + $0xd8] sm:$0xff] %vm793_vm3, %v4113_v53  ;;  %v7703_v4 = vld [vmem:[#allocation4 + $0x98] sm:$0xff]  ;;  %v6016_v51 = vpop.f32.mrf.mxu1 }
 0x218   : > { %v4530_v47 = vld [vmem:[#allocation4 + $0xb0] sm:$0xff]  ;;  %4655 = vst.msk [vmem:[%s7573_s24 + $0x98] sm:$0xff] %vm793_vm3, %v7703_v4  ;;  %4595 = vst.msk [vmem:[#allocation4 + $0xb8] sm:$0xff] %vm793_vm3, %v4563_v60  ;;  %v4115_v5 = vadd.f32 %v6016_v51, %v4083_v10 }
 0x219   : > { %v6063_v18 = vpop.f32.mrf.mxu0  ;;  %4144 = vst.msk [vmem:[#allocation4 + $0xd0] sm:$0xff] %vm793_vm3, %v4112_v3  ;;  %v4562_v22 = vadd.f32 %v4530_v47, %v4459_v41  ;;  %v7710_v58 = vld [vmem:[#allocation4 + $0x90] sm:$0xff]  ;;  %v4035_v40 = vpop.f32.mrf.mxu1 }
 0x21a   : > { %v4533_v62 = vld [vmem:[#allocation4 + $0xc8] sm:$0xff]  ;;  %4654 = vst.msk [vmem:[%s7573_s24 + $0x90] sm:$0xff] %vm793_vm3, %v7710_v58  ;;  %4147 = vst.msk [vmem:[#allocation4 + $0xe8] sm:$0xff] %vm793_vm3, %v4115_v5  ;;  %v4114_v48 = vadd.f32 %v4082_v24, %v4035_v40 }
 0x21b   : > { %v4479_v14 = vpop.f32.mrf.mxu0  ;;  %4594 = vst.msk [vmem:[#allocation4 + $0xb0] sm:$0xff] %vm793_vm3, %v4562_v22  ;;  %v4565_v8 = vadd.f32 %v6060_v45, %v4533_v62  ;;  %v7717_v49 = vld [vmem:[#allocation4 + $0xa8] sm:$0xff]  ;;  %v6019_v28 = vpop.f32.mrf.mxu1 }
 0x21c   : > { %v4532_v21 = vld [vmem:[#allocation4 + $0xc0] sm:$0xff]  ;;  %4657 = vst.msk [vmem:[%s7573_s24 + $0xa8] sm:$0xff] %vm793_vm3, %v7717_v49  ;;  %4146 = vst.msk [vmem:[#allocation4 + $0xe0] sm:$0xff] %vm793_vm3, %v4114_v48  ;;  %v4117_v17 = vadd.f32 %v6019_v28, %v4085_v1 }
 0x21d   : > { %v6066_v34 = vpop.f32.mrf.mxu0  ;;  %4597 = vst.msk [vmem:[#allocation4 + $0xc8] sm:$0xff] %vm793_vm3, %v4565_v8  ;;  %v4564_v23 = vadd.f32 %v4532_v21, %v4469_v63  ;;  %v7724_v42 = vld [vmem:[#allocation4 + $0xa0] sm:$0xff]  ;;  %v4045_v33 = vpop.f32.mrf.mxu1 }
 0x21e   : > { %v4535_v32 = vld [vmem:[#allocation4 + $0xd8] sm:$0xff]  ;;  %4656 = vst.msk [vmem:[%s7573_s24 + $0xa0] sm:$0xff] %vm793_vm3, %v7724_v42  ;;  %4149 = vst.msk [vmem:[#allocation4 + $0xf8] sm:$0xff] %vm793_vm3, %v4117_v17  ;;  %v4116_v13 = vadd.f32 %v4084_v6, %v4045_v33 }
 0x21f   : > { %4596 = vst.msk [vmem:[#allocation4 + $0xc0] sm:$0xff] %vm793_vm3, %v4564_v23  ;;  %v4567_v11 = vadd.f32 %v6063_v18, %v4535_v32  ;;  %v7731_v35 = vld [vmem:[#allocation4 + $0xb8] sm:$0xff]  ;;  %v4489_v43 = vpop.f32.mrf.mxu0 }
 0x220   : > { %v4534_v41 = vld [vmem:[#allocation4 + $0xd0] sm:$0xff]  ;;  %4659 = vst.msk [vmem:[%s7573_s24 + $0xb8] sm:$0xff] %vm793_vm3, %v7731_v35  ;;  %4148 = vst.msk [vmem:[#allocation4 + $0xf0] sm:$0xff] %vm793_vm3, %v4116_v13 }
 0x221   : > { %4599 = vst.msk [vmem:[#allocation4 + $0xd8] sm:$0xff] %vm793_vm3, %v4567_v11  ;;  %v4566_v7 = vadd.f32 %v4534_v41, %v4479_v14  ;;  %v4537_v38 = vld [vmem:[#allocation4 + $0xe8] sm:$0xff]  ;;  %v6069_v55 = vpop.f32.mrf.mxu0 }
 0x222   : > { %v7738_v12 = vld [vmem:[#allocation4 + $0xb0] sm:$0xff]  ;;  %v4569_v31 = vadd.f32 %v6066_v34, %v4537_v38 }
 0x223   : > { %4658 = vst.msk [vmem:[%s7573_s24 + $0xb0] sm:$0xff] %vm793_vm3, %v7738_v12  ;;  %4598 = vst.msk [vmem:[#allocation4 + $0xd0] sm:$0xff] %vm793_vm3, %v4566_v7  ;;  %v4536_v29 = vld [vmem:[#allocation4 + $0xe0] sm:$0xff]  ;;  %v4499_v39 = vpop.f32.mrf.mxu0 }
 0x224   : > { %v7744_v45 = vld [vmem:[#allocation4 + $0xc8] sm:$0xff]  ;;  %4601 = vst.msk [vmem:[#allocation4 + $0xe8] sm:$0xff] %vm793_vm3, %v4569_v31  ;;  %v4568_v15 = vadd.f32 %v4536_v29, %v4489_v43 }
 0x225   : > { %4661 = vst.msk [vmem:[%s7573_s24 + $0xc8] sm:$0xff] %vm793_vm3, %v7744_v45  ;;  %v4539_v53 = vld [vmem:[#allocation4 + $0xf8] sm:$0xff] }
 0x226   : > { %v7750_v36 = vld [vmem:[#allocation4 + $0xc0] sm:$0xff]  ;;  %4600 = vst.msk [vmem:[#allocation4 + $0xe0] sm:$0xff] %vm793_vm3, %v4568_v15  ;;  %v4571_v63 = vadd.f32 %v6069_v55, %v4539_v53 }
 0x227   : > { %4660 = vst.msk [vmem:[%s7573_s24 + $0xc0] sm:$0xff] %vm793_vm3, %v7750_v36  ;;  %v4538_v61 = vld [vmem:[#allocation4 + $0xf0] sm:$0xff] }
 0x228   : > { %v7756_v9 = vld [vmem:[#allocation4 + $0xd8] sm:$0xff]  ;;  %4603 = vst.msk [vmem:[#allocation4 + $0xf8] sm:$0xff] %vm793_vm3, %v4571_v63  ;;  %v4570_v60 = vadd.f32 %v4538_v61, %v4499_v39 }
 0x229   : > { %4663 = vst.msk [vmem:[%s7573_s24 + $0xd8] sm:$0xff] %vm793_vm3, %v7756_v9 }
 0x22a   : > { %v7762_v3 = vld [vmem:[#allocation4 + $0xd0] sm:$0xff]  ;;  %4602 = vst.msk [vmem:[#allocation4 + $0xf0] sm:$0xff] %vm793_vm3, %v4570_v60 }
 0x22b   : > { %4662 = vst.msk [vmem:[%s7573_s24 + $0xd0] sm:$0xff] %vm793_vm3, %v7762_v3  ;;  %v7768_v18 = vld [vmem:[#allocation4 + $0xe8] sm:$0xff] }
 0x22c   : > { %4665 = vst.msk [vmem:[%s7573_s24 + $0xe8] sm:$0xff] %vm793_vm3, %v7768_v18 }
 0x22d   : > { %v7773_v47 = vld [vmem:[#allocation4 + $0xe0] sm:$0xff] }
 0x22e   : > { %4664 = vst.msk [vmem:[%s7573_s24 + $0xe0] sm:$0xff] %vm793_vm3, %v7773_v47  ;;  %4671 = sbr.rel (%p5314_p5) target bundleno = 565 (0x235), region = 32 }
 0x22f   : > { %v7778_v51 = vld [vmem:[#allocation4 + $0xf8] sm:$0xff] }
 0x230   : > { %4667 = vst.msk [vmem:[%s7573_s24 + $0xf8] sm:$0xff] %vm793_vm3, %v7778_v51 }
 0x231   : > { %v7783_v10 = vld [vmem:[#allocation4 + $0xf0] sm:$0xff] }
 0x232   : > { %4666 = vst.msk [vmem:[%s7573_s24 + $0xf0] sm:$0xff] %vm793_vm3, %v7783_v10 }
 0x233   : > { %vm4672_vm4 = vcmask 57344   ;;  %v6193_v22 = vmov 0.0  }
 0x234   : > { %4673 = vst.msk [vmem:[#allocation5] sm:$0x1] %vm4672_vm4, %v6193_v22  ;;  %4674 = vst.msk [vmem:[#allocation7] sm:$0x1] %vm4672_vm4, %v6193_v22 }
 0x235 PF: > { %v4676_v5 = vsel %vm793_vm3, %v7584_v0, 0.0  ;;  %v4677_v14 = vsel %vm793_vm3, %v7577_v54, 0.0  ;;  %v4679_v62 = vsel %vm793_vm3, %v7598_v59, 0.0  ;;  %v4681_v24 = vsel %vm793_vm3, %v7591_v2, 0.0  ;;  %s6194_s15 = smov [#allocation5]   ;;  %p7950_p6 = scmp.eq.s32.totalorder %s4999_s18, 1 }
 0x236   : > { %v4678_v40 = vadd.f32 %v4677_v14, %v4676_v5  ;;  %v4683_v48 = vsel %vm793_vm3, %v7612_v52, 0.0  ;;  %v4685_v28 = vsel %vm793_vm3, %v7605_v50, 0.0  ;;  %v4687_v34 = vsel %vm793_vm3, %v7626_v19, 0.0  ;;  %s4872_s25 = sshll.u32 %s6194_s15, 4  ;;  %s4873_s25 = int_to_ptr.vmem [resolvable:$true] %s4872_s25 }
 0x237   : > { %v4689_v17 = vsel %vm793_vm3, %v7619_v37, 0.0  ;;  %v4691_v33 = vsel %vm793_vm3, %v7640_v46, 0.0  ;;  %v4693_v11 = vsel %vm793_vm3, %v7633_v20, 0.0  ;;  %v4749_v13 = vmul.f32 %v7584_v0, %v7584_v0  ;;  %s6112_s27 = scalar_lea.vmem %s4873_s25, 16  ;;  %s6118_s28 = scalar_lea.vmem %s4873_s25, 32 }
 0x238   : > { %v4680_v8 = vadd.f32 %v4679_v62, %v4678_v40  ;;  %v4750_v41 = vmul.f32 %v7577_v54, %v7577_v54  ;;  %v4751_v7 = vmul.f32 %v7598_v59, %v7598_v59  ;;  %v4695_v38 = vsel %vm793_vm3, %v7654_v57, 0.0  ;;  %p6113_p7 = scmp.ne.s32.totalorder %s4873_s25, %s6112_s27  ;;  %p6119_p10 = scmp.lt.s32.totalorder %s4873_s25, %s4873_s25 }
 0x239   : > { %v4752_v31 = vmul.f32 %v7591_v2, %v7591_v2  ;;  %v4697_v55 = vsel %vm793_vm3, %v7647_v44, 0.0  ;;  %v4753_v0 = vmul.f32 %v7612_v52, %v7612_v52  ;;  %v4781_v15 = vsel %vm793_vm3, %v4749_v13, 0.0  ;;  %p6120_p11 = scmp.lt.s32.totalorder %s6118_s28, %s6112_s27 }
 0x23a   : > { %v4682_v21 = vadd.f32 %v4681_v24, %v4680_v8  ;;  %v4782_v54 = vsel %vm793_vm3, %v4750_v41, 0.0  ;;  %v4784_v59 = vsel %vm793_vm3, %v4751_v7, 0.0  ;;  %v4699_v39 = vsel %vm793_vm3, %v7668_v30, 0.0  ;;  %p6114_p8 = pnand %p6113_p7, %p7950_p6 }
 0x23b   : > { %v4783_v63 = vadd.f32 %v4782_v54, %v4781_v15  ;;  %v4754_v2 = vmul.f32 %v7605_v50, %v7605_v50  ;;  %v4786_v61 = vsel %vm793_vm3, %v4752_v31, 0.0  ;;  %v4701_v52 = vsel %vm793_vm3, %v7661_v16, 0.0  ;;  %p6121_p12 = por %p6120_p11, %p6119_p10 }
 0x23c   : > { %v4684_v1 = vadd.f32 %v4683_v48, %v4682_v21  ;;  %v4755_v5 = vmul.f32 %v7626_v19, %v7626_v19  ;;  %v4788_v14 = vsel %vm793_vm3, %v4753_v0, 0.0  ;;  %v4703_v24 = vsel %vm793_vm3, %v7682_v25, 0.0  ;;  %p6115_p9 = pneg %p6114_p8 }
 0x23d   : > { %v4785_v22 = vadd.f32 %v4784_v59, %v4783_v63  ;;  %v4756_v50 = vmul.f32 %v7619_v37, %v7619_v37  ;;  %v4790_v8 = vsel %vm793_vm3, %v4754_v2, 0.0  ;;  %v4757_v19 = vmul.f32 %v7640_v46, %v7640_v46 }
 0x23e   : > { %v4686_v23 = vadd.f32 %v4685_v28, %v4684_v1  ;;  %v4705_v28 = vsel %vm793_vm3, %v7675_v26, 0.0  ;;  %v4792_v1 = vsel %vm793_vm3, %v4755_v5, 0.0  ;;  %v4758_v37 = vmul.f32 %v7633_v20, %v7633_v20  ;;  %p6122_p13 = pnand %p6121_p12, %p6115_p9 }
 0x23f   : > { %v4787_v40 = vadd.f32 %v4786_v61, %v4785_v22  ;;  %v4759_v46 = vmul.f32 %v7654_v57, %v7654_v57  ;;  %v4796_v13 = vsel %vm793_vm3, %v4757_v19, 0.0  ;;  %v4711_v7 = vsel %vm793_vm3, %v7710_v58, 0.0 }
 0x240   : > { %v4688_v32 = vadd.f32 %v4687_v34, %v4686_v23  ;;  %v4760_v20 = vmul.f32 %v7647_v44, %v7647_v44  ;;  %v4761_v57 = vmul.f32 %v7668_v30, %v7668_v30  ;;  %v4762_v44 = vmul.f32 %v7661_v16, %v7661_v16 }
 0x241   : > { %v4789_v21 = vadd.f32 %v4788_v14, %v4787_v40  ;;  %v4800_v0 = vsel %vm793_vm3, %v4759_v46, 0.0  ;;  %v4717_v2 = vsel %vm793_vm3, %v7717_v49, 0.0  ;;  %v4763_v30 = vmul.f32 %v7682_v25, %v7682_v25 }
 0x242   : > { %v4690_v6 = vadd.f32 %v4689_v17, %v4688_v32  ;;  %v4707_v17 = vsel %vm793_vm3, %v7696_v56, 0.0  ;;  %v4794_v32 = vsel %vm793_vm3, %v4756_v50, 0.0  ;;  %v4802_v63 = vsel %vm793_vm3, %v4760_v20, 0.0 }
 0x243   : > { %v4791_v23 = vadd.f32 %v4790_v8, %v4789_v21  ;;  %v4804_v61 = vsel %vm793_vm3, %v4761_v57, 0.0  ;;  %v4764_v16 = vmul.f32 %v7675_v26, %v7675_v26  ;;  %v4806_v5 = vsel %vm793_vm3, %v4762_v44, 0.0 }
 0x244   : > { %v4692_v43 = vadd.f32 %v4691_v33, %v4690_v6  ;;  %v4721_v40 = vsel %vm793_vm3, %v7731_v35, 0.0  ;;  %v4765_v25 = vmul.f32 %v7696_v56, %v7696_v56  ;;  %v4766_v26 = vmul.f32 %v7689_v27, %v7689_v27 }
 0x245   : > { %v4793_v6 = vadd.f32 %v4792_v1, %v4791_v23  ;;  %v4810_v21 = vsel %vm793_vm3, %v4764_v16, 0.0  ;;  %v4725_v1 = vsel %vm793_vm3, %v7744_v45, 0.0  ;;  %v4767_v56 = vmul.f32 %v7710_v58, %v7710_v58 }
 0x246   : > { %v4694_v29 = vadd.f32 %v4693_v11, %v4692_v43  ;;  %v4709_v11 = vsel %vm793_vm3, %v7689_v27, 0.0  ;;  %v4768_v27 = vmul.f32 %v7703_v4, %v7703_v4  ;;  %v4769_v58 = vmul.f32 %v7724_v42, %v7724_v42 }
 0x247   : > { %v4795_v43 = vadd.f32 %v4794_v32, %v4793_v6  ;;  %v4814_v32 = vsel %vm793_vm3, %v4766_v26, 0.0  ;;  %v4816_v46 = vsel %vm793_vm3, %v4767_v56, 0.0  ;;  %v4737_v44 = vsel %vm793_vm3, %v7778_v51, 0.0 }
 0x248   : > { %v4696_v53 = vadd.f32 %v4695_v38, %v4694_v29  ;;  %v4798_v38 = vsel %vm793_vm3, %v4758_v37, 0.0  ;;  %v4727_v37 = vsel %vm793_vm3, %v7762_v3, 0.0  ;;  %vm4746_vm5 = vcmask 57344  }
 0x249   : > { %v4797_v29 = vadd.f32 %v4796_v13, %v4795_v43  ;;  %v4731_v43 = vsel %vm793_vm3, %v7773_v47, 0.0 }
 0x24a   : > { %v4698_v60 = vadd.f32 %v4697_v55, %v4696_v53  ;;  %v4713_v55 = vsel %vm793_vm3, %v7703_v4, 0.0  ;;  %v4715_v53 = vsel %vm793_vm3, %v7724_v42, 0.0  ;;  %v4770_v4 = vmul.f32 %v7717_v49, %v7717_v49 }
 0x24b   : > { %v4799_v54 = vadd.f32 %v4798_v38, %v4797_v29  ;;  %v4771_v42 = vmul.f32 %v7738_v12, %v7738_v12  ;;  %v4820_v29 = vsel %vm793_vm3, %v4769_v58, 0.0  ;;  %v4772_v49 = vmul.f32 %v7731_v35, %v7731_v35 }
 0x24c   : > { %v4700_v62 = vadd.f32 %v4699_v39, %v4698_v60 }
 0x24d   : > { %v4801_v39 = vadd.f32 %v4800_v0, %v4799_v54  ;;  %v4735_v0 = vsel %vm793_vm3, %v7783_v10, 0.0 }
 0x24e   : > { %v4702_v48 = vadd.f32 %v4701_v52, %v4700_v62  ;;  %v4719_v52 = vsel %vm793_vm3, %v7738_v12, 0.0  ;;  %v4773_v12 = vmul.f32 %v7750_v36, %v7750_v36 }
 0x24f   : > { %v4803_v22 = vadd.f32 %v4802_v63, %v4801_v39  ;;  %v4824_v63 = vsel %vm793_vm3, %v4771_v42, 0.0 }
 0x250   : > { %v4704_v34 = vadd.f32 %v4703_v24, %v4702_v48  ;;  %v4808_v24 = vsel %vm793_vm3, %v4763_v30, 0.0  ;;  %v4723_v48 = vsel %vm793_vm3, %v7750_v36, 0.0  ;;  %v4826_v30 = vsel %vm793_vm3, %v4772_v49, 0.0 }
 0x251   : > { %v4805_v62 = vadd.f32 %v4804_v61, %v4803_v22  ;;  %v4828_v22 = vsel %vm793_vm3, %v4773_v12, 0.0  ;;  %v4776_v36 = vmul.f32 %v7756_v9, %v7756_v9 }
 0x252   : > { %v4706_v33 = vadd.f32 %v4705_v28, %v4704_v34  ;;  %v4812_v34 = vsel %vm793_vm3, %v4765_v25, 0.0 }
 0x253   : > { %v4807_v8 = vadd.f32 %v4806_v5, %v4805_v62 }
 0x254   : > { %v4708_v41 = vadd.f32 %v4707_v17, %v4706_v33 }
 0x255   : > { %v4809_v19 = vadd.f32 %v4808_v24, %v4807_v8 }
 0x256   : > { %v4710_v31 = vadd.f32 %v4709_v11, %v4708_v41  ;;  %v4729_v11 = vsel %vm793_vm3, %v7756_v9, 0.0  ;;  %v4779_v9 = vmul.f32 %v7783_v10, %v7783_v10 }
 0x257   : > { %v4811_v17 = vadd.f32 %v4810_v21, %v4809_v19  ;;  %v4780_v19 = vmul.f32 %v7778_v51, %v7778_v51 }
 0x258   : > { %v4712_v15 = vadd.f32 %v4711_v7, %v4710_v31  ;;  %v4818_v7 = vsel %vm793_vm3, %v4768_v27, 0.0  ;;  %v4733_v31 = vsel %vm793_vm3, %v7768_v18, 0.0 }
 0x259   : > { %v4813_v6 = vadd.f32 %v4812_v34, %v4811_v17  ;;  %v4840_v34 = vsel %vm793_vm3, %v4779_v9, 0.0  ;;  %v4842_v51 = vsel %vm793_vm3, %v4780_v19, 0.0 }
 0x25a   : > { %v4714_v59 = vadd.f32 %v4713_v55, %v4712_v15  ;;  %v4822_v15 = vsel %vm793_vm3, %v4770_v4, 0.0 }
 0x25b   : > { %v4815_v41 = vadd.f32 %v4814_v32, %v4813_v6 }
 0x25c   : > { %v4716_v60 = vadd.f32 %v4715_v53, %v4714_v59 }
 0x25d   : > { %v4817_v38 = vadd.f32 %v4816_v46, %v4815_v41 }
 0x25e   : > { %v4718_v14 = vadd.f32 %v4717_v2, %v4716_v60  ;;  %v4774_v2 = vmul.f32 %v7744_v45, %v7744_v45  ;;  %v4775_v60 = vmul.f32 %v7762_v3, %v7762_v3  ;;  %v4777_v45 = vmul.f32 %v7773_v47, %v7773_v47  ;;  %v4675_v47 = vld [vmem:[#allocation5] sm:$0x1] }
 0x25f   : > { %v4819_v57 = vadd.f32 %v4818_v7, %v4817_v38  ;;  %v4778_v3 = vmul.f32 %v7768_v18, %v7768_v18 }
 0x260   : > { %v4720_v50 = vadd.f32 %v4719_v52, %v4718_v14  ;;  %v4830_v5 = vsel %vm793_vm3, %v4774_v2, 0.0  ;;  %v4836_v26 = vsel %vm793_vm3, %v4777_v45, 0.0 }
 0x261   : > { %v4821_v53 = vadd.f32 %v4820_v29, %v4819_v57 }
 0x262   : > { %v4722_v28 = vadd.f32 %v4721_v40, %v4720_v50  ;;  %v4832_v40 = vsel %vm793_vm3, %v4775_v60, 0.0  ;;  %v4834_v50 = vsel %vm793_vm3, %v4776_v36, 0.0 }
 0x263   : > { %v4823_v39 = vadd.f32 %v4822_v15, %v4821_v53 }
 0x264   : > { %v4724_v23 = vadd.f32 %v4723_v48, %v4722_v28 }
 0x265   : > { %v4825_v61 = vadd.f32 %v4824_v63, %v4823_v39 }
 0x266   : > { %v4726_v33 = vadd.f32 %v4725_v1, %v4724_v23  ;;  %v4838_v1 = vsel %vm793_vm3, %v4778_v3, 0.0 }
 0x267   : > { %v4827_v16 = vadd.f32 %v4826_v30, %v4825_v61 }
 0x268   : > { %v4728_v13 = vadd.f32 %v4727_v37, %v4726_v33 }
 0x269   : > { %v4829_v62 = vadd.f32 %v4828_v22, %v4827_v16 }
 0x26a   : > { %v4730_v20 = vadd.f32 %v4729_v11, %v4728_v13 }
 0x26b   : > { %v4831_v24 = vadd.f32 %v4830_v5, %v4829_v62 }
 0x26c   : > { %v4732_v55 = vadd.f32 %v4731_v43, %v4730_v20 }
 0x26d   : > { %v4833_v48 = vadd.f32 %v4832_v40, %v4831_v24 }
 0x26e   : > { %v4734_v54 = vadd.f32 %v4733_v31, %v4732_v55 }
 0x26f   : > { %v4835_v28 = vadd.f32 %v4834_v50, %v4833_v48 }
 0x270   : > { %v4736_v59 = vadd.f32 %v4735_v0, %v4734_v54 }
 0x271   : > { %v4837_v56 = vadd.f32 %v4836_v26, %v4835_v28 }
 0x272   : > { %v4738_v35 = vadd.f32 %v4737_v44, %v4736_v59 }
 0x273   : > { %v4839_v23 = vadd.f32 %v4838_v1, %v4837_v56 }
 0x274   : > { %v4739_v52 = vrot.slane %v4738_v35, 4 }
 0x275   : > { %v4841_v17 = vadd.f32 %v4840_v34, %v4839_v23 }
 0x276   : > { %v4740_v14 = vadd.f32 %v4739_v52, %v4738_v35 }
 0x278   : > { %v4741_v25 = vrot.slane %v4740_v14, 2 }
 0x27a   : > { %v4742_v8 = vadd.f32 %v4741_v25, %v4740_v14 }
 0x27c   : > { %v4743_v21 = vrot.slane %v4742_v8, 1 }
 0x27e   : > { %v4744_v18 = vadd.f32 %v4743_v21, %v4742_v8 }
 0x280   : > { %v4745_v10 = vadd.f32 %v4744_v18, %v4675_v47 }
 0x282   : > { %4747 = vst.msk [vmem:[#allocation5] sm:$0x1] %vm4746_vm5, %v4745_v10 }
 0x283   : > { %6125 = shalt.err (!%p6122_p13)
}
 0x284   : > { %6073 = dma.vmem_to_hbm [thread:$0]  (%p7950_p6), %s4873_s25, 16, %s7991_s3, [#allocation6]   ;;  %v4843_v37 = vadd.f32 %v4842_v51, %v4841_v17  ;;  %v4748_v58 = vld [vmem:[#allocation7] sm:$0x1] }
 0x285   : > { %s6195_s30 = smov [#allocation7]  }
 0x286   : > { %v4844_v27 = vrot.slane %v4843_v37, 4  ;;  %s4885_s5 = sshll.u32 %s6195_s30, 4  ;;  %s4886_s5 = int_to_ptr.vmem [resolvable:$true] %s4885_s5 }
 0x287   : > { %s6136_s6 = scalar_lea.vmem %s4886_s5, 16  ;;  %s6142_s7 = scalar_lea.vmem %s4886_s5, 32 }
 0x288   : > { %v4845_v32 = vadd.f32 %v4844_v27, %v4843_v37  ;;  %p6137_p0 = scmp.ne.s32.totalorder %s4886_s5, %s6136_s6  ;;  %p6143_p3 = scmp.lt.s32.totalorder %s4886_s5, %s4886_s5 }
 0x289   : > { %p6144_p4 = scmp.lt.s32.totalorder %s6142_s7, %s6136_s6 }
 0x28a   : > { %v4846_v33 = vrot.slane %v4845_v32, 2  ;;  %p6138_p1 = pnand %p6137_p0, %p7950_p6 }
 0x28b   : > { %p6145_p5 = por %p6144_p4, %p6143_p3 }
 0x28c   : > { %v4847_v6 = vadd.f32 %v4846_v33, %v4845_v32  ;;  %p6139_p2 = pneg %p6138_p1 }
 0x28e   : > { %v4848_v11 = vrot.slane %v4847_v6, 1  ;;  %p6146_p7 = pnand %p6145_p5, %p6139_p2 }
 0x290   : > { %v4849_v46 = vadd.f32 %v4848_v11, %v4847_v6 }
 0x292   : > { %v4850_v13 = vadd.f32 %v4849_v46, %v4748_v58 }
 0x294   : > { %4851 = vst.msk [vmem:[#allocation7] sm:$0x1] %vm4746_vm5, %v4850_v13 }
 0x295   : > { %6149 = shalt.err (!%p6146_p7)
}
 0x296   : > { %6075 = dma.vmem_to_hbm [thread:$0]  (%p7950_p6), %s4886_s5, 16, %s7992_s4, [#allocation8]  }
 0x297   : > { %6173 = dma.done.wait (%p7950_p6), [#allocation6], 16  }
 0x298   : > { %6175 = vsyncadd (%p7950_p6), [#allocation6], 4294967280 }
 0x299   : > { %6177 = dma.done.wait (%p7950_p6), [#allocation8], 16  }
 0x29a   : > { %6179 = vsyncadd (%p7950_p6), [#allocation8], 4294967280 }
 0x29b PF: > { %s17_s17 = sadd.s32 1, %s6190_s17   ;;  %s7994_s15 = smov %s6186_s16 }
 0x29c   : > { %p14_p8 = scmp.ge.s32.totalorder %s17_s17, 4   ;;  %s7995_s16 = smov %s7997_s19 }
 0x29e   :  { %16 = sbr.rel (!%p14_p8) target bundleno = 3 (0x3), region = 95 }
 0x2a3   :  { %4913 = vsyncpa [#allocation6], 1 }
 0x2a4   :  { %4915 = vsyncpa [#allocation6 + $0x1], 1 }
 0x2a5   :  { %4916 = vsyncpa [#allocation8], 1 }

</bundles_post_ra>
